<compile_context>
chip_gen: v7x
topology: tpu7x:2x2x1
jax: 0.10.0
libtpu: 0.0.40
codegen_flags: <defaults>
</compile_context>

<pallas_src>
import functools

import jax
import jax.numpy as jnp
from jax.experimental import pallas as pl
from jax.experimental.pallas import tpu as pltpu


# -----------------------------------------------------------------------------
# Fused forward kernel (one image per grid step).
# -----------------------------------------------------------------------------
def _qfunction_kernel(p1_ref, w1_ref, b1_ref, w2_ref, b2_ref, w3_ref, b3_ref,
                      wf1_ref, bf1_ref, wf2_ref, bf2_ref, out_ref):
    f32 = jnp.float32
    bf16 = jnp.bfloat16

    # ---- conv1 (k=8, s=4): one bf16 MXU matmul on pre-gathered patches ------
    # Patch rows are (h, m) with paired output columns w = 2m + u; result lanes
    # are (u, cout):  a1[h*16 + m, u*32 + c] == relu(conv1)[h, 2m + u, c].
    a1 = jnp.dot(p1_ref[0], w1_ref[...], preferred_element_type=f32)
    a1 = jnp.maximum(a1 + b1_ref[...], 0.0)              # (384, 64) f32
    # Split rows into (h//2, h%2, m): pure leading/sublane-tile relabel (16%8==0).
    a1 = a1.reshape(12, 2, 16, 64)                       # (h//2, h%2, m, u*32+c)

    # ---- conv2 (k=4, s=2): 8 contiguous taps -> one bf16 MXU matmul ---------
    # di = 2*qh + ph, dj = 2*rw + uw;
    #   relu1[2*oh+di, 2*ow+dj, cin] == a1[oh+qh, ph, ow+rw, uw*32+cin]
    taps2 = []
    for qh in range(2):
        for ph in range(2):
            for rw in range(2):
                taps2.append(a1[qh:qh + 10, ph, rw:rw + 10, :])   # (10, 10, 64)
    p2 = jnp.concatenate(taps2, axis=-1)                 # (10, 10, 512); K=(di,dj,cin)
    p2 = jnp.concatenate(                                # pad width 10 -> 16 so the
        [p2, jnp.zeros((10, 6, 512), f32)], axis=1)      # 2-D view is a tile relabel
    p2 = p2.reshape(160, 512).astype(bf16)
    a2 = jnp.dot(p2, w2_ref[...], preferred_element_type=f32)
    a2 = jnp.maximum(a2 + b2_ref[...], 0.0)              # (160, 64)
    a2 = a2.reshape(10, 16, 64)                          # (h2, w2 padded, cout)

    # ---- conv3 (k=3, s=1): 9 contiguous taps -> one bf16 MXU matmul ---------
    taps3 = []
    for di in range(3):
        for dj in range(3):
            taps3.append(a2[di:di + 8, dj:dj + 8, :])    # (8, 8, 64)
    p3 = jnp.concatenate(taps3, axis=-1)                 # (8, 8, 576); K=(di,dj,cin)
    p3 = p3.reshape(64, 576).astype(bf16)
    a3 = jnp.dot(p3, w3_ref[...], preferred_element_type=f32)
    a3 = jnp.maximum(a3 + b3_ref[...], 0.0)              # (64, 64); row = h3*8 + w3

    # ---- flatten in (h, w, c) order via row slices + lane concat ------------
    # (The NCHW-flatten permutation lives in wf1's row order, packed once in
    #  the wrapper, so no activation transpose / exotic reshape is needed.)
    flat = jnp.concatenate([a3[s:s + 1, :] for s in range(64)], axis=-1)
    flat = flat.astype(bf16)                             # (1, 4096)

    # ---- fc1 + ReLU, fc2 (f32 epilogues; lane-dense 128-wide final store) ---
    h = jnp.dot(flat, wf1_ref[...], preferred_element_type=f32)
    h = jnp.maximum(h + bf1_ref[...], 0.0)               # (1, hidden)
    o = jnp.dot(h, wf2_ref[...], preferred_element_type=f32) + bf2_ref[...]
    out_ref[0] = o                                       # (1, 128), unmasked vst


# -----------------------------------------------------------------------------
# Wrapper-side conv1 patch gather (raw input only; paired output columns so the
# kernel never needs strided slices).
# -----------------------------------------------------------------------------
def _conv1_paired_patches(x):
    """Returns (B, 24*16, 96*C) bf16 with
       patches[b, h*16 + m, (di*12 + e)*C + c] = x[b, 4h + di, 8m + e, c]
    (h padded 23->24, m padded 12->16, input width zero-padded 96->100)."""
    B, H, W, C = x.shape
    xp = jnp.pad(x, ((0, 0), (0, 0), (0, 4), (0, 0)))            # width 96 -> 100
    cols = []
    for di in range(8):
        for e in range(12):
            cols.append(xp[:, di:di + 89:4, e:e + 89:8, :])      # (B, 23, 12, C)
    p1 = jnp.concatenate(cols, axis=-1)                          # (B, 23, 12, 96C)
    p1 = jnp.pad(p1, ((0, 0), (0, 1), (0, 4), (0, 0)))           # (B, 24, 16, 96C)
    return p1.reshape(B, 24 * 16, 96 * C).astype(jnp.bfloat16)


# -----------------------------------------------------------------------------
# Parameter construction (natural HWIO layout) + one-time packing into the
# kernel's layouts (paired conv1 weight, bf16 matmul operands, lane-padded fc2).
# -----------------------------------------------------------------------------
def init_qfunction_params(key, input_channels, hidden_dim, output_dim):
    ks = jax.random.split(key, 10)

    def u(k, shape, fan_in):
        bound = 1.0 / jnp.sqrt(jnp.float32(fan_in))
        return jax.random.uniform(k, shape, jnp.float32, -bound, bound)

    p = {}
    p["w1"] = u(ks[0], (8, 8, input_channels, 32), input_channels * 64)
    p["b1"] = u(ks[1], (32,), input_channels * 64)
    p["w2"] = u(ks[2], (4, 4, 32, 64), 32 * 16)
    p["b2"] = u(ks[3], (64,), 32 * 16)
    p["w3"] = u(ks[4], (3, 3, 64, 64), 64 * 9)
    p["b3"] = u(ks[5], (64,), 64 * 9)
    conv_out = 8 * 8 * 64                                 # 96x96 -> 23 -> 10 -> 8
    p["wf1"] = u(ks[6], (conv_out, hidden_dim), conv_out)  # rows in (h, w, c) order
    p["bf1"] = u(ks[7], (hidden_dim,), conv_out)
    p["wf2"] = u(ks[8], (hidden_dim, output_dim), hidden_dim)
    p["bf2"] = u(ks[9], (output_dim,), hidden_dim)
    return p


def pack_params(params, hidden_dim, output_dim):
    C = params["w1"].shape[2]
    f32, bf16 = jnp.float32, jnp.bfloat16

    # conv1: paired-output-column weight.  Row (di, e, c) multiplies
    # x[4h+di, 8m+e, c]; column u*32+co produces output (h, 2m+u, co), i.e. the
    # even/odd output columns use taps at e = dj and e = dj + 4.
    w1 = params["w1"]                                     # (8, 8, C, 32)
    w1p = jnp.zeros((8, 12, C, 2, 32), f32)
    w1p = w1p.at[:, 0:8, :, 0, :].set(w1)
    w1p = w1p.at[:, 4:12, :, 1, :].set(w1)
    w1p = w1p.reshape(8 * 12 * C, 64).astype(bf16)
    b1p = jnp.concatenate([params["b1"], params["b1"]]).reshape(1, 64)

    # conv2 / conv3: the in-kernel tap order reproduces the natural (di,dj,cin)
    # ordering, so plain reshapes of the HWIO weights suffice.
    w2m = params["w2"].reshape(4 * 4 * 32, 64).astype(bf16)
    w3m = params["w3"].reshape(3 * 3 * 64, 64).astype(bf16)

    # fc2: pad the tiny output dim to 128 lanes; wrapper slices the logits out.
    wf2 = jnp.zeros((hidden_dim, 128), f32).at[:, :output_dim].set(params["wf2"])
    bf2 = jnp.zeros((1, 128), f32).at[0, :output_dim].set(params["bf2"])

    return {
        "w1p": w1p, "b1p": b1p.astype(f32),
        "w2m": w2m, "b2": params["b2"].reshape(1, 64).astype(f32),
        "w3m": w3m, "b3": params["b3"].reshape(1, 64).astype(f32),
        "wf1": params["wf1"].astype(bf16),
        "bf1": params["bf1"].reshape(1, hidden_dim).astype(f32),
        "wf2": wf2, "bf2": bf2,
    }


# -----------------------------------------------------------------------------
# Full forward pass (single pallas_call).
# -----------------------------------------------------------------------------
def qfunction_forward(packed, x, *, output_dim):
    B = x.shape[0]
    p1 = _conv1_paired_patches(x)                         # (B, 384, 96*C) bf16
    k1 = p1.shape[2]
    hid = packed["wf1"].shape[1]
    nout = packed["wf2"].shape[1]                         # 128 (lane-padded)

    out = pl.pallas_call(
        _qfunction_kernel,
        out_shape=jax.ShapeDtypeStruct((B, 1, nout), jnp.float32),
        grid_spec=pltpu.PrefetchScalarGridSpec(
            num_scalar_prefetch=0,
            grid=(B,),
            in_specs=[
                pl.BlockSpec((1, 384, k1), lambda b: (b, 0, 0)),   # conv1 patches
                pl.BlockSpec((k1, 64), lambda b: (0, 0)),          # w1 (paired)
                pl.BlockSpec((1, 64), lambda b: (0, 0)),           # b1 (paired)
                pl.BlockSpec((512, 64), lambda b: (0, 0)),         # w2
                pl.BlockSpec((1, 64), lambda b: (0, 0)),           # b2
                pl.BlockSpec((576, 64), lambda b: (0, 0)),         # w3
                pl.BlockSpec((1, 64), lambda b: (0, 0)),           # b3
                pl.BlockSpec((4096, hid), lambda b: (0, 0)),       # wf1
                pl.BlockSpec((1, hid), lambda b: (0, 0)),          # bf1
                pl.BlockSpec((hid, nout), lambda b: (0, 0)),       # wf2 (padded)
                pl.BlockSpec((1, nout), lambda b: (0, 0)),         # bf2 (padded)
            ],
            out_specs=pl.BlockSpec((1, 1, nout), lambda b: (b, 0, 0)),
        ),
        compiler_params=pltpu.CompilerParams(
            dimension_semantics=("parallel",)),           # v7x: image per core
    )(p1, packed["w1p"], packed["b1p"], packed["w2m"], packed["b2"],
      packed["w3m"], packed["b3"], packed["wf1"], packed["bf1"],
      packed["wf2"], packed["bf2"])

    return out.reshape(B, nout)[:, :output_dim]


# -----------------------------------------------------------------------------
# Pure-JAX f32 reference (same semantics as Qfunction.forward).
# -----------------------------------------------------------------------------
def qfunction_reference(params, x):
    dn = ("NHWC", "HWIO", "NHWC")
    hp = jax.lax.Precision.HIGHEST
    h = jax.lax.conv_general_dilated(x, params["w1"], (4, 4), "VALID",
                                     dimension_numbers=dn, precision=hp)
    h = jnp.maximum(h + params["b1"], 0.0)
    h = jax.lax.conv_general_dilated(h, params["w2"], (2, 2), "VALID",
                                     dimension_numbers=dn, precision=hp)
    h = jnp.maximum(h + params["b2"], 0.0)
    h = jax.lax.conv_general_dilated(h, params["w3"], (1, 1), "VALID",
                                     dimension_numbers=dn, precision=hp)
    h = jnp.maximum(h + params["b3"], 0.0)
    h = h.reshape(x.shape[0], -1)                         # (h, w, c) flatten order
    h = jnp.maximum(jnp.dot(h, params["wf1"], precision=hp) + params["bf1"], 0.0)
    return jnp.dot(h, params["wf2"], precision=hp) + params["bf2"]


if __name__ == "__main__":
    key = jax.random.PRNGKey(0)
    k_param, k_x = jax.random.split(key)

    B, C = 2, 4                       # H = W = 96 is required by the module's fc sizing
    hidden_dim, output_dim = 32, 5

    params = init_qfunction_params(k_param, C, hidden_dim, output_dim)
    packed = pack_params(params, hidden_dim, output_dim)
    x = jax.random.normal(k_x, (B, 96, 96, C), jnp.float32)

    fwd = jax.jit(functools.partial(qfunction_forward, output_dim=output_dim))
    out = jax.block_until_ready(fwd(packed, x))
    assert out.shape == (B, output_dim) and out.dtype == jnp.float32

    ref = qfunction_reference(params, x)
    err = float(jnp.max(jnp.abs(out - ref)) / (jnp.max(jnp.abs(ref)) + 1e-6))
    assert err < 0.05, f"numerical mismatch vs f32 reference: {err}"
    print("KERNEL_OK")
</pallas_src>

<mosaic_0001>
module attributes {stable_mosaic.version = 11 : i64} {
  func.func @_qfunction_kernel(%arg0: i32, %arg1: memref<1x384x384xbf16, #tpu.memory_space<vmem>>, %arg2: memref<384x64xbf16, #tpu.memory_space<vmem>>, %arg3: memref<1x64xf32, #tpu.memory_space<vmem>>, %arg4: memref<512x64xbf16, #tpu.memory_space<vmem>>, %arg5: memref<1x64xf32, #tpu.memory_space<vmem>>, %arg6: memref<576x64xbf16, #tpu.memory_space<vmem>>, %arg7: memref<1x64xf32, #tpu.memory_space<vmem>>, %arg8: memref<4096x32xbf16, #tpu.memory_space<vmem>>, %arg9: memref<1x32xf32, #tpu.memory_space<vmem>>, %arg10: memref<32x128xf32, #tpu.memory_space<vmem>>, %arg11: memref<1x128xf32, #tpu.memory_space<vmem>>, %arg12: memref<1x1x128xf32, #tpu.memory_space<vmem>>) attributes {dimension_semantics = [#tpu.dimension_semantics<parallel>], iteration_bounds = array<i64: 2>, scalar_prefetch = 0 : i64, scratch_operands = 0 : i64, tpu.core_type = #tpu.core_type<tc>, window_params = [{transform_indices = @transform_0, window_bounds = array<i64: 1, 384, 384>}, {pipeline_mode = #tpu.pipeline_mode<synchronous>, transform_indices = @transform_1, window_bounds = array<i64: 384, 64>}, {pipeline_mode = #tpu.pipeline_mode<synchronous>, transform_indices = @transform_2, window_bounds = array<i64: 1, 64>}, {pipeline_mode = #tpu.pipeline_mode<synchronous>, transform_indices = @transform_3, window_bounds = array<i64: 512, 64>}, {pipeline_mode = #tpu.pipeline_mode<synchronous>, transform_indices = @transform_4, window_bounds = array<i64: 1, 64>}, {pipeline_mode = #tpu.pipeline_mode<synchronous>, transform_indices = @transform_5, window_bounds = array<i64: 576, 64>}, {pipeline_mode = #tpu.pipeline_mode<synchronous>, transform_indices = @transform_6, window_bounds = array<i64: 1, 64>}, {pipeline_mode = #tpu.pipeline_mode<synchronous>, transform_indices = @transform_7, window_bounds = array<i64: 4096, 32>}, {pipeline_mode = #tpu.pipeline_mode<synchronous>, transform_indices = @transform_8, window_bounds = array<i64: 1, 32>}, {pipeline_mode = #tpu.pipeline_mode<synchronous>, transform_indices = @transform_9, window_bounds = array<i64: 32, 128>}, {pipeline_mode = #tpu.pipeline_mode<synchronous>, transform_indices = @transform_10, window_bounds = array<i64: 1, 128>}, {transform_indices = @transform_11, window_bounds = array<i64: 1, 1, 128>}]} {
    %c0 = arith.constant 0 : index
    %c0_0 = arith.constant 0 : index
    %c0_1 = arith.constant 0 : index
    %0 = vector.load %arg1[%c0, %c0_0, %c0_1] : memref<1x384x384xbf16, #tpu.memory_space<vmem>>, vector<1x384x384xbf16>
    %1 = vector.shape_cast %0 : vector<1x384x384xbf16> to vector<384x384xbf16>
    %c0_2 = arith.constant 0 : index
    %c0_3 = arith.constant 0 : index
    %2 = vector.load %arg2[%c0_2, %c0_3] : memref<384x64xbf16, #tpu.memory_space<vmem>>, vector<384x64xbf16>
    %cst = arith.constant dense<0.000000e+00> : vector<384x64xf32>
    %3 = tpu.matmul %1, %2, %cst {dimension_numbers = #tpu.dot_dimension_numbers<[1], [0], [0], [1], [0, 0, 1, 1], [], []>} : vector<384x384xbf16>, vector<384x64xbf16>, vector<384x64xf32> -> vector<384x64xf32>
    %c0_4 = arith.constant 0 : index
    %c0_5 = arith.constant 0 : index
    %4 = vector.load %arg3[%c0_4, %c0_5] : memref<1x64xf32, #tpu.memory_space<vmem>>, vector<1x64xf32>
    %5 = vector.broadcast %4 : vector<1x64xf32> to vector<384x64xf32>
    %6 = arith.addf %3, %5 : vector<384x64xf32>
    %cst_6 = arith.constant 0.000000e+00 : f32
    %7 = vector.broadcast %cst_6 : f32 to vector<384x64xf32>
    %8 = arith.maximumf %6, %7 : vector<384x64xf32>
    %9 = vector.shape_cast %8 : vector<384x64xf32> to vector<12x2x16x64xf32>
    %10 = vector.extract_strided_slice %9 {offsets = [0, 0, 0, 0], sizes = [10, 1, 10, 64], strides = [1, 1, 1, 1]} : vector<12x2x16x64xf32> to vector<10x1x10x64xf32>
    %11 = vector.shape_cast %10 : vector<10x1x10x64xf32> to vector<10x10x64xf32>
    %12 = vector.extract_strided_slice %9 {offsets = [0, 0, 1, 0], sizes = [10, 1, 10, 64], strides = [1, 1, 1, 1]} : vector<12x2x16x64xf32> to vector<10x1x10x64xf32>
    %13 = vector.shape_cast %12 : vector<10x1x10x64xf32> to vector<10x10x64xf32>
    %14 = vector.extract_strided_slice %9 {offsets = [0, 1, 0, 0], sizes = [10, 1, 10, 64], strides = [1, 1, 1, 1]} : vector<12x2x16x64xf32> to vector<10x1x10x64xf32>
    %15 = vector.shape_cast %14 : vector<10x1x10x64xf32> to vector<10x10x64xf32>
    %16 = vector.extract_strided_slice %9 {offsets = [0, 1, 1, 0], sizes = [10, 1, 10, 64], strides = [1, 1, 1, 1]} : vector<12x2x16x64xf32> to vector<10x1x10x64xf32>
    %17 = vector.shape_cast %16 : vector<10x1x10x64xf32> to vector<10x10x64xf32>
    %18 = vector.extract_strided_slice %9 {offsets = [1, 0, 0, 0], sizes = [10, 1, 10, 64], strides = [1, 1, 1, 1]} : vector<12x2x16x64xf32> to vector<10x1x10x64xf32>
    %19 = vector.shape_cast %18 : vector<10x1x10x64xf32> to vector<10x10x64xf32>
    %20 = vector.extract_strided_slice %9 {offsets = [1, 0, 1, 0], sizes = [10, 1, 10, 64], strides = [1, 1, 1, 1]} : vector<12x2x16x64xf32> to vector<10x1x10x64xf32>
    %21 = vector.shape_cast %20 : vector<10x1x10x64xf32> to vector<10x10x64xf32>
    %22 = vector.extract_strided_slice %9 {offsets = [1, 1, 0, 0], sizes = [10, 1, 10, 64], strides = [1, 1, 1, 1]} : vector<12x2x16x64xf32> to vector<10x1x10x64xf32>
    %23 = vector.shape_cast %22 : vector<10x1x10x64xf32> to vector<10x10x64xf32>
    %24 = vector.extract_strided_slice %9 {offsets = [1, 1, 1, 0], sizes = [10, 1, 10, 64], strides = [1, 1, 1, 1]} : vector<12x2x16x64xf32> to vector<10x1x10x64xf32>
    %25 = vector.shape_cast %24 : vector<10x1x10x64xf32> to vector<10x10x64xf32>
    %26 = tpu.concatenate %11, %13, %15, %17, %19, %21, %23, %25 in 2 : vector<10x10x64xf32>, vector<10x10x64xf32>, vector<10x10x64xf32>, vector<10x10x64xf32>, vector<10x10x64xf32>, vector<10x10x64xf32>, vector<10x10x64xf32>, vector<10x10x64xf32> -> vector<10x10x512xf32>
    %cst_7 = arith.constant 0.000000e+00 : f32
    %27 = vector.broadcast %cst_7 : f32 to vector<10x6x512xf32>
    %28 = tpu.concatenate %26, %27 in 1 : vector<10x10x512xf32>, vector<10x6x512xf32> -> vector<10x16x512xf32>
    %29 = vector.shape_cast %28 : vector<10x16x512xf32> to vector<160x512xf32>
    %30 = arith.truncf %29 : vector<160x512xf32> to vector<160x512xbf16>
    %c0_8 = arith.constant 0 : index
    %c0_9 = arith.constant 0 : index
    %31 = vector.load %arg4[%c0_8, %c0_9] : memref<512x64xbf16, #tpu.memory_space<vmem>>, vector<512x64xbf16>
    %cst_10 = arith.constant dense<0.000000e+00> : vector<160x64xf32>
    %32 = tpu.matmul %30, %31, %cst_10 {dimension_numbers = #tpu.dot_dimension_numbers<[1], [0], [0], [1], [0, 0, 1, 1], [], []>} : vector<160x512xbf16>, vector<512x64xbf16>, vector<160x64xf32> -> vector<160x64xf32>
    %c0_11 = arith.constant 0 : index
    %c0_12 = arith.constant 0 : index
    %33 = vector.load %arg5[%c0_11, %c0_12] : memref<1x64xf32, #tpu.memory_space<vmem>>, vector<1x64xf32>
    %34 = vector.broadcast %33 : vector<1x64xf32> to vector<160x64xf32>
    %35 = arith.addf %32, %34 : vector<160x64xf32>
    %cst_13 = arith.constant 0.000000e+00 : f32
    %36 = vector.broadcast %cst_13 : f32 to vector<160x64xf32>
    %37 = arith.maximumf %35, %36 : vector<160x64xf32>
    %38 = vector.shape_cast %37 : vector<160x64xf32> to vector<10x16x64xf32>
    %39 = vector.extract_strided_slice %38 {offsets = [0, 0, 0], sizes = [8, 8, 64], strides = [1, 1, 1]} : vector<10x16x64xf32> to vector<8x8x64xf32>
    %40 = vector.extract_strided_slice %38 {offsets = [0, 1, 0], sizes = [8, 8, 64], strides = [1, 1, 1]} : vector<10x16x64xf32> to vector<8x8x64xf32>
    %41 = vector.extract_strided_slice %38 {offsets = [0, 2, 0], sizes = [8, 8, 64], strides = [1, 1, 1]} : vector<10x16x64xf32> to vector<8x8x64xf32>
    %42 = vector.extract_strided_slice %38 {offsets = [1, 0, 0], sizes = [8, 8, 64], strides = [1, 1, 1]} : vector<10x16x64xf32> to vector<8x8x64xf32>
    %43 = vector.extract_strided_slice %38 {offsets = [1, 1, 0], sizes = [8, 8, 64], strides = [1, 1, 1]} : vector<10x16x64xf32> to vector<8x8x64xf32>
    %44 = vector.extract_strided_slice %38 {offsets = [1, 2, 0], sizes = [8, 8, 64], strides = [1, 1, 1]} : vector<10x16x64xf32> to vector<8x8x64xf32>
    %45 = vector.extract_strided_slice %38 {offsets = [2, 0, 0], sizes = [8, 8, 64], strides = [1, 1, 1]} : vector<10x16x64xf32> to vector<8x8x64xf32>
    %46 = vector.extract_strided_slice %38 {offsets = [2, 1, 0], sizes = [8, 8, 64], strides = [1, 1, 1]} : vector<10x16x64xf32> to vector<8x8x64xf32>
    %47 = vector.extract_strided_slice %38 {offsets = [2, 2, 0], sizes = [8, 8, 64], strides = [1, 1, 1]} : vector<10x16x64xf32> to vector<8x8x64xf32>
    %48 = tpu.concatenate %39, %40, %41, %42, %43, %44, %45, %46, %47 in 2 : vector<8x8x64xf32>, vector<8x8x64xf32>, vector<8x8x64xf32>, vector<8x8x64xf32>, vector<8x8x64xf32>, vector<8x8x64xf32>, vector<8x8x64xf32>, vector<8x8x64xf32>, vector<8x8x64xf32> -> vector<8x8x576xf32>
    %49 = vector.shape_cast %48 : vector<8x8x576xf32> to vector<64x576xf32>
    %50 = arith.truncf %49 : vector<64x576xf32> to vector<64x576xbf16>
    %c0_14 = arith.constant 0 : index
    %c0_15 = arith.constant 0 : index
    %51 = vector.load %arg6[%c0_14, %c0_15] : memref<576x64xbf16, #tpu.memory_space<vmem>>, vector<576x64xbf16>
    %cst_16 = arith.constant dense<0.000000e+00> : vector<64x64xf32>
    %52 = tpu.matmul %50, %51, %cst_16 {dimension_numbers = #tpu.dot_dimension_numbers<[1], [0], [0], [1], [0, 0, 1, 1], [], []>} : vector<64x576xbf16>, vector<576x64xbf16>, vector<64x64xf32> -> vector<64x64xf32>
    %c0_17 = arith.constant 0 : index
    %c0_18 = arith.constant 0 : index
    %53 = vector.load %arg7[%c0_17, %c0_18] : memref<1x64xf32, #tpu.memory_space<vmem>>, vector<1x64xf32>
    %54 = vector.broadcast %53 : vector<1x64xf32> to vector<64x64xf32>
    %55 = arith.addf %52, %54 : vector<64x64xf32>
    %cst_19 = arith.constant 0.000000e+00 : f32
    %56 = vector.broadcast %cst_19 : f32 to vector<64x64xf32>
    %57 = arith.maximumf %55, %56 : vector<64x64xf32>
    %58 = vector.extract_strided_slice %57 {offsets = [0, 0], sizes = [1, 64], strides = [1, 1]} : vector<64x64xf32> to vector<1x64xf32>
    %59 = vector.extract_strided_slice %57 {offsets = [1, 0], sizes = [1, 64], strides = [1, 1]} : vector<64x64xf32> to vector<1x64xf32>
    %60 = vector.extract_strided_slice %57 {offsets = [2, 0], sizes = [1, 64], strides = [1, 1]} : vector<64x64xf32> to vector<1x64xf32>
    %61 = vector.extract_strided_slice %57 {offsets = [3, 0], sizes = [1, 64], strides = [1, 1]} : vector<64x64xf32> to vector<1x64xf32>
    %62 = vector.extract_strided_slice %57 {offsets = [4, 0], sizes = [1, 64], strides = [1, 1]} : vector<64x64xf32> to vector<1x64xf32>
    %63 = vector.extract_strided_slice %57 {offsets = [5, 0], sizes = [1, 64], strides = [1, 1]} : vector<64x64xf32> to vector<1x64xf32>
    %64 = vector.extract_strided_slice %57 {offsets = [6, 0], sizes = [1, 64], strides = [1, 1]} : vector<64x64xf32> to vector<1x64xf32>
    %65 = vector.extract_strided_slice %57 {offsets = [7, 0], sizes = [1, 64], strides = [1, 1]} : vector<64x64xf32> to vector<1x64xf32>
    %66 = vector.extract_strided_slice %57 {offsets = [8, 0], sizes = [1, 64], strides = [1, 1]} : vector<64x64xf32> to vector<1x64xf32>
    %67 = vector.extract_strided_slice %57 {offsets = [9, 0], sizes = [1, 64], strides = [1, 1]} : vector<64x64xf32> to vector<1x64xf32>
    %68 = vector.extract_strided_slice %57 {offsets = [10, 0], sizes = [1, 64], strides = [1, 1]} : vector<64x64xf32> to vector<1x64xf32>
    %69 = vector.extract_strided_slice %57 {offsets = [11, 0], sizes = [1, 64], strides = [1, 1]} : vector<64x64xf32> to vector<1x64xf32>
    %70 = vector.extract_strided_slice %57 {offsets = [12, 0], sizes = [1, 64], strides = [1, 1]} : vector<64x64xf32> to vector<1x64xf32>
    %71 = vector.extract_strided_slice %57 {offsets = [13, 0], sizes = [1, 64], strides = [1, 1]} : vector<64x64xf32> to vector<1x64xf32>
    %72 = vector.extract_strided_slice %57 {offsets = [14, 0], sizes = [1, 64], strides = [1, 1]} : vector<64x64xf32> to vector<1x64xf32>
    %73 = vector.extract_strided_slice %57 {offsets = [15, 0], sizes = [1, 64], strides = [1, 1]} : vector<64x64xf32> to vector<1x64xf32>
    %74 = vector.extract_strided_slice %57 {offsets = [16, 0], sizes = [1, 64], strides = [1, 1]} : vector<64x64xf32> to vector<1x64xf32>
    %75 = vector.extract_strided_slice %57 {offsets = [17, 0], sizes = [1, 64], strides = [1, 1]} : vector<64x64xf32> to vector<1x64xf32>
    %76 = vector.extract_strided_slice %57 {offsets = [18, 0], sizes = [1, 64], strides = [1, 1]} : vector<64x64xf32> to vector<1x64xf32>
    %77 = vector.extract_strided_slice %57 {offsets = [19, 0], sizes = [1, 64], strides = [1, 1]} : vector<64x64xf32> to vector<1x64xf32>
    %78 = vector.extract_strided_slice %57 {offsets = [20, 0], sizes = [1, 64], strides = [1, 1]} : vector<64x64xf32> to vector<1x64xf32>
    %79 = vector.extract_strided_slice %57 {offsets = [21, 0], sizes = [1, 64], strides = [1, 1]} : vector<64x64xf32> to vector<1x64xf32>
    %80 = vector.extract_strided_slice %57 {offsets = [22, 0], sizes = [1, 64], strides = [1, 1]} : vector<64x64xf32> to vector<1x64xf32>
    %81 = vector.extract_strided_slice %57 {offsets = [23, 0], sizes = [1, 64], strides = [1, 1]} : vector<64x64xf32> to vector<1x64xf32>
    %82 = vector.extract_strided_slice %57 {offsets = [24, 0], sizes = [1, 64], strides = [1, 1]} : vector<64x64xf32> to vector<1x64xf32>
    %83 = vector.extract_strided_slice %57 {offsets = [25, 0], sizes = [1, 64], strides = [1, 1]} : vector<64x64xf32> to vector<1x64xf32>
    %84 = vector.extract_strided_slice %57 {offsets = [26, 0], sizes = [1, 64], strides = [1, 1]} : vector<64x64xf32> to vector<1x64xf32>
    %85 = vector.extract_strided_slice %57 {offsets = [27, 0], sizes = [1, 64], strides = [1, 1]} : vector<64x64xf32> to vector<1x64xf32>
    %86 = vector.extract_strided_slice %57 {offsets = [28, 0], sizes = [1, 64], strides = [1, 1]} : vector<64x64xf32> to vector<1x64xf32>
    %87 = vector.extract_strided_slice %57 {offsets = [29, 0], sizes = [1, 64], strides = [1, 1]} : vector<64x64xf32> to vector<1x64xf32>
    %88 = vector.extract_strided_slice %57 {offsets = [30, 0], sizes = [1, 64], strides = [1, 1]} : vector<64x64xf32> to vector<1x64xf32>
    %89 = vector.extract_strided_slice %57 {offsets = [31, 0], sizes = [1, 64], strides = [1, 1]} : vector<64x64xf32> to vector<1x64xf32>
    %90 = vector.extract_strided_slice %57 {offsets = [32, 0], sizes = [1, 64], strides = [1, 1]} : vector<64x64xf32> to vector<1x64xf32>
    %91 = vector.extract_strided_slice %57 {offsets = [33, 0], sizes = [1, 64], strides = [1, 1]} : vector<64x64xf32> to vector<1x64xf32>
    %92 = vector.extract_strided_slice %57 {offsets = [34, 0], sizes = [1, 64], strides = [1, 1]} : vector<64x64xf32> to vector<1x64xf32>
    %93 = vector.extract_strided_slice %57 {offsets = [35, 0], sizes = [1, 64], strides = [1, 1]} : vector<64x64xf32> to vector<1x64xf32>
    %94 = vector.extract_strided_slice %57 {offsets = [36, 0], sizes = [1, 64], strides = [1, 1]} : vector<64x64xf32> to vector<1x64xf32>
    %95 = vector.extract_strided_slice %57 {offsets = [37, 0], sizes = [1, 64], strides = [1, 1]} : vector<64x64xf32> to vector<1x64xf32>
    %96 = vector.extract_strided_slice %57 {offsets = [38, 0], sizes = [1, 64], strides = [1, 1]} : vector<64x64xf32> to vector<1x64xf32>
    %97 = vector.extract_strided_slice %57 {offsets = [39, 0], sizes = [1, 64], strides = [1, 1]} : vector<64x64xf32> to vector<1x64xf32>
    %98 = vector.extract_strided_slice %57 {offsets = [40, 0], sizes = [1, 64], strides = [1, 1]} : vector<64x64xf32> to vector<1x64xf32>
    %99 = vector.extract_strided_slice %57 {offsets = [41, 0], sizes = [1, 64], strides = [1, 1]} : vector<64x64xf32> to vector<1x64xf32>
    %100 = vector.extract_strided_slice %57 {offsets = [42, 0], sizes = [1, 64], strides = [1, 1]} : vector<64x64xf32> to vector<1x64xf32>
    %101 = vector.extract_strided_slice %57 {offsets = [43, 0], sizes = [1, 64], strides = [1, 1]} : vector<64x64xf32> to vector<1x64xf32>
    %102 = vector.extract_strided_slice %57 {offsets = [44, 0], sizes = [1, 64], strides = [1, 1]} : vector<64x64xf32> to vector<1x64xf32>
    %103 = vector.extract_strided_slice %57 {offsets = [45, 0], sizes = [1, 64], strides = [1, 1]} : vector<64x64xf32> to vector<1x64xf32>
    %104 = vector.extract_strided_slice %57 {offsets = [46, 0], sizes = [1, 64], strides = [1, 1]} : vector<64x64xf32> to vector<1x64xf32>
    %105 = vector.extract_strided_slice %57 {offsets = [47, 0], sizes = [1, 64], strides = [1, 1]} : vector<64x64xf32> to vector<1x64xf32>
    %106 = vector.extract_strided_slice %57 {offsets = [48, 0], sizes = [1, 64], strides = [1, 1]} : vector<64x64xf32> to vector<1x64xf32>
    %107 = vector.extract_strided_slice %57 {offsets = [49, 0], sizes = [1, 64], strides = [1, 1]} : vector<64x64xf32> to vector<1x64xf32>
    %108 = vector.extract_strided_slice %57 {offsets = [50, 0], sizes = [1, 64], strides = [1, 1]} : vector<64x64xf32> to vector<1x64xf32>
    %109 = vector.extract_strided_slice %57 {offsets = [51, 0], sizes = [1, 64], strides = [1, 1]} : vector<64x64xf32> to vector<1x64xf32>
    %110 = vector.extract_strided_slice %57 {offsets = [52, 0], sizes = [1, 64], strides = [1, 1]} : vector<64x64xf32> to vector<1x64xf32>
    %111 = vector.extract_strided_slice %57 {offsets = [53, 0], sizes = [1, 64], strides = [1, 1]} : vector<64x64xf32> to vector<1x64xf32>
    %112 = vector.extract_strided_slice %57 {offsets = [54, 0], sizes = [1, 64], strides = [1, 1]} : vector<64x64xf32> to vector<1x64xf32>
    %113 = vector.extract_strided_slice %57 {offsets = [55, 0], sizes = [1, 64], strides = [1, 1]} : vector<64x64xf32> to vector<1x64xf32>
    %114 = vector.extract_strided_slice %57 {offsets = [56, 0], sizes = [1, 64], strides = [1, 1]} : vector<64x64xf32> to vector<1x64xf32>
    %115 = vector.extract_strided_slice %57 {offsets = [57, 0], sizes = [1, 64], strides = [1, 1]} : vector<64x64xf32> to vector<1x64xf32>
    %116 = vector.extract_strided_slice %57 {offsets = [58, 0], sizes = [1, 64], strides = [1, 1]} : vector<64x64xf32> to vector<1x64xf32>
    %117 = vector.extract_strided_slice %57 {offsets = [59, 0], sizes = [1, 64], strides = [1, 1]} : vector<64x64xf32> to vector<1x64xf32>
    %118 = vector.extract_strided_slice %57 {offsets = [60, 0], sizes = [1, 64], strides = [1, 1]} : vector<64x64xf32> to vector<1x64xf32>
    %119 = vector.extract_strided_slice %57 {offsets = [61, 0], sizes = [1, 64], strides = [1, 1]} : vector<64x64xf32> to vector<1x64xf32>
    %120 = vector.extract_strided_slice %57 {offsets = [62, 0], sizes = [1, 64], strides = [1, 1]} : vector<64x64xf32> to vector<1x64xf32>
    %121 = vector.extract_strided_slice %57 {offsets = [63, 0], sizes = [1, 64], strides = [1, 1]} : vector<64x64xf32> to vector<1x64xf32>
    %122 = tpu.concatenate %58, %59, %60, %61, %62, %63, %64, %65, %66, %67, %68, %69, %70, %71, %72, %73 in 1 : vector<1x64xf32>, vector<1x64xf32>, vector<1x64xf32>, vector<1x64xf32>, vector<1x64xf32>, vector<1x64xf32>, vector<1x64xf32>, vector<1x64xf32>, vector<1x64xf32>, vector<1x64xf32>, vector<1x64xf32>, vector<1x64xf32>, vector<1x64xf32>, vector<1x64xf32>, vector<1x64xf32>, vector<1x64xf32> -> vector<1x1024xf32>
    %123 = tpu.concatenate %74, %75, %76, %77, %78, %79, %80, %81, %82, %83, %84, %85, %86, %87, %88, %89 in 1 : vector<1x64xf32>, vector<1x64xf32>, vector<1x64xf32>, vector<1x64xf32>, vector<1x64xf32>, vector<1x64xf32>, vector<1x64xf32>, vector<1x64xf32>, vector<1x64xf32>, vector<1x64xf32>, vector<1x64xf32>, vector<1x64xf32>, vector<1x64xf32>, vector<1x64xf32>, vector<1x64xf32>, vector<1x64xf32> -> vector<1x1024xf32>
    %124 = tpu.concatenate %90, %91, %92, %93, %94, %95, %96, %97, %98, %99, %100, %101, %102, %103, %104, %105 in 1 : vector<1x64xf32>, vector<1x64xf32>, vector<1x64xf32>, vector<1x64xf32>, vector<1x64xf32>, vector<1x64xf32>, vector<1x64xf32>, vector<1x64xf32>, vector<1x64xf32>, vector<1x64xf32>, vector<1x64xf32>, vector<1x64xf32>, vector<1x64xf32>, vector<1x64xf32>, vector<1x64xf32>, vector<1x64xf32> -> vector<1x1024xf32>
    %125 = tpu.concatenate %106, %107, %108, %109, %110, %111, %112, %113, %114, %115, %116, %117, %118, %119, %120, %121 in 1 : vector<1x64xf32>, vector<1x64xf32>, vector<1x64xf32>, vector<1x64xf32>, vector<1x64xf32>, vector<1x64xf32>, vector<1x64xf32>, vector<1x64xf32>, vector<1x64xf32>, vector<1x64xf32>, vector<1x64xf32>, vector<1x64xf32>, vector<1x64xf32>, vector<1x64xf32>, vector<1x64xf32>, vector<1x64xf32> -> vector<1x1024xf32>
    %126 = tpu.concatenate %122, %123, %124, %125 in 1 : vector<1x1024xf32>, vector<1x1024xf32>, vector<1x1024xf32>, vector<1x1024xf32> -> vector<1x4096xf32>
    %127 = arith.truncf %126 : vector<1x4096xf32> to vector<1x4096xbf16>
    %c0_20 = arith.constant 0 : index
    %c0_21 = arith.constant 0 : index
    %128 = vector.load %arg8[%c0_20, %c0_21] : memref<4096x32xbf16, #tpu.memory_space<vmem>>, vector<4096x32xbf16>
    %cst_22 = arith.constant dense<0.000000e+00> : vector<1x32xf32>
    %129 = tpu.matmul %127, %128, %cst_22 {dimension_numbers = #tpu.dot_dimension_numbers<[1], [0], [0], [1], [0, 0, 1, 1], [], []>} : vector<1x4096xbf16>, vector<4096x32xbf16>, vector<1x32xf32> -> vector<1x32xf32>
    %c0_23 = arith.constant 0 : index
    %c0_24 = arith.constant 0 : index
    %130 = vector.load %arg9[%c0_23, %c0_24] : memref<1x32xf32, #tpu.memory_space<vmem>>, vector<1x32xf32>
    %131 = arith.addf %129, %130 : vector<1x32xf32>
    %cst_25 = arith.constant 0.000000e+00 : f32
    %132 = vector.broadcast %cst_25 : f32 to vector<1x32xf32>
    %133 = arith.maximumf %131, %132 : vector<1x32xf32>
    %c0_26 = arith.constant 0 : index
    %c0_27 = arith.constant 0 : index
    %134 = vector.load %arg10[%c0_26, %c0_27] : memref<32x128xf32, #tpu.memory_space<vmem>>, vector<32x128xf32>
    %cst_28 = arith.constant dense<0.000000e+00> : vector<1x128xf32>
    %135 = tpu.matmul %133, %134, %cst_28 {dimension_numbers = #tpu.dot_dimension_numbers<[1], [0], [0], [1], [0, 0, 1, 1], [], []>} : vector<1x32xf32>, vector<32x128xf32>, vector<1x128xf32> -> vector<1x128xf32>
    %c0_29 = arith.constant 0 : index
    %c0_30 = arith.constant 0 : index
    %136 = vector.load %arg11[%c0_29, %c0_30] : memref<1x128xf32, #tpu.memory_space<vmem>>, vector<1x128xf32>
    %137 = arith.addf %135, %136 : vector<1x128xf32>
    %c0_31 = arith.constant 0 : index
    %c0_32 = arith.constant 0 : index
    %c0_33 = arith.constant 0 : index
    %138 = vector.load %arg12[%c0_31, %c0_32, %c0_33] : memref<1x1x128xf32, #tpu.memory_space<vmem>>, vector<1x1x128xf32>
    %139 = vector.shape_cast %138 : vector<1x1x128xf32> to vector<1x128xf32>
    %140 = vector.shape_cast %137 : vector<1x128xf32> to vector<1x1x128xf32>
    tpu.vector_store %arg12[%c0_31, %c0_32, %c0_33], %140 {strides = array<i32>} : memref<1x1x128xf32, #tpu.memory_space<vmem>>, vector<1x1x128xf32>,
    return
  }
  func.func @transform_0(%arg0: i32) -> (i32, i32, i32) {
    %c0_i32 = arith.constant 0 : i32
    %c0_i32_0 = arith.constant 0 : i32
    %c0_i32_1 = arith.constant 0 : i32
    return %arg0, %c0_i32, %c0_i32_0 : i32, i32, i32
  }
  func.func @transform_1(%arg0: i32) -> (i32, i32) {
    %c0_i32 = arith.constant 0 : i32
    %c0_i32_0 = arith.constant 0 : i32
    %c0_i32_1 = arith.constant 0 : i32
    return %c0_i32, %c0_i32_0 : i32, i32
  }
  func.func @transform_2(%arg0: i32) -> (i32, i32) {
    %c0_i32 = arith.constant 0 : i32
    %c0_i32_0 = arith.constant 0 : i32
    %c0_i32_1 = arith.constant 0 : i32
    return %c0_i32, %c0_i32_0 : i32, i32
  }
  func.func @transform_3(%arg0: i32) -> (i32, i32) {
    %c0_i32 = arith.constant 0 : i32
    %c0_i32_0 = arith.constant 0 : i32
    %c0_i32_1 = arith.constant 0 : i32
    return %c0_i32, %c0_i32_0 : i32, i32
  }
  func.func @transform_4(%arg0: i32) -> (i32, i32) {
    %c0_i32 = arith.constant 0 : i32
    %c0_i32_0 = arith.constant 0 : i32
    %c0_i32_1 = arith.constant 0 : i32
    return %c0_i32, %c0_i32_0 : i32, i32
  }
  func.func @transform_5(%arg0: i32) -> (i32, i32) {
    %c0_i32 = arith.constant 0 : i32
    %c0_i32_0 = arith.constant 0 : i32
    %c0_i32_1 = arith.constant 0 : i32
    return %c0_i32, %c0_i32_0 : i32, i32
  }
  func.func @transform_6(%arg0: i32) -> (i32, i32) {
    %c0_i32 = arith.constant 0 : i32
    %c0_i32_0 = arith.constant 0 : i32
    %c0_i32_1 = arith.constant 0 : i32
    return %c0_i32, %c0_i32_0 : i32, i32
  }
  func.func @transform_7(%arg0: i32) -> (i32, i32) {
    %c0_i32 = arith.constant 0 : i32
    %c0_i32_0 = arith.constant 0 : i32
    %c0_i32_1 = arith.constant 0 : i32
    return %c0_i32, %c0_i32_0 : i32, i32
  }
  func.func @transform_8(%arg0: i32) -> (i32, i32) {
    %c0_i32 = arith.constant 0 : i32
    %c0_i32_0 = arith.constant 0 : i32
    %c0_i32_1 = arith.constant 0 : i32
    return %c0_i32, %c0_i32_0 : i32, i32
  }
  func.func @transform_9(%arg0: i32) -> (i32, i32) {
    %c0_i32 = arith.constant 0 : i32
    %c0_i32_0 = arith.constant 0 : i32
    %c0_i32_1 = arith.constant 0 : i32
    return %c0_i32, %c0_i32_0 : i32, i32
  }
  func.func @transform_10(%arg0: i32) -> (i32, i32) {
    %c0_i32 = arith.constant 0 : i32
    %c0_i32_0 = arith.constant 0 : i32
    %c0_i32_1 = arith.constant 0 : i32
    return %c0_i32, %c0_i32_0 : i32, i32
  }
  func.func @transform_11(%arg0: i32) -> (i32, i32, i32) {
    %c0_i32 = arith.constant 0 : i32
    %c0_i32_0 = arith.constant 0 : i32
    %c0_i32_1 = arith.constant 0 : i32
    return %arg0, %c0_i32, %c0_i32_0 : i32, i32, i32
  }
}

</mosaic_0001>

<bundles_post_ra>
// kernel: qfunction_forward.1
= control target key start
LH: loop header
LB: loop body
LE: loop exit
PB: predicated region body
PF: predicated region fallthrough
CT: control target
= control target key end

     0   :  { %s10830_s0 = inlined_call_operand.vmem [shape: bf16[2,384,384], index: 0, kind: input, shape index: {}]   ;;  %s10831_s1 = inlined_call_operand.vmem [shape: bf16[384,64], index: 1, kind: input, shape index: {}]   ;;  %s10832_s2 = inlined_call_operand.vmem [shape: f32[1,64], index: 2, kind: input, shape index: {}]   ;;  %s10833_s3 = inlined_call_operand.vmem [shape: bf16[512,64], index: 3, kind: input, shape index: {}]   ;;  %s10834_s4 = inlined_call_operand.vmem [shape: f32[1,64], index: 4, kind: input, shape index: {}]   ;;  %s10835_s5 = inlined_call_operand.vmem [shape: bf16[576,64], index: 5, kind: input, shape index: {}]   ;;  %s10836_s6 = inlined_call_operand.vmem [shape: f32[1,64], index: 6, kind: input, shape index: {}]   ;;  %s10837_s7 = inlined_call_operand.vmem [shape: bf16[4096,32], index: 7, kind: input, shape index: {}]   ;;  %s10838_s8 = inlined_call_operand.vmem [shape: f32[1,32], index: 8, kind: input, shape index: {}]   ;;  %s10839_s9 = inlined_call_operand.vmem [shape: f32[32,128], index: 9, kind: input, shape index: {}]   ;;  %s10840_s10 = inlined_call_operand.vmem [shape: f32[1,128], index: 10, kind: input, shape index: {}]   ;;  %s10841_s11 = inlined_call_operand.hbm [shape: f32[2,1,128], index: 11, kind: output, shape index: {}]  }
   0x1   :  { %10877 = sst [smem:[#allocation6_spill]] %s10830_s0 }
   0x2   :  { %10878 = sst [smem:[#allocation7_spill]] %s10831_s1 }
   0x3   :  { %16 = vsyncpa [#allocation3], 0 }
   0x4   :  { %18 = vsyncpa [#allocation3 + $0x1], 0  ;;  %s8367_s17 = smov 0   ;;  %s8369_s18 = smov 0  }
   0x5   :  { %s8371_s19 = smov 0   ;;  %s8373_s20 = smov 0  }
   0x6 LB: > { %s8388_s21 = sadd.s32 4294967295, %s8298_s20   ;;  %s6208_s22 = sadd.s32 4294967294, %s8298_s20   ;;  %s8298_s20 = sphi %s8373_s20, %s10924_s20   ;;  %s8294_s19 = sphi %s8371_s19, %s10923_s19   ;;  %s8290_s18 = sphi %s8369_s18, %s10922_s18   ;;  %s8286_s17 = sphi %s8367_s17, %s10921_s17  }
   0x7   : > { %s8392_s23 = sadd.s32 1, %s8298_s20   ;;  %s267_s24 = sadd.s32 1, %s8294_s19 }
   0x8   : > { %s264_s25 = ssub.s32 %s8298_s20, %s8392_s23  ;;  %p277_p0 = scmp.ne.s32.totalorder %s8294_s19, %s8290_s18 }
   0x9   : > { %p265_p1 = scmp.eq.s32.totalorder %s264_s25, 0  ;;  %p278_p2 = scmp.eq.s32.totalorder %s8388_s21, 1 }
   0xa   : > { %p283_p3 = scmp.ne.s32.totalorder %s8290_s18, %s8286_s17  ;;  %p284_p4 = scmp.eq.s32.totalorder %s6208_s22, 1 }
   0xb   : > { %s8403_s26 = scalar_select %p265_p1, %s8294_s19, %s267_s24  }
   0xc   : > { %p8405_p5 = por %p278_p2, %p277_p0  ;;  %p8409_p6 = por %p284_p4, %p283_p3 }
   0xd   : > { %10879 = sst [smem:[#allocation5_spill]] %s8403_s26  ;;  %p6211_p7 = scmp.ge.s32.totalorder %s8298_s20, 1 }
   0xe   : > { %p340_p8 = scmp.lt.s32.totalorder %s8298_s20, 3 }
  0x10   : > { %p341_p9 = pnand %p6211_p7, %p340_p8 }
  0x11   : > { %s10882_s1 = sld [smem:[#allocation7_spill]] (!%p341_p9)  ;;  %v8300_v1 = vmov (!%p341_p9), 0   ;;  %p379_p10 = scmp.lt.s32.totalorder (!%p341_p9), %s8388_s21, 1  ;;  %vm1570_vm0 = vcmask (!%p341_p9), 1046528   ;;  %vm1793_vm1 = vcmask (!%p341_p9), 523264   ;;  %vm1838_vm2 = vcmask (!%p341_p9), 1041408  }
  0x12   : > { %344 = sbr.rel (%p341_p9) target bundleno = 2027 (0x7eb), region = 64  ;;  %1064 = vmatprep.subr.bf16.mxu0 (!%p341_p9), %v8300_v1  ;;  %s10883_s0 = sld [smem:[#allocation6_spill]] (!%p341_p9)  ;;  %vm8302_vm3 = vmmov (!%p341_p9), 1   ;;  %vm2456_vm5 = vcmask (!%p341_p9), 1045504   ;;  %vm8304_vm6 = vmmov (!%p341_p9), 0   ;;  %vm6065_vm7 = vcmask (!%p341_p9), 261120  }
  0x13   : > { %s10875_s22 = smov (!%p341_p9), 64   ;;  %vm8997_vm4 = vmpackc.low (!%p341_p9), %vm1838_vm2, %vm8302_vm3  ;;  %s6761_s29 = sshll.u32 (!%p341_p9), %s8388_s21, 4 }
  0x14   : > { %s10788_s14 = scalar_lea.hbm (!%p341_p9), %s10841_s11, %s6761_s29 }
  0x17   : > { %v7791_v0 = vld [vmem:[%s10882_s1] sm:$0xff] (!%p341_p9)   ;;  %v7792_v2 = vld [vmem:[%s10882_s1 + $0x8] sm:$0xff] (!%p341_p9)   ;;  %v7793_v3 = vld [vmem:[%s10882_s1 + $0x10] sm:$0xff] (!%p341_p9)  }
  0x18   : > { %1065 = vmatpush1.bf16.msra.mxu0 (!%p341_p9), %v7791_v0  ;;  %v7800_v4 = vld [vmem:[%s10882_s1 + $0x80] sm:$0xff] (!%p341_p9)   ;;  %v7794_v5 = vld [vmem:[%s10882_s1 + $0x18] sm:$0xff] (!%p341_p9)   ;;  %v7802_v6 = vld [vmem:[%s10882_s1 + $0x88] sm:$0xff] (!%p341_p9)  }
  0x19   : > { %1066 = vmatprep.subr.bf16.mxu0 %v8300_v1  ;;  %7393 = vmatprep.subr.bf16.mxu1 %v7800_v4  ;;  %v7804_v7 = vld [vmem:[%s10882_s1 + $0x90] sm:$0xff]   ;;  %v7795_v8 = vld [vmem:[%s10882_s1 + $0x20] sm:$0xff]   ;;  %s380_s16 = scalar_select %p379_p10, %s8388_s21, 1  ;;  %v7806_v9 = vld [vmem:[%s10882_s1 + $0x98] sm:$0xff]  }
  0x1a   : > { %7394 = vmatpush3.bf16.msra.mxu1 %v7800_v4  ;;  %v7796_v10 = vld [vmem:[%s10882_s1 + $0x28] sm:$0xff]   ;;  %v7808_v11 = vld [vmem:[%s10882_s1 + $0xa0] sm:$0xff]   ;;  %v7797_v12 = vld [vmem:[%s10882_s1 + $0x30] sm:$0xff]   ;;  %s8306_s21 = smov [#allocation2]  }
  0x1b   : > { %7395 = vmatprep.subr.bf16.mxu1 %v7802_v6  ;;  %s7490_s30 = smul.u32 576, %s380_s16  ;;  %v7798_v13 = vld [vmem:[%s10882_s1 + $0x38] sm:$0xff]   ;;  %v7810_v14 = vld [vmem:[%s10882_s1 + $0xa8] sm:$0xff]   ;;  %v7812_v17 = vld [vmem:[%s10882_s1 + $0xb0] sm:$0xff]   ;;  %s377_s16 = sand.u32 1, %s8290_s18  }
  0x1c   : > { %1067 = vmatpush1.bf16.msra.mxu0 %v7792_v2  ;;  %v7799_v18 = vld [vmem:[%s10882_s1 + $0x40] sm:$0xff]   ;;  %v7814_v19 = vld [vmem:[%s10882_s1 + $0xb8] sm:$0xff]   ;;  %v7801_v20 = vld [vmem:[%s10882_s1 + $0x48] sm:$0xff]   ;;  %s378_s12 = scalar_lea.vmem [#allocation2], %s377_s16  ;;  %s6141_s15 = scalar_lea.sflag [#allocation3], %s377_s16 }
  0x1d   : > { %1068 = vmatprep.subr.bf16.mxu0 %v8300_v1  ;;  %s8462_s26 = scalar_lea.vmem %s10883_s0, %s7490_s30  ;;  %v7803_v21 = vld [vmem:[%s10882_s1 + $0x50] sm:$0xff]   ;;  %v7805_v24 = vld [vmem:[%s10882_s1 + $0x58] sm:$0xff]   ;;  %v7807_v25 = vld [vmem:[%s10882_s1 + $0x60] sm:$0xff]   ;;  %s6153_s30 = sshll.u32 %s378_s12, 4  ;;  %s10790_s30 = int_to_ptr.vmem [resolvable:$true] %s6153_s30 }
  0x1e   : > { %7396 = vmatpush3.bf16.msra.mxu1 %v7802_v6  ;;  %v7817_v15 = vld [vmem:[%s8462_s26 + $0x4] ss:$12 sps:$4 sm:$0xff]   ;;  %v7818_v16 = vld [vmem:[%s8462_s26 + $0x8] ss:$12 sps:$4 sm:$0xff]   ;;  %v7819_v22 = vld [vmem:[%s8462_s26 + $0x20] ss:$12 sps:$4 sm:$0xff]  }
  0x1f   : > { %7397 = vmatprep.subr.bf16.mxu1 %v7804_v7  ;;  %1096 = vmatprep.mubr.bf16.mxu0 %v7817_v15  ;;  %v7826_v23 = vld [vmem:[%s8462_s26 + $0x38] ss:$12 sps:$4 sm:$0xff]   ;;  %v7827_v26 = vld [vmem:[%s8462_s26 + $0x50] ss:$12 sps:$4 sm:$0xff]   ;;  %v7834_v27 = vld [vmem:[%s8462_s26 + $0x68] ss:$12 sps:$4 sm:$0xff]  }
  0x20   : > { %1069 = vmatpush1.bf16.msra.mxu0 %v7793_v3  ;;  %7409 = vmatprep.mubr.bf16.mxu1 %v7818_v16  ;;  %v7809_v28 = vld [vmem:[%s10882_s1 + $0x68] sm:$0xff]   ;;  %v7811_v29 = vld [vmem:[%s10882_s1 + $0x70] sm:$0xff]   ;;  %v7842_v31 = vld [vmem:[%s8462_s26 + $0x98] ss:$12 sps:$4 sm:$0xff]   ;;  %s8236_s0 = scalar_lea.vmem %s10790_s30, 16 }
  0x21   : > { %1070 = vmatprep.subr.bf16.mxu0 %v8300_v1  ;;  %v7835_v30 = vld [vmem:[%s8462_s26 + $0x80] ss:$12 sps:$4 sm:$0xff]   ;;  %v7813_v32 = vld [vmem:[%s10882_s1 + $0x78] sm:$0xff]   ;;  %v7850_v36 = vld [vmem:[%s8462_s26 + $0xc8] ss:$12 sps:$4 sm:$0xff]   ;;  %p8237_p11 = scmp.ne.s32.totalorder %s10790_s30, %s8236_s0  ;;  %s8240_s1 = sshll.u32 %s8306_s21, 4  ;;  %s8241_s1 = int_to_ptr.vmem [resolvable:$false] %s8240_s1 }
  0x22   : > { %7398 = vmatpush3.bf16.msra.mxu1 %v7804_v7  ;;  %v7815_v33 = vld [vmem:[%s8462_s26] ss:$12 sps:$4 sm:$0xff]   ;;  %v7820_v34 = vld [vmem:[%s8462_s26 + $0x1c] ss:$12 sps:$4 sm:$0xff]   ;;  %v7822_v37 = vld [vmem:[%s8462_s26 + $0x18] ss:$12 sps:$4 sm:$0xff]   ;;  %p8243_p0 = scmp.lt.s32.totalorder %s10790_s30, %s8241_s1 }
  0x23   : > { %7399 = vmatprep.subr.bf16.mxu1 %v7806_v9  ;;  %v7843_v35 = vld [vmem:[%s8462_s26 + $0xb0] ss:$12 sps:$4 sm:$0xff]   ;;  %v7823_v38 = vld [vmem:[%s8462_s26 + $0x34] ss:$12 sps:$4 sm:$0xff]   ;;  %v7858_v40 = vld [vmem:[%s8462_s26 + $0xf8] ss:$12 sps:$4 sm:$0xff]   ;;  %p8238_p12 = pnand %p8237_p11, %p8405_p5 }
  0x24   : > { %1071 = vmatpush1.bf16.msra.mxu0 %v7794_v5  ;;  %v7851_v39 = vld [vmem:[%s8462_s26 + $0xe0] ss:$12 sps:$4 sm:$0xff]   ;;  %v7825_v41 = vld [vmem:[%s8462_s26 + $0x30] ss:$12 sps:$4 sm:$0xff]   ;;  %v7866_v44 = vld [vmem:[%s8462_s26 + $0x128] ss:$12 sps:$4 sm:$0xff]  }
  0x25   : > { %1072 = vmatprep.subr.bf16.mxu0 %v8300_v1  ;;  %v7828_v42 = vld [vmem:[%s8462_s26 + $0x4c] ss:$12 sps:$4 sm:$0xff]   ;;  %v7859_v43 = vld [vmem:[%s8462_s26 + $0x110] ss:$12 sps:$4 sm:$0xff]   ;;  %v7830_v45 = vld [vmem:[%s8462_s26 + $0x48] ss:$12 sps:$4 sm:$0xff]   ;;  %p8239_p13 = pneg %p8238_p12 }
  0x26   : > { %7400 = vmatpush3.bf16.msra.mxu1 %v7806_v9  ;;  %v7831_v46 = vld [vmem:[%s8462_s26 + $0x64] ss:$12 sps:$4 sm:$0xff]   ;;  %v7867_v47 = vld [vmem:[%s8462_s26 + $0x140] ss:$12 sps:$4 sm:$0xff]   ;;  %v7836_v50 = vld [vmem:[%s8462_s26 + $0x7c] ss:$12 sps:$4 sm:$0xff]  }
  0x27   : > { %7401 = vmatprep.subr.bf16.mxu1 %v7808_v11  ;;  %v7874_v48 = vld [vmem:[%s8462_s26 + $0x158] ss:$12 sps:$4 sm:$0xff]   ;;  %v7833_v49 = vld [vmem:[%s8462_s26 + $0x60] ss:$12 sps:$4 sm:$0xff]   ;;  %v7875_v51 = vld [vmem:[%s8462_s26 + $0x170] ss:$12 sps:$4 sm:$0xff]  }
  0x28   : > { %1073 = vmatpush1.bf16.msra.mxu0 %v7795_v8  ;;  %v7882_v52 = vld [vmem:[%s8462_s26 + $0x188] ss:$12 sps:$4 sm:$0xff]   ;;  %v7838_v53 = vld [vmem:[%s8462_s26 + $0x78] ss:$12 sps:$4 sm:$0xff]   ;;  %v7883_v55 = vld [vmem:[%s8462_s26 + $0x1a0] ss:$12 sps:$4 sm:$0xff]  }
  0x29   : > { %1074 = vmatprep.subr.bf16.mxu0 %v8300_v1  ;;  %v7839_v54 = vld [vmem:[%s8462_s26 + $0x94] ss:$12 sps:$4 sm:$0xff]   ;;  %v7890_v56 = vld [vmem:[%s8462_s26 + $0x1b8] ss:$12 sps:$4 sm:$0xff]   ;;  %v7841_v57 = vld [vmem:[%s8462_s26 + $0x90] ss:$12 sps:$4 sm:$0xff]  }
  0x2a   : > { %7402 = vmatpush3.bf16.msra.mxu1 %v7808_v11  ;;  %v7844_v58 = vld [vmem:[%s8462_s26 + $0xac] ss:$12 sps:$4 sm:$0xff]   ;;  %v7891_v59 = vld [vmem:[%s8462_s26 + $0x1d0] ss:$12 sps:$4 sm:$0xff]   ;;  %v7846_v60 = vld [vmem:[%s8462_s26 + $0xa8] ss:$12 sps:$4 sm:$0xff]  }
  0x2b   : > { %7403 = vmatprep.subr.bf16.mxu1 %v7810_v14  ;;  %v7847_v61 = vld [vmem:[%s8462_s26 + $0xc4] ss:$12 sps:$4 sm:$0xff]   ;;  %v7849_v62 = vld [vmem:[%s8462_s26 + $0xc0] ss:$12 sps:$4 sm:$0xff]   ;;  %v7852_v63 = vld [vmem:[%s8462_s26 + $0xdc] ss:$12 sps:$4 sm:$0xff]  }
  0x2c   : > { %1075 = vmatpush1.bf16.msra.mxu0 %v7796_v10  ;;  %v7854_v0 = vld [vmem:[%s8462_s26 + $0xd8] ss:$12 sps:$4 sm:$0xff]   ;;  %v7857_v2 = vld [vmem:[%s8462_s26 + $0xf0] ss:$12 sps:$4 sm:$0xff]   ;;  %v7862_v4 = vld [vmem:[%s8462_s26 + $0x108] ss:$12 sps:$4 sm:$0xff]  }
  0x2d   : > { %1076 = vmatprep.subr.bf16.mxu0 %v8300_v1  ;;  %v7860_v3 = vld [vmem:[%s8462_s26 + $0x10c] ss:$12 sps:$4 sm:$0xff]   ;;  %v7863_v5 = vld [vmem:[%s8462_s26 + $0x124] ss:$12 sps:$4 sm:$0xff]   ;;  %v7868_v7 = vld [vmem:[%s8462_s26 + $0x13c] ss:$12 sps:$4 sm:$0xff]  }
  0x2e   : > { %7404 = vmatpush3.bf16.msra.mxu1 %v7810_v14  ;;  %v7865_v6 = vld [vmem:[%s8462_s26 + $0x120] ss:$12 sps:$4 sm:$0xff]   ;;  %v7870_v8 = vld [vmem:[%s8462_s26 + $0x138] ss:$12 sps:$4 sm:$0xff]   ;;  %v7901_v10 = vld [vmem:[%s8462_s26 + $0x1e8] ss:$12 sps:$4 sm:$0xff]  }
  0x2f   : > { %7405 = vmatprep.subr.bf16.mxu1 %v7812_v17  ;;  %v7871_v9 = vld [vmem:[%s8462_s26 + $0x154] ss:$12 sps:$4 sm:$0xff]   ;;  %v7879_v15 = vld [vmem:[%s8462_s26 + $0x184] ss:$12 sps:$4 sm:$0xff]   ;;  %s8242_s24 = scalar_lea.vmem %s8241_s1, 32 }
  0x30   : > { %1077 = vmatpush1.bf16.msra.mxu0 %v7797_v12  ;;  %v7902_v11 = vld [vmem:[%s8462_s26 + $0x200] ss:$12 sps:$4 sm:$0xff]   ;;  %v7873_v12 = vld [vmem:[%s8462_s26 + $0x150] ss:$12 sps:$4 sm:$0xff]   ;;  %v7878_v14 = vld [vmem:[%s8462_s26 + $0x168] ss:$12 sps:$4 sm:$0xff]   ;;  %p8244_p1 = scmp.lt.s32.totalorder %s8242_s24, %s8236_s0 }
  0x31   : > { %1078 = vmatprep.subr.bf16.mxu0 %v8300_v1  ;;  %v7881_v16 = vld [vmem:[%s8462_s26 + $0x180] ss:$12 sps:$4 sm:$0xff]  }
  0x32   : > { %7406 = vmatpush3.bf16.msra.mxu1 %v7812_v17  ;;  %v7884_v17 = vld [vmem:[%s8462_s26 + $0x19c] ss:$12 sps:$4 sm:$0xff]   ;;  %p8245_p2 = por %p8244_p1, %p8243_p0 }
  0x33   : > { %7407 = vmatprep.subr.bf16.mxu1 %v7814_v19 }
  0x34   : > { %1079 = vmatpush1.bf16.msra.mxu0 %v7798_v13  ;;  %v7876_v13 = vld [vmem:[%s8462_s26 + $0x16c] ss:$12 sps:$4 sm:$0xff]   ;;  %p8246_p3 = pnand %p8245_p2, %p8239_p13 }
  0x35   : > { %1080 = vmatprep.subr.bf16.mxu0 %v8300_v1 }
  0x36   : > { %7408 = vmatpush3.bf16.msra.mxu1 %v7814_v19  ;;  %v7887_v19 = vld [vmem:[%s8462_s26 + $0x1b4] ss:$12 sps:$4 sm:$0xff]  }
  0x38   : > { %1081 = vmatpush1.bf16.msra.mxu0 %v7799_v18  ;;  %v7886_v18 = vld [vmem:[%s8462_s26 + $0x198] ss:$12 sps:$4 sm:$0xff]  }
  0x39   : > { %1082 = vmatprep.subr.bf16.mxu0 %v8300_v1  ;;  %7410 = vmatmul.mubr.bf16.vlgmr.msra.gmra.mrb[0].mxu1 %v7819_v22  ;;  %v7894_v22 = vld [vmem:[%s8462_s26 + $0x1c8] ss:$12 sps:$4 sm:$0xff]  }
  0x3a   : > { %7413 = vmatprep.mubr.bf16.mxu1 %v7826_v23  ;;  %v7895_v23 = vld [vmem:[%s8462_s26 + $0x1e4] ss:$12 sps:$4 sm:$0xff]  }
  0x3c   : > { %1083 = vmatpush1.bf16.msra.mxu0 %v7801_v20  ;;  %v7889_v20 = vld [vmem:[%s8462_s26 + $0x1b0] ss:$12 sps:$4 sm:$0xff]  }
  0x3d   : > { %1084 = vmatprep.subr.bf16.mxu0 %v8300_v1 }
  0x40   : > { %1085 = vmatpush1.bf16.msra.mxu0 %v7803_v21  ;;  %v7892_v21 = vld [vmem:[%s8462_s26 + $0x1cc] ss:$12 sps:$4 sm:$0xff]  }
  0x41   : > { %1086 = vmatprep.subr.bf16.mxu0 %v8300_v1  ;;  %7414 = vmatmul.mubr.bf16.gmra.mrb[4].mxu1 %v7827_v26  ;;  %v7900_v26 = vld [vmem:[%s8462_s26 + $0x1f8] ss:$12 sps:$4 sm:$0xff]  }
  0x42   : > { %7417 = vmatprep.mubr.bf16.mxu1 %v7834_v27 }
  0x44   : > { %1087 = vmatpush1.bf16.msra.mxu0 %v7805_v24  ;;  %v7897_v24 = vld [vmem:[%s8462_s26 + $0x1e0] ss:$12 sps:$4 sm:$0xff]  }
  0x45   : > { %1088 = vmatprep.subr.bf16.mxu0 %v8300_v1 }
  0x48   : > { %1089 = vmatpush1.bf16.msra.mxu0 %v7807_v25  ;;  %v7898_v25 = vld [vmem:[%s8462_s26 + $0x1fc] ss:$12 sps:$4 sm:$0xff]  }
  0x49   : > { %1090 = vmatprep.subr.bf16.mxu0 %v8300_v1  ;;  %7418 = vmatmul.mubr.bf16.gmra.mrb[8].mxu1 %v7835_v30 }
  0x4a   : > { %7421 = vmatprep.mubr.bf16.mxu1 %v7842_v31  ;;  %v7903_v31 = vld [vmem:[%s10833_s3 + $0x40] sm:$0xff]  }
  0x4b   : > { %6796 = vmatprep.subr.bf16.mxu1 %v7903_v31 }
  0x4c   : > { %1091 = vmatpush1.bf16.msra.mxu0 %v7809_v28 }
  0x4d   : > { %1092 = vmatprep.subr.bf16.mxu0 %v8300_v1 }
  0x50   : > { %1093 = vmatpush1.bf16.msra.mxu0 %v7811_v29 }
  0x51   : > { %1094 = vmatprep.subr.bf16.mxu0 %v8300_v1  ;;  %7422 = vmatmul.mubr.bf16.gmra.mrb[12].mxu1 %v7843_v35  ;;  %v7855_v1 = vld [vmem:[%s8462_s26 + $0xf4] ss:$12 sps:$4 sm:$0xff]  }
  0x52   : > { %7425 = vmatprep.mubr.bf16.mxu1 %v7850_v36  ;;  %v7905_v36 = vld [vmem:[%s10833_s3 + $0x48] sm:$0xff]  }
  0x54   : > { %1095 = vmatpush1.bf16.msra.mxu0 %v7813_v32  ;;  %v7904_v32 = vld [vmem:[%s10833_s3] sm:$0xff]  }
  0x55   : > { %6797 = vmatpush3.bf16.msra.mxu1 %v7904_v32 }
  0x56   : > { %6798 = vmatprep.subr.bf16.mxu1 %v7905_v36 }
  0x57   : > { %1097 = vmatmul.mubr.bf16.vlgmr.msra.gmra.mrb[0].mxu0 %v7815_v33 }
  0x58   : > { %1104 = vmatprep.mubr.bf16.mxu0 %v7820_v34 }
  0x59   : > { %7426 = vmatmul.mubr.bf16.gmra.mrb[16].mxu1 %v7851_v39  ;;  %v7907_v39 = vld [vmem:[%s10833_s3 + $0x50] sm:$0xff]  }
  0x5a   : > { %7429 = vmatprep.mubr.bf16.mxu1 %v7858_v40  ;;  %v7908_v40 = vld [vmem:[%s10833_s3 + $0x10] sm:$0xff]  }
  0x5f   : > { %1105 = vmatmul.mubr.bf16.gmra.mrb[4].mxu0 %v7822_v37 }
  0x60   : > { %1112 = vmatprep.mubr.bf16.mxu0 %v7823_v38  ;;  %v7906_v38 = vld [vmem:[%s10833_s3 + $0x8] sm:$0xff]  }
  0x61   : > { %7430 = vmatmul.mubr.bf16.gmra.mrb[20].mxu1 %v7859_v43  ;;  %v8613_v43 = vld [vmem:[%s10832_s2] ss:$0 sm:$0xff] }
  0x62   : > { %7433 = vmatprep.mubr.bf16.mxu1 %v7866_v44  ;;  %6799 = vmatpush3.bf16.msra.mxu1 %v7906_v38 }
  0x63   : > { %6800 = vmatprep.subr.bf16.mxu1 %v7907_v39 }
  0x66   : > { %6801 = vmatpush3.bf16.msra.mxu1 %v7908_v40 }
  0x67   : > { %1113 = vmatmul.mubr.bf16.gmra.mrb[8].mxu0 %v7825_v41 }
  0x68   : > { %1120 = vmatprep.mubr.bf16.mxu0 %v7828_v42 }
  0x69   : > { %7434 = vmatmul.mubr.bf16.gmra.mrb[24].mxu1 %v7867_v47  ;;  %v7910_v47 = vld [vmem:[%s10833_s3 + $0x18] sm:$0xff]  }
  0x6a   : > { %7437 = vmatprep.mubr.bf16.mxu1 %v7874_v48 }
  0x6f   : > { %1121 = vmatmul.mubr.bf16.gmra.mrb[12].mxu0 %v7830_v45  ;;  %v7909_v45 = vld [vmem:[%s10833_s3 + $0x58] sm:$0xff]  }
  0x70   : > { %1128 = vmatprep.mubr.bf16.mxu0 %v7831_v46  ;;  %6802 = vmatprep.subr.bf16.mxu1 %v7909_v45 }
  0x71   : > { %7438 = vmatmul.mubr.bf16.gmra.mrb[28].mxu1 %v7875_v51 }
  0x72   : > { %7441 = vmatprep.mubr.bf16.mxu1 %v7882_v52  ;;  %6803 = vmatpush3.bf16.msra.mxu1 %v7910_v47  ;;  %v7912_v52 = vld [vmem:[%s10833_s3 + $0x20] sm:$0xff]  }
  0x77   : > { %1129 = vmatmul.mubr.bf16.gmra.mrb[16].mxu0 %v7833_v49  ;;  %v7911_v49 = vld [vmem:[%s10833_s3 + $0x60] sm:$0xff]  }
  0x78   : > { %1136 = vmatprep.mubr.bf16.mxu0 %v7836_v50  ;;  %6804 = vmatprep.subr.bf16.mxu1 %v7911_v49 }
  0x79   : > { %7442 = vmatmul.mubr.bf16.gmra.mrb[32].mxu1 %v7883_v55 }
  0x7a   : > { %7445 = vmatprep.mubr.bf16.mxu1 %v7890_v56  ;;  %6805 = vmatpush3.bf16.msra.mxu1 %v7912_v52 }
  0x7f   : > { %1137 = vmatmul.mubr.bf16.gmra.mrb[20].mxu0 %v7838_v53 }
  0x80   : > { %1144 = vmatprep.mubr.bf16.mxu0 %v7839_v54 }
  0x81   : > { %7446 = vmatmul.mubr.bf16.gmra.mrb[36].mxu1 %v7891_v59 }
  0x82   : > { %7449 = vmatprep.mubr.bf16.mxu1 %v7901_v10 }
  0x87   : > { %1145 = vmatmul.mubr.bf16.gmra.mrb[24].mxu0 %v7841_v57 }
  0x88   : > { %1152 = vmatprep.mubr.bf16.mxu0 %v7844_v58 }
  0x89   : > { %7450 = vmatmul.mubr.bf16.gmra.mrb[40].mxu1 %v7902_v11 }
  0x8f   : > { %1153 = vmatmul.mubr.bf16.gmra.mrb[28].mxu0 %v7846_v60  ;;  %v7913_v60 = vld [vmem:[%s10833_s3 + $0x68] sm:$0xff]  }
  0x90   : > { %1160 = vmatprep.mubr.bf16.mxu0 %v7847_v61  ;;  %6806 = vmatprep.subr.bf16.mxu1 %v7913_v60 }
  0x97   : > { %1161 = vmatmul.mubr.bf16.gmra.mrb[32].mxu0 %v7849_v62 }
  0x98   : > { %1168 = vmatprep.mubr.bf16.mxu0 %v7852_v63  ;;  %v7914_v63 = vld [vmem:[%s10833_s3 + $0x28] sm:$0xff]  }
  0x99   : > { %6807 = vmatpush3.bf16.msra.mxu1 %v7914_v63 }
  0x9f   : > { %1169 = vmatmul.mubr.bf16.gmra.mrb[36].mxu0 %v7854_v0  ;;  %v7915_v0 = vld [vmem:[%s8462_s26 + $0x218] ss:$12 sps:$4 sm:$0xff]  }
  0xa0   : > { %1176 = vmatprep.mubr.bf16.mxu0 %v7855_v1  ;;  %7453 = vmatprep.mubr.bf16.mxu1 %v7915_v0 }
  0xa7   : > { %1177 = vmatmul.mubr.bf16.gmra.mrb[40].mxu0 %v7857_v2  ;;  %v7916_v2 = vld [vmem:[%s8462_s26 + $0x230] ss:$12 sps:$4 sm:$0xff]  }
  0xa8   : > { %1184 = vmatprep.mubr.bf16.mxu0 %v7860_v3  ;;  %v7917_v3 = vld [vmem:[%s10833_s3 + $0x70] sm:$0xff]   ;;  %7454 = vmatmul.mubr.bf16.gmra.mrb[44].mxu1 %v7916_v2 }
  0xa9   : > { %6808 = vmatprep.subr.bf16.mxu1 %v7917_v3 }
  0xaf   : > { %1185 = vmatmul.mubr.bf16.gmra.mrb[44].mxu0 %v7862_v4 }
  0xb0   : > { %1192 = vmatprep.mubr.bf16.mxu0 %v7863_v5 }
  0xb7   : > { %1193 = vmatmul.mubr.bf16.gmra.mrb[48].mxu0 %v7865_v6  ;;  %v7918_v6 = vld [vmem:[%s10833_s3 + $0x30] sm:$0xff]  }
  0xb8   : > { %1200 = vmatprep.mubr.bf16.mxu0 %v7868_v7  ;;  %6809 = vmatpush3.bf16.msra.mxu1 %v7918_v6 }
  0xbf   : > { %1201 = vmatmul.mubr.bf16.gmra.mrb[52].mxu0 %v7870_v8 }
  0xc0   : > { %1208 = vmatprep.mubr.bf16.mxu0 %v7871_v9 }
  0xc7   : > { %1209 = vmatmul.mubr.bf16.gmra.mrb[56].mxu0 %v7873_v12 }
  0xc8   : > { %1216 = vmatprep.mubr.bf16.mxu0 %v7876_v13 }
  0xcf   : > { %1217 = vmatmul.mubr.bf16.gmra.mrb[60].mxu0 %v7878_v14 }
  0xd0   : > { %1224 = vmatprep.mubr.bf16.mxu0 %v7879_v15 }
  0xd7   : > { %1225 = vmatmul.mubr.bf16.gmra.mrb[64].mxu0 %v7881_v16  ;;  %v7919_v16 = vld [vmem:[%s10833_s3 + $0x78] sm:$0xff]  }
  0xd8   : > { %1232 = vmatprep.mubr.bf16.mxu0 %v7884_v17  ;;  %6810 = vmatprep.subr.bf16.mxu1 %v7919_v16 }
  0xdf   : > { %1233 = vmatmul.mubr.bf16.gmra.mrb[68].mxu0 %v7886_v18 }
  0xe0   : > { %1240 = vmatprep.mubr.bf16.mxu0 %v7887_v19 }
  0xe7   : > { %1241 = vmatmul.mubr.bf16.gmra.mrb[72].mxu0 %v7889_v20 }
  0xe8   : > { %1248 = vmatprep.mubr.bf16.mxu0 %v7892_v21 }
  0xef   : > { %1249 = vmatmul.mubr.bf16.gmra.mrb[76].mxu0 %v7894_v22 }
  0xf0   : > { %1256 = vmatprep.mubr.bf16.mxu0 %v7895_v23  ;;  %v7920_v23 = vld [vmem:[%s10833_s3 + $0x38] sm:$0xff]  }
  0xf1   : > { %6811 = vmatpush3.bf16.msra.mxu1 %v7920_v23 }
  0xf7   : > { %1257 = vmatmul.mubr.bf16.gmra.mrb[80].mxu0 %v7897_v24 }
  0xf8   : > { %1264 = vmatprep.mubr.bf16.mxu0 %v7898_v25 }
  0xff   : > { %1265 = vmatmul.mubr.bf16.gmra.mrb[84].mxu0 %v7900_v26 }
 0x10c   : > { %v8576_v27 = vpop.f32.mrb[0].mxu1 }
 0x10d   : > { %v1319_v28 = vpop.f32.mrb[1].mxu1 }
 0x10e   : > { %v8578_v29 = vpop.f32.mrb[2].mxu1 }
 0x10f   : > { %v1322_v30 = vpop.f32.mrb[3].mxu1 }
 0x114   : > { %v8586_v33 = vpop.f32.mrb[4].mxu1 }
 0x115   : > { %v8588_v34 = vpop.f32.mrb[5].mxu1 }
 0x116   : > { %v8590_v35 = vpop.f32.mrb[6].mxu1 }
 0x117   : > { %v8595_v37 = vpop.f32.mrb[7].mxu1 }
 0x11c   : > { %v8606_v41 = vpop.f32.mrb[8].mxu1 }
 0x11d   : > { %v8608_v42 = vpop.f32.mrb[9].mxu1 }
 0x11e   : > { %v8615_v44 = vpop.f32.mrb[10].mxu1 }
 0x11f   : > { %v8620_v46 = vpop.f32.mrb[11].mxu1 }
 0x124   : > { %v8632_v54 = vpop.f32.mrb[12].mxu1 }
 0x125   : > { %v8637_v58 = vpop.f32.mrb[13].mxu1 }
 0x126   : > { %v8639_v59 = vpop.f32.mrb[14].mxu1 }
 0x127   : > { %v8646_v62 = vpop.f32.mrb[15].mxu1 }
 0x12a   : > { %v1098_v48 = vpop.f32.mrb[0].mxu0 }
 0x12b   : > { %v1099_v50 = vadd.f32 %v8613_v43, %v1098_v48  ;;  %v1100_v51 = vpop.f32.mrb[1].mxu0 }
 0x12c   : > { %v1101_v53 = vpop.f32.mrb[2].mxu0  ;;  %v8662_v10 = vpop.f32.mrb[16].mxu1 }
 0x12d   : > { %v1102_v55 = vadd.f32 %v8613_v43, %v1101_v53  ;;  %v8635_v56 = vadd.f32 %v1319_v28, %v1099_v50  ;;  %v1103_v57 = vpop.f32.mrb[3].mxu0  ;;  %v8668_v14 = vpop.f32.mrb[17].mxu1 }
 0x12e   : > { %v8670_v15 = vpop.f32.mrb[18].mxu1 }
 0x12f   : > { %v8644_v61 = vadd.f32 %v1322_v30, %v1102_v55  ;;  %v1506_v7 = vmax.f32 %v8635_v56, 0.0  ;;  %v8679_v19 = vpop.f32.mrb[19].mxu1 }
 0x131   : > { %v1507_v8 = vmax.f32 %v8644_v61, 0.0  ;;  %v1571_v20 = vrot.slane %v1506_v7, 1 }
 0x132   : > { %v1106_v1 = vpop.f32.mrb[4].mxu0 }
 0x133   : > { %v1107_v4 = vadd.f32 %v8613_v43, %v1106_v1  ;;  %v1108_v5 = vpop.f32.mrb[5].mxu0  ;;  %v1572_v21 = vrot.slane %v1507_v8, 1 }
 0x134   : > { %v1109_v9 = vpop.f32.mrb[6].mxu0  ;;  %v8694_v30 = vpop.f32.mrb[20].mxu1 }
 0x135   : > { %v8665_v11 = vadd.f32 %v8576_v27, %v1107_v4  ;;  %v1110_v12 = vadd.f32 %v8613_v43, %v1109_v9  ;;  %v1111_v13 = vpop.f32.mrb[7].mxu0  ;;  %v8701_v39 = vpop.f32.mrb[21].mxu1  ;;  %v1573_v48 = vsel %vm1570_vm0, %v1571_v20, %v1572_v21 }
 0x136   : > { %v8703_v45 = vpop.f32.mrb[22].mxu1  ;;  %v7541_v51 = vpack.i.bf16 %v1572_v21, %v1573_v48 }
 0x137   : > { %v1508_v17 = vmax.f32 %v8665_v11, 0.0  ;;  %v8677_v18 = vadd.f32 %v8578_v29, %v1110_v12  ;;  %v8709_v49 = vpop.f32.mrb[23].mxu1 }
 0x139   : > { %v1509_v22 = vmax.f32 %v8677_v18, 0.0  ;;  %v1681_v24 = vrot.slane %v1508_v17, 1 }
 0x13a   : > { %v1114_v25 = vpop.f32.mrb[8].mxu0 }
 0x13b   : > { %v1115_v26 = vadd.f32 %v8613_v43, %v1114_v25  ;;  %v1116_v27 = vpop.f32.mrb[9].mxu0  ;;  %v1682_v28 = vrot.slane %v1509_v22, 1 }
 0x13c   : > { %v1117_v29 = vpop.f32.mrb[10].mxu0 }
 0x13d   : > { %v1118_v31 = vadd.f32 %v8613_v43, %v1117_v29  ;;  %v8698_v32 = vadd.f32 %v8588_v34, %v1115_v26  ;;  %v1119_v36 = vpop.f32.mrb[11].mxu0  ;;  %v1683_v38 = vsel %vm1570_vm0, %v1681_v24, %v1682_v28 }
 0x13e   : > { %v7536_v40 = vpack.i.bf16 %v1682_v28, %v1683_v38 }
 0x13f   : > { %v8706_v47 = vadd.f32 %v8595_v37, %v1118_v31  ;;  %v10860_v34 = vmax.f32 %v8698_v32, 0.0  ;;  %v8716_v37 = vpop.f32.mrb[24].mxu1 }
 0x140   : > { %7537 = vrot.lane.b32.xlu0 %v7536_v40, %s10875_s22  ;;  %v8722_v1 = vpop.f32.mrb[25].mxu1 }
 0x141   : > { %v10861_v52 = vmax.f32 %v8706_v47, 0.0  ;;  %v1574_v2 = vrot.slane %v10860_v34, 1  ;;  %v8726_v3 = vpop.f32.mrb[26].mxu1 }
 0x142   : > { %v1122_v50 = vpop.f32.mrb[12].mxu0  ;;  %v8732_v6 = vpop.f32.mrb[27].mxu1 }
 0x143   : > { %v1123_v53 = vadd.f32 %v8613_v43, %v1122_v50  ;;  %v1124_v55 = vpop.f32.mrb[13].mxu0 }
 0x144   : > { %v1125_v57 = vpop.f32.mrb[14].mxu0  ;;  %7542 = vrot.lane.b32.xlu0 %v7541_v51, %s10875_s22 }
 0x145   : > { %v8719_v60 = vadd.f32 %v8586_v33, %v1123_v53  ;;  %v1126_v63 = vadd.f32 %v8613_v43, %v1125_v57  ;;  %v1127_v0 = vpop.f32.mrb[15].mxu0  ;;  %v1575_v33 = vrot.slane %v10861_v52, 1 }
 0x147   : > { %v10862_v4 = vmax.f32 %v8719_v60, 0.0  ;;  %v8730_v5 = vadd.f32 %v8590_v35, %v1126_v63  ;;  %v8742_v35 = vpop.f32.mrb[28].mxu1  ;;  %v1576_v40 = vsel %vm1570_vm0, %v1574_v2, %v1575_v33 }
 0x148   : > { %v8749_v28 = vpop.f32.mrb[29].mxu1  ;;  %v7551_v51 = vpack.i.bf16 %v1575_v33, %v1576_v40 }
 0x149   : > { %v1513_v9 = vmax.f32 %v8730_v5, 0.0  ;;  %v1684_v12 = vrot.slane %v10862_v4, 1  ;;  %v8751_v31 = vpop.f32.mrb[30].mxu1 }
 0x14a   : > { %v1130_v13 = vpop.f32.mrb[16].mxu0  ;;  %v8758_v48 = vpop.f32.mrb[31].mxu1 }
 0x14b   : > { %v1131_v16 = vadd.f32 %v8613_v43, %v1130_v13  ;;  %v1132_v20 = vpop.f32.mrb[17].mxu0  ;;  %v1685_v21 = vrot.slane %v1513_v9, 1 }
 0x14c   : > { %v1133_v23 = vpop.f32.mrb[18].mxu0  ;;  %v8768_v0 = vpop.f32.mrb[32].mxu1 }
 0x14d   : > { %v1134_v24 = vadd.f32 %v8613_v43, %v1133_v23  ;;  %v8746_v25 = vadd.f32 %v8608_v42, %v1131_v16  ;;  %v1135_v26 = vpop.f32.mrb[19].mxu0  ;;  %v1686_v27 = vsel %vm1570_vm0, %v1684_v12, %v1685_v21  ;;  %v8775_v16 = vpop.f32.mrb[33].mxu1 }
 0x14e   : > { %v7546_v29 = vpack.i.bf16 %v1685_v21, %v1686_v27  ;;  %v8777_v21 = vpop.f32.mrb[34].mxu1 }
 0x14f   : > { %v10844_v36 = vmax.f32 %v8746_v25, 0.0  ;;  %v8755_v38 = vadd.f32 %v8620_v46, %v1134_v24  ;;  %v8783_v26 = vpop.f32.mrb[35].mxu1 }
 0x150   : > { %7547 = vrot.lane.b32.xlu1 %v7546_v29, %s10875_s22 }
 0x151   : > { %v10858_v42 = vmax.f32 %v8755_v38, 0.0  ;;  %v1577_v53 = vrot.slane %v10844_v36, 1 }
 0x152   : > { %v1138_v50 = vpop.f32.mrb[20].mxu0 }
 0x153   : > { %v1578_v55 = vrot.slane %v10858_v42, 1  ;;  %v1139_v57 = vadd.f32 %v8613_v43, %v1138_v50  ;;  %v1140_v46 = vpop.f32.mrb[21].mxu0 }
 0x154   : > { %v1141_v63 = vpop.f32.mrb[22].mxu0  ;;  %7552 = vrot.lane.b32.xlu1 %v7551_v51, %s10875_s22 }
 0x155   : > { %v8771_v2 = vadd.f32 %v8606_v41, %v1139_v57  ;;  %v1142_v12 = vadd.f32 %v8613_v43, %v1141_v63  ;;  %v1143_v33 = vpop.f32.mrb[23].mxu0  ;;  %v1579_v13 = vsel %vm1570_vm0, %v1577_v53, %v1578_v55 }
 0x156   : > { %v7561_v20 = vpack.i.bf16 %v1578_v55, %v1579_v13  ;;  %v8792_v55 = vpop.f32.mrb[36].mxu1 }
 0x157   : > { %v10842_v23 = vmax.f32 %v8771_v2, 0.0  ;;  %v8781_v24 = vadd.f32 %v8615_v44, %v1142_v12  ;;  %v8799_v12 = vpop.f32.mrb[37].mxu1 }
 0x158   : > { %7562 = vrot.lane.b32.xlu1 %v7561_v20, %s10875_s22  ;;  %v8801_v13 = vpop.f32.mrb[38].mxu1 }
 0x159   : > { %v10843_v41 = vmax.f32 %v8781_v24, 0.0  ;;  %v1687_v29 = vrot.slane %v10842_v23, 1 }
 0x15a   : > { %v1146_v27 = vpop.f32.mrb[24].mxu0 }
 0x15b   : > { %v1688_v40 = vrot.slane %v10843_v41, 1  ;;  %v1147_v50 = vadd.f32 %v8613_v43, %v1146_v27  ;;  %v1148_v51 = vpop.f32.mrb[25].mxu0 }
 0x15c   : > { %v1149_v53 = vpop.f32.mrb[26].mxu0  ;;  %v8807_v51 = vpop.f32.mrb[39].mxu1 }
 0x15d   : > { %v1150_v44 = vadd.f32 %v8613_v43, %v1149_v53  ;;  %v8796_v57 = vadd.f32 %v8637_v58, %v1147_v50  ;;  %v1151_v46 = vpop.f32.mrb[27].mxu0  ;;  %v1689_v63 = vsel %vm1570_vm0, %v1687_v29, %v1688_v40 }
 0x15e   : > { %v7556_v33 = vpack.i.bf16 %v1688_v40, %v1689_v63 }
 0x15f   : > { %v10845_v20 = vmax.f32 %v8796_v57, 0.0  ;;  %v8805_v27 = vadd.f32 %v8646_v62, %v1150_v44 }
 0x160   : > { %7557 = vrot.lane.b32.xlu0 %v7556_v33, %s10875_s22 }
 0x161   : > { %v10846_v58 = vmax.f32 %v8805_v27, 0.0  ;;  %v1580_v29 = vrot.slane %v10845_v20, 1 }
 0x162   : > { %v1154_v50 = vpop.f32.mrb[28].mxu0 }
 0x163   : > { %v1581_v40 = vrot.slane %v10846_v58, 1  ;;  %v1155_v53 = vadd.f32 %v8613_v43, %v1154_v50  ;;  %v1156_v46 = vpop.f32.mrb[29].mxu0 }
 0x164   : > { %v1157_v63 = vpop.f32.mrb[30].mxu0 }
 0x165   : > { %v8817_v62 = vadd.f32 %v8632_v54, %v1155_v53  ;;  %v1158_v44 = vadd.f32 %v8613_v43, %v1157_v63  ;;  %v1159_v23 = vpop.f32.mrb[31].mxu0  ;;  %v1582_v33 = vsel %vm1570_vm0, %v1580_v29, %v1581_v40 }
 0x166   : > { %v7571_v41 = vpack.i.bf16 %v1581_v40, %v1582_v33 }
 0x167   : > { %v10847_v36 = vmax.f32 %v8817_v62, 0.0  ;;  %v8823_v20 = vadd.f32 %v8639_v59, %v1158_v44 }
 0x168   : > { %7572 = vrot.lane.b32.xlu1 %v7571_v41, %s10875_s22 }
 0x169   : > { %v10848_v50 = vmax.f32 %v8823_v20, 0.0  ;;  %v1690_v54 = vrot.slane %v10847_v36, 1 }
 0x16a   : > { %v1162_v46 = vpop.f32.mrb[32].mxu0 }
 0x16b   : > { %v1691_v53 = vrot.slane %v10848_v50, 1  ;;  %v1163_v23 = vadd.f32 %v8613_v43, %v1162_v46  ;;  %v1164_v29 = vpop.f32.mrb[33].mxu0 }
 0x16c   : > { %v1165_v40 = vpop.f32.mrb[34].mxu0 }
 0x16d   : > { %v1166_v63 = vadd.f32 %v8613_v43, %v1165_v40  ;;  %v8834_v59 = vadd.f32 %v8668_v14, %v1163_v23  ;;  %v1167_v44 = vpop.f32.mrb[35].mxu0  ;;  %v1692_v41 = vsel %vm1570_vm0, %v1690_v54, %v1691_v53 }
 0x16e   : > { %v7566_v33 = vpack.i.bf16 %v1691_v53, %v1692_v41 }
 0x16f   : > { %v10849_v58 = vmax.f32 %v8834_v59, 0.0  ;;  %v8839_v36 = vadd.f32 %v8679_v19, %v1166_v63 }
 0x170   : > { %7567 = vrot.lane.b32.xlu0 %v7566_v33, %s10875_s22 }
 0x171   : > { %v10851_v46 = vmax.f32 %v8839_v36, 0.0  ;;  %v1583_v40 = vrot.slane %v10849_v58, 1 }
 0x172   : > { %v1170_v29 = vpop.f32.mrb[36].mxu0 }
 0x173   : > { %v1584_v14 = vrot.slane %v10851_v46, 1  ;;  %v1171_v23 = vadd.f32 %v8613_v43, %v1170_v29  ;;  %v1172_v54 = vpop.f32.mrb[37].mxu0 }
 0x174   : > { %v1173_v53 = vpop.f32.mrb[38].mxu0 }
 0x175   : > { %v8849_v44 = vadd.f32 %v8662_v10, %v1171_v23  ;;  %v1174_v19 = vadd.f32 %v8613_v43, %v1173_v53  ;;  %v1175_v63 = vpop.f32.mrb[39].mxu0  ;;  %v1585_v41 = vsel %vm1570_vm0, %v1583_v40, %v1584_v14 }
 0x176   : > { %v7581_v33 = vpack.i.bf16 %v1584_v14, %v1585_v41 }
 0x177   : > { %v10850_v50 = vmax.f32 %v8849_v44, 0.0  ;;  %v8855_v58 = vadd.f32 %v8670_v15, %v1174_v19 }
 0x178   : > { %7582 = vrot.lane.b32.xlu1 %v7581_v33, %s10875_s22 }
 0x179   : > { %v10852_v29 = vmax.f32 %v8855_v58, 0.0  ;;  %v1693_v10 = vrot.slane %v10850_v50, 1  ;;  %v7921_v50 = vld [vmem:[%s10833_s3 + $0xc0] sm:$0xff]  }
 0x17a   : > { %v1178_v54 = vpop.f32.mrb[40].mxu0  ;;  %6872 = vmatprep.subr.bf16.mxu1 %v7921_v50 }
 0x17b   : > { %v1694_v23 = vrot.slane %v10852_v29, 1  ;;  %v1179_v53 = vadd.f32 %v8613_v43, %v1178_v54  ;;  %v1180_v40 = vpop.f32.mrb[41].mxu0 }
 0x17c   : > { %v1181_v14 = vpop.f32.mrb[42].mxu0 }
 0x17d   : > { %v1182_v63 = vadd.f32 %v8613_v43, %v1181_v14  ;;  %v8866_v15 = vadd.f32 %v8701_v39, %v1179_v53  ;;  %v1183_v19 = vpop.f32.mrb[43].mxu0  ;;  %v1695_v41 = vsel %vm1570_vm0, %v1693_v10, %v1694_v23 }
 0x17e   : > { %v7576_v33 = vpack.i.bf16 %v1694_v23, %v1695_v41 }
 0x17f   : > { %v10853_v46 = vmax.f32 %v8866_v15, 0.0  ;;  %v8874_v29 = vadd.f32 %v8709_v49, %v1182_v63 }
 0x180   : > { %7577 = vrot.lane.b32.xlu0 %v7576_v33, %s10875_s22 }
 0x181   : > { %v10854_v54 = vmax.f32 %v8874_v29, 0.0  ;;  %v1586_v53 = vrot.slane %v10853_v46, 1 }
 0x182   : > { %v1186_v39 = vpop.f32.mrb[44].mxu0 }
 0x183   : > { %v1587_v10 = vrot.slane %v10854_v54, 1  ;;  %v1187_v23 = vadd.f32 %v8613_v43, %v1186_v39  ;;  %v1188_v40 = vpop.f32.mrb[45].mxu0 }
 0x184   : > { %v1189_v14 = vpop.f32.mrb[46].mxu0 }
 0x185   : > { %v8884_v19 = vadd.f32 %v8694_v30, %v1187_v23  ;;  %v1190_v49 = vadd.f32 %v8613_v43, %v1189_v14  ;;  %v1191_v63 = vpop.f32.mrb[47].mxu0  ;;  %v1588_v50 = vsel %vm1570_vm0, %v1586_v53, %v1587_v10 }
 0x186   : > { %v7591_v41 = vpack.i.bf16 %v1587_v10, %v1588_v50 }
 0x187   : > { %v10855_v33 = vmax.f32 %v8884_v19, 0.0  ;;  %v8890_v46 = vadd.f32 %v8703_v45, %v1190_v49 }
 0x188   : > { %7592 = vrot.lane.b32.xlu1 %v7591_v41, %s10875_s22 }
 0x189   : > { %v10856_v39 = vmax.f32 %v8890_v46, 0.0  ;;  %v1696_v30 = vrot.slane %v10855_v33, 1 }
 0x18a   : > { %v1194_v40 = vpop.f32.mrb[48].mxu0 }
 0x18b   : > { %v1697_v23 = vrot.slane %v10856_v39, 1  ;;  %v1195_v14 = vadd.f32 %v8613_v43, %v1194_v40  ;;  %v1196_v53 = vpop.f32.mrb[49].mxu0  ;;  %v8920_v39 = vpop.f32.mrb[40].mxu1 }
 0x18c   : > { %v1197_v10 = vpop.f32.mrb[50].mxu0 }
 0x18d   : > { %v1198_v63 = vadd.f32 %v8613_v43, %v1197_v10  ;;  %v8901_v45 = vadd.f32 %v8722_v1, %v1195_v14  ;;  %v1199_v49 = vpop.f32.mrb[51].mxu0  ;;  %v1698_v50 = vsel %vm1570_vm0, %v1696_v30, %v1697_v23 }
 0x18e   : > { %v7586_v41 = vpack.i.bf16 %v1697_v23, %v1698_v50 }
 0x18f   : > { %v10857_v54 = vmax.f32 %v8901_v45, 0.0  ;;  %v8906_v33 = vadd.f32 %v8732_v6, %v1198_v63 }
 0x190   : > { %7587 = vrot.lane.b32.xlu0 %v7586_v41, %s10875_s22 }
 0x191   : > { %v10859_v40 = vmax.f32 %v8906_v33, 0.0  ;;  %v1589_v10 = vrot.slane %v10857_v54, 1 }
 0x192   : > { %v1202_v53 = vpop.f32.mrb[52].mxu0 }
 0x193   : > { %v1590_v1 = vrot.slane %v10859_v40, 1  ;;  %v1203_v14 = vadd.f32 %v8613_v43, %v1202_v53  ;;  %v1204_v30 = vpop.f32.mrb[53].mxu0  ;;  %v8926_v40 = vpop.f32.mrb[41].mxu1 }
 0x194   : > { %v1205_v23 = vpop.f32.mrb[54].mxu0  ;;  %v8929_v53 = vpop.f32.mrb[42].mxu1 }
 0x195   : > { %v8916_v49 = vadd.f32 %v8716_v37, %v1203_v14  ;;  %v1206_v6 = vadd.f32 %v8613_v43, %v1205_v23  ;;  %v1207_v63 = vpop.f32.mrb[55].mxu0  ;;  %v1591_v50 = vsel %vm1570_vm0, %v1589_v10, %v1590_v1  ;;  %v8932_v14 = vpop.f32.mrb[43].mxu1 }
 0x196   : > { %v7601_v41 = vpack.i.bf16 %v1590_v1, %v1591_v50 }
 0x197   : > { %v10863_v54 = vmax.f32 %v8916_v49, 0.0  ;;  %v8924_v42 = vadd.f32 %v8726_v3, %v1206_v6 }
 0x198   : > { %7602 = vrot.lane.b32.xlu1 %v7601_v41, %s10875_s22 }
 0x199   : > { %v10864_v37 = vmax.f32 %v8924_v42, 0.0  ;;  %v1699_v10 = vrot.slane %v10863_v54, 1 }
 0x19a   : > { %v1210_v30 = vpop.f32.mrb[56].mxu0 }
 0x19b   : > { %v1700_v1 = vrot.slane %v10864_v37, 1  ;;  %v1211_v3 = vadd.f32 %v8613_v43, %v1210_v30  ;;  %v1212_v23 = vpop.f32.mrb[57].mxu0 }
 0x19c   : > { %v1213_v6 = vpop.f32.mrb[58].mxu0 }
 0x19d   : > { %v1214_v63 = vadd.f32 %v8613_v43, %v1213_v6  ;;  %v8941_v50 = vadd.f32 %v8749_v28, %v1211_v3  ;;  %v1215_v41 = vpop.f32.mrb[59].mxu0  ;;  %v1701_v34 = vsel %vm1570_vm0, %v1699_v10, %v1700_v1 }
 0x19e   : > { %v7596_v52 = vpack.i.bf16 %v1700_v1, %v1701_v34 }
 0x19f   : > { %v10865_v4 = vmax.f32 %v8941_v50, 0.0  ;;  %v8946_v54 = vadd.f32 %v8758_v48, %v1214_v63 }
 0x1a0   : > { %7597 = vrot.lane.b32.xlu0 %v7596_v52, %s10875_s22 }
 0x1a1   : > { %v10866_v30 = vmax.f32 %v8946_v54, 0.0  ;;  %v1592_v6 = vrot.slane %v10865_v4, 1 }
 0x1a2   : > { %v1218_v23 = vpop.f32.mrb[60].mxu0 }
 0x1a3   : > { %v1593_v28 = vrot.slane %v10866_v30, 1  ;;  %v1219_v3 = vadd.f32 %v8613_v43, %v1218_v23  ;;  %v1220_v10 = vpop.f32.mrb[61].mxu0 }
 0x1a4   : > { %v1221_v34 = vpop.f32.mrb[62].mxu0 }
 0x1a5   : > { %v8956_v1 = vadd.f32 %v8742_v35, %v1219_v3  ;;  %v1222_v48 = vadd.f32 %v8613_v43, %v1221_v34  ;;  %v1223_v63 = vpop.f32.mrb[63].mxu0  ;;  %v1594_v52 = vsel %vm1570_vm0, %v1592_v6, %v1593_v28 }
 0x1a6   : > { %v7611_v41 = vpack.i.bf16 %v1593_v28, %v1594_v52 }
 0x1a7   : > { %v10867_v37 = vmax.f32 %v8956_v1, 0.0  ;;  %v8962_v4 = vadd.f32 %v8751_v31, %v1222_v48 }
 0x1a8   : > { %7612 = vrot.lane.b32.xlu1 %v7611_v41, %s10875_s22 }
 0x1a9   : > { %v10868_v23 = vmax.f32 %v8962_v4, 0.0  ;;  %v1702_v35 = vrot.slane %v10867_v37, 1 }
 0x1aa   : > { %v1226_v10 = vpop.f32.mrb[64].mxu0 }
 0x1ab   : > { %v1703_v3 = vrot.slane %v10868_v23, 1  ;;  %v1227_v34 = vadd.f32 %v8613_v43, %v1226_v10  ;;  %v1228_v6 = vpop.f32.mrb[65].mxu0 }
 0x1ac   : > { %v1229_v28 = vpop.f32.mrb[66].mxu0 }
 0x1ad   : > { %v1230_v63 = vadd.f32 %v8613_v43, %v1229_v28  ;;  %v8973_v31 = vadd.f32 %v8775_v16, %v1227_v34  ;;  %v1231_v48 = vpop.f32.mrb[67].mxu0  ;;  %v1704_v52 = vsel %vm1570_vm0, %v1702_v35, %v1703_v3 }
 0x1ae   : > { %v7606_v41 = vpack.i.bf16 %v1703_v3, %v1704_v52 }
 0x1af   : > { %v8977_v30 = vadd.f32 %v8783_v26, %v1230_v63  ;;  %v10870_v37 = vmax.f32 %v8973_v31, 0.0 }
 0x1b0   : > { %7607 = vrot.lane.b32.xlu0 %v7606_v41, %s10875_s22 }
 0x1b1   : > { %v10869_v10 = vmax.f32 %v8977_v30, 0.0  ;;  %v1595_v26 = vrot.slane %v10870_v37, 1 }
 0x1b2   : > { %v1234_v6 = vpop.f32.mrb[68].mxu0  ;;  %v7538_v23 = vpop.permute.xlu0 %7537 }
 0x1b3   : > { %v1596_v16 = vrot.slane %v10869_v10, 1  ;;  %v1235_v34 = vadd.f32 %v8613_v43, %v1234_v6  ;;  %v7540_v35 = vunpack.i.h.bf16 %v7538_v23  ;;  %v7539_v3 = vunpack.i.l.bf16 %v7538_v23  ;;  %v1236_v28 = vpop.f32.mrb[69].mxu0  ;;  %v7940_v23 = vld [vmem:[%s10835_s5 + $0x8] sm:$0xff]  }
 0x1b4   : > { %v1237_v63 = vpop.f32.mrb[70].mxu0 }
 0x1b5   : > { %v8988_v48 = vadd.f32 %v8768_v0, %v1235_v34  ;;  %v1815_v52 = vsel %vm1793_vm1, %v1509_v22, %v7540_v35  ;;  %v1814_v41 = vsel %vm1793_vm1, %v1508_v17, %v7539_v3  ;;  %v1238_v6 = vadd.f32 %v8613_v43, %v1237_v63  ;;  %v1239_v10 = vpop.f32.mrb[71].mxu0 }
 0x1b6   : > { %v6344_v28 = vpack.c.bf16 %v1815_v52, %v1814_v41  ;;  %v7543_v37 = vpop.permute.xlu0 %7542  ;;  %v1597_v0 = vsel %vm1570_vm0, %v1595_v26, %v1596_v16 }
 0x1b7   : > { %v1540_v18 = vmax.f32 %v8988_v48, 0.0  ;;  %v9004_v22 = vadd.f32 %v8777_v21, %v1238_v6  ;;  %v7545_v11 = vunpack.i.h.bf16 %v7543_v37  ;;  %v7544_v34 = vunpack.i.l.bf16 %v7543_v37  ;;  %v7922_v21 = vld [vmem:[%s10833_s3 + $0x80] sm:$0xff]  }
 0x1b8   : > { %v7621_v17 = vpack.i.bf16 %v1596_v16, %v1597_v0  ;;  %6345 = vmatprep.mubr.msk.bf16.mxu1 %vm8997_vm4, %v6344_v28  ;;  %v7923_v16 = vld [vmem:[%s10833_s3 + $0xc8] sm:$0xff]  }
 0x1b9   : > { %v1541_v10 = vmax.f32 %v9004_v22, 0.0  ;;  %v1795_v35 = vsel %vm1793_vm1, %v1507_v8, %v7545_v11  ;;  %v1794_v3 = vsel %vm1793_vm1, %v1506_v7, %v7544_v34  ;;  %v1705_v61 = vrot.slane %v1540_v18, 1  ;;  %v7924_v0 = vld [vmem:[%s10833_s3 + $0x88] sm:$0xff]   ;;  %v7925_v34 = vld [vmem:[%s10833_s3 + $0xd0] sm:$0xff]  }
 0x1ba   : > { %v6347_v26 = vpack.c.bf16 %v1795_v35, %v1794_v3  ;;  %7622 = vrot.lane.b32.xlu1 %v7621_v17, %s10875_s22  ;;  %v1242_v37 = vpop.f32.mrb[72].mxu0  ;;  %v7926_v3 = vld [vmem:[%s10833_s3 + $0x90] sm:$0xff]  }
 0x1bb   : > { %v1706_v56 = vrot.slane %v1541_v10, 1  ;;  %v1243_v7 = vadd.f32 %v8613_v43, %v1242_v37  ;;  %v1244_v8 = vpop.f32.mrb[73].mxu0  ;;  %v7927_v37 = vld [vmem:[%s10833_s3 + $0xd8] sm:$0xff]  }
 0x1bc   : > { %v1245_v63 = vpop.f32.mrb[74].mxu0  ;;  %6348 = vmatmul.mubr.msk.bf16.vlgmr.msra.gmra.mrb[48].mxu1 %vm8997_vm4, %v6347_v26 }
 0x1bd   : > { %v1246_v52 = vadd.f32 %v8613_v43, %v1245_v63  ;;  %v9031_v41 = vadd.f32 %v8799_v12, %v1243_v7  ;;  %v1247_v6 = vpop.f32.mrb[75].mxu0  ;;  %v1707_v28 = vsel %vm1570_vm0, %v1705_v61, %v1706_v56  ;;  %6873 = vmatpush3.bf16.msra.mxu1 %v7922_v21 }
 0x1be   : > { %v7616_v11 = vpack.i.bf16 %v1706_v56, %v1707_v28  ;;  %6874 = vmatprep.subr.bf16.mxu1 %v7923_v16  ;;  %v10886_v28 = vmax.f32 %v8719_v60, 0.0  ;;  %v7929_v60 = vld [vmem:[%s10833_s3 + $0xe0] sm:$0xff]  }
 0x1bf   : > { %v9041_v17 = vadd.f32 %v8807_v51, %v1246_v52  ;;  %v1542_v12 = vmax.f32 %v9031_v41, 0.0 }
 0x1c0   : > { %7617 = vrot.lane.b32.xlu0 %v7616_v11, %s10875_s22 }
 0x1c1   : > { %v1543_v35 = vmax.f32 %v9041_v17, 0.0  ;;  %6875 = vmatpush3.bf16.msra.mxu1 %v7924_v0  ;;  %v1598_v8 = vrot.slane %v1542_v12, 1 }
 0x1c2   : > { %v1250_v21 = vpop.f32.mrb[76].mxu0  ;;  %v7548_v26 = vpop.permute.xlu1 %7547  ;;  %6876 = vmatprep.subr.bf16.mxu1 %v7925_v34 }
 0x1c3   : > { %v1599_v51 = vrot.slane %v1543_v35, 1  ;;  %v1251_v16 = vadd.f32 %v8613_v43, %v1250_v21  ;;  %v7550_v61 = vunpack.i.h.bf16 %v7548_v26  ;;  %v7549_v56 = vunpack.i.l.bf16 %v7548_v26  ;;  %v1252_v7 = vpop.f32.mrb[77].mxu0  ;;  %v7928_v21 = vld [vmem:[%s10833_s3 + $0x98] sm:$0xff]  }
 0x1c4   : > { %v1253_v63 = vpop.f32.mrb[78].mxu0 }
 0x1c5   : > { %v9058_v52 = vadd.f32 %v8792_v55, %v1251_v16  ;;  %v1817_v6 = vsel %vm1793_vm1, %v1513_v9, %v7550_v61  ;;  %v1816_v0 = vsel %vm1793_vm1, %v10886_v28, %v7549_v56  ;;  %v1254_v11 = vadd.f32 %v8613_v43, %v1253_v63  ;;  %v1255_v34 = vpop.f32.mrb[79].mxu0  ;;  %6877 = vmatpush3.bf16.msra.mxu1 %v7926_v3 }
 0x1c6   : > { %v9070_v26 = vpack.c.bf16 %v1817_v6, %v1816_v0  ;;  %v7553_v55 = vpop.permute.xlu1 %7552  ;;  %v1600_v16 = vsel %vm1570_vm0, %v1598_v8, %v1599_v51  ;;  %6878 = vmatprep.subr.bf16.mxu1 %v7927_v37  ;;  %v10887_v37 = vmax.f32 %v8706_v47, 0.0  ;;  %v10888_v63 = vmax.f32 %v8698_v32, 0.0  ;;  %v7931_v47 = vld [vmem:[%s10833_s3 + $0xe8] sm:$0xff]  }
 0x1c7   : > { %v10872_v5 = vmax.f32 %v9058_v52, 0.0  ;;  %v9078_v9 = vadd.f32 %v8801_v13, %v1254_v11  ;;  %v7555_v3 = vunpack.i.h.bf16 %v7553_v55  ;;  %v7554_v61 = vunpack.i.l.bf16 %v7553_v55  ;;  %v7930_v13 = vld [vmem:[%s10833_s3 + $0xa0] sm:$0xff]  }
 0x1c8   : > { %v7631_v56 = vpack.i.bf16 %v1599_v51, %v1600_v16  ;;  %6351 = vmatprep.mubr.msk.bf16.mxu1 %vm8997_vm4, %v9070_v26 }
 0x1c9   : > { %v10873_v7 = vmax.f32 %v9078_v9, 0.0  ;;  %v1797_v8 = vsel %vm1793_vm1, %v10887_v37, %v7555_v3  ;;  %v1796_v6 = vsel %vm1793_vm1, %v10888_v63, %v7554_v61  ;;  %6879 = vmatpush3.bf16.msra.mxu1 %v7928_v21  ;;  %v1708_v32 = vrot.slane %v10872_v5, 1  ;;  %v7932_v61 = vld [vmem:[%s10833_s3 + $0xa8] sm:$0xff]  }
 0x1ca   : > { %v9093_v51 = vpack.c.bf16 %v1797_v8, %v1796_v6  ;;  %7632 = vrot.lane.b32.xlu1 %v7631_v56, %s10875_s22  ;;  %v1258_v28 = vpop.f32.mrb[80].mxu0  ;;  %6880 = vmatprep.subr.bf16.mxu1 %v7929_v60  ;;  %v7563_v55 = vpop.permute.xlu1 %7562  ;;  %v7933_v8 = vld [vmem:[%s10833_s3 + $0xf0] sm:$0xff]  }
 0x1cb   : > { %v1709_v0 = vrot.slane %v10873_v7, 1  ;;  %v1259_v11 = vadd.f32 %v8613_v43, %v1258_v28  ;;  %v1260_v34 = vpop.f32.mrb[81].mxu0  ;;  %v7565_v6 = vunpack.i.h.bf16 %v7563_v55  ;;  %v10892_v7 = vmax.f32 %v8771_v2, 0.0 }
 0x1cc   : > { %6354 = vmatmul.mubr.msk.bf16.gmra.mrb[52].mxu1 %vm8997_vm4, %v9093_v51  ;;  %v1261_v21 = vpop.f32.mrb[82].mxu0 }
 0x1cd   : > { %v1710_v16 = vsel %vm1570_vm0, %v1708_v32, %v1709_v0  ;;  %v1262_v60 = vadd.f32 %v8613_v43, %v1261_v21  ;;  %v1263_v3 = vpop.f32.mrb[83].mxu0  ;;  %6881 = vmatpush3.bf16.msra.mxu1 %v7930_v13  ;;  %v9113_v37 = vadd.f32 %v8926_v40, %v1259_v11  ;;  %v7564_v43 = vunpack.i.l.bf16 %v7563_v55  ;;  %v7934_v40 = vld [vmem:[%s10833_s3 + $0xb0] sm:$0xff]   ;;  %v8235_v21 = vld [vmem:[%s10832_s2] ss:$0 sm:$0xff] }
 0x1ce   : > { %v7626_v56 = vpack.i.bf16 %v1709_v0, %v1710_v16  ;;  %6882 = vmatprep.subr.bf16.mxu1 %v7931_v47  ;;  %v10889_v3 = vmax.f32 %v8755_v38, 0.0 }
 0x1cf   : > { %v9119_v63 = vadd.f32 %v8932_v14, %v1262_v60  ;;  %v10871_v13 = vmax.f32 %v9113_v37, 0.0  ;;  %v7935_v14 = vld [vmem:[%s10833_s3 + $0xf8] sm:$0xff]  }
 0x1d0   : > { %7627 = vrot.lane.b32.xlu0 %v7626_v56, %s10875_s22  ;;  %v10890_v56 = vmax.f32 %v8746_v25, 0.0 }
 0x1d1   : > { %v10874_v28 = vmax.f32 %v9119_v63, 0.0  ;;  %6883 = vmatpush3.bf16.msra.mxu1 %v7932_v61  ;;  %v1773_v0 = vrot.slane %v10871_v13, 1  ;;  %v1799_v61 = vsel %vm1793_vm1, %v10889_v3, %v7565_v6  ;;  %v10893_v3 = vmax.f32 %v8805_v27, 0.0 }
 0x1d2   : > { %v7558_v47 = vpop.permute.xlu0 %7557  ;;  %v1266_v32 = vpop.f32.mrb[84].mxu0  ;;  %6884 = vmatprep.subr.bf16.mxu1 %v7933_v8  ;;  %v1798_v8 = vsel %vm1793_vm1, %v10890_v56, %v7564_v43  ;;  %v10894_v56 = vmax.f32 %v8796_v57, 0.0 }
 0x1d3   : > { %v7560_v11 = vunpack.i.h.bf16 %v7558_v47  ;;  %v7559_v34 = vunpack.i.l.bf16 %v7558_v47  ;;  %v1267_v55 = vadd.f32 %v8235_v21, %v1266_v32  ;;  %v1268_v16 = vpop.f32.mrb[85].mxu0  ;;  %v1774_v60 = vrot.slane %v10874_v28, 1 }
 0x1d4   : > { %v1269_v13 = vpop.f32.mrb[86].mxu0  ;;  %v10891_v47 = vmax.f32 %v8781_v24, 0.0  ;;  %v7936_v24 = vld [vmem:[%s10833_s3 + $0xb8] sm:$0xff]   ;;  %v9158_v43 = vpack.c.bf16 %v1799_v61, %v1798_v8 }
 0x1d5   : > { %v1818_v32 = vsel %vm1793_vm1, %v10892_v7, %v7559_v34  ;;  %v1270_v16 = vadd.f32 %v8235_v21, %v1269_v13  ;;  %v9150_v28 = vadd.f32 %v8920_v39, %v1267_v55  ;;  %6885 = vmatpush3.bf16.msra.mxu1 %v7934_v40  ;;  %v1271_v38 = vpop.f32.mrb[87].mxu0  ;;  %v1775_v25 = vsel %vm1570_vm0, %v1773_v0, %v1774_v60 }
 0x1d6   : > { %v1819_v5 = vsel %vm1793_vm1, %v10891_v47, %v7560_v11  ;;  %6886 = vmatprep.subr.bf16.mxu1 %v7935_v14  ;;  %v7641_v39 = vpack.i.bf16 %v1774_v60, %v1775_v25  ;;  %v10895_v47 = vmax.f32 %v8823_v20, 0.0 }
 0x1d7   : > { %v9152_v6 = vpack.c.bf16 %v1819_v5, %v1818_v32  ;;  %v1548_v2 = vmax.f32 %v9150_v28, 0.0  ;;  %v9162_v7 = vadd.f32 %v8929_v53, %v1270_v16  ;;  %v10896_v16 = vmax.f32 %v8817_v62, 0.0 }
 0x1d8   : > { %7642 = vrot.lane.b32.xlu1 %v7641_v39, %s10875_s22  ;;  %v10917_v28 = vmax.f32 %v9119_v63, 0.0 }
 0x1d9   : > { %6357 = vmatprep.mubr.msk.bf16.mxu1 %vm8997_vm4, %v9152_v6  ;;  %v1784_v5 = vrot.slane %v1548_v2, 1  ;;  %v1549_v13 = vmax.f32 %v9162_v7, 0.0  ;;  %6887 = vmatpush3.bf16.msra.mxu1 %v7936_v24 }
 0x1da   : > { %6360 = vmatmul.mubr.msk.bf16.gmra.mrb[56].mxu1 %vm8997_vm4, %v9158_v43  ;;  %v7573_v40 = vpop.permute.xlu1 %7572 }
 0x1db   : > { %v1785_v53 = vrot.slane %v1549_v13, 1  ;;  %v7575_v11 = vunpack.i.h.bf16 %v7573_v40  ;;  %v7574_v34 = vunpack.i.l.bf16 %v7573_v40 }
 0x1dd   : > { %v1786_v0 = vsel %vm1570_vm0, %v1784_v5, %v1785_v53  ;;  %v1801_v61 = vsel %vm1793_vm1, %v10893_v3, %v7575_v11  ;;  %v1800_v8 = vsel %vm1793_vm1, %v10894_v56, %v7574_v34  ;;  %v10899_v11 = vmax.f32 %v8855_v58, 0.0 }
 0x1de   : > { %v7636_v14 = vpack.i.bf16 %v1785_v53, %v1786_v0  ;;  %v9192_v24 = vpack.c.bf16 %v1801_v61, %v1800_v8  ;;  %v10897_v53 = vmax.f32 %v8839_v36, 0.0  ;;  %v10898_v0 = vmax.f32 %v8834_v59, 0.0 }
 0x1df   : > { %v10901_v8 = vmax.f32 %v8874_v29, 0.0 }
 0x1e0   : > { %7637 = vrot.lane.b32.xlu0 %v7636_v14, %s10875_s22 }
 0x1e2   : > { %v7568_v21 = vpop.permute.xlu0 %7567 }
 0x1e3   : > { %v7570_v55 = vunpack.i.h.bf16 %v7568_v21  ;;  %v7569_v60 = vunpack.i.l.bf16 %v7568_v21  ;;  %v10900_v21 = vmax.f32 %v8849_v44, 0.0 }
 0x1e5   : > { %v1821_v32 = vsel %vm1793_vm1, %v10895_v47, %v7570_v55  ;;  %v1820_v38 = vsel %vm1793_vm1, %v10896_v16, %v7569_v60 }
 0x1e6   : > { %v9190_v25 = vpack.c.bf16 %v1821_v32, %v1820_v38  ;;  %v10902_v32 = vmax.f32 %v8866_v15, 0.0  ;;  %v10903_v38 = vmax.f32 %v8890_v46, 0.0 }
 0x1e8   : > { %6363 = vmatprep.mubr.msk.bf16.mxu1 %vm8997_vm4, %v9190_v25 }
 0x1e9   : > { %6366 = vmatmul.mubr.msk.bf16.gmra.mrb[60].mxu1 %vm8997_vm4, %v9192_v24 }
 0x1ea   : > { %v7583_v57 = vpop.permute.xlu1 %7582 }
 0x1eb   : > { %v7585_v20 = vunpack.i.h.bf16 %v7583_v57  ;;  %v7584_v27 = vunpack.i.l.bf16 %v7583_v57 }
 0x1ed   : > { %v1803_v40 = vsel %vm1793_vm1, %v10897_v53, %v7585_v20  ;;  %v1802_v14 = vsel %vm1793_vm1, %v10898_v0, %v7584_v27  ;;  %v10904_v20 = vmax.f32 %v8884_v19, 0.0 }
 0x1ee   : > { %v9214_v3 = vpack.c.bf16 %v1803_v40, %v1802_v14 }
 0x1f2   : > { %v7578_v39 = vpop.permute.xlu0 %7577 }
 0x1f3   : > { %v7580_v5 = vunpack.i.h.bf16 %v7578_v39  ;;  %v7579_v62 = vunpack.i.l.bf16 %v7578_v39 }
 0x1f5   : > { %v1823_v34 = vsel %vm1793_vm1, %v10899_v11, %v7580_v5  ;;  %v1822_v55 = vsel %vm1793_vm1, %v10900_v21, %v7579_v62  ;;  %v7455_v62 = vpop.f32.mrb[44].mxu1 }
 0x1f6   : > { %v9212_v60 = vpack.c.bf16 %v1823_v34, %v1822_v55  ;;  %v1495_v29 = vpop.f32.mrb[45].mxu1  ;;  %v10905_v34 = vmax.f32 %v8906_v33, 0.0  ;;  %v10906_v55 = vmax.f32 %v8901_v45, 0.0 }
 0x1f7   : > { %v7456_v46 = vpop.f32.mrb[46].mxu1  ;;  %v10912_v29 = vmax.f32 %v8956_v1, 0.0 }
 0x1f8   : > { %6369 = vmatprep.mubr.msk.bf16.mxu1 %vm8997_vm4, %v9212_v60  ;;  %v1497_v15 = vpop.f32.mrb[47].mxu1 }
 0x1f9   : > { %6372 = vmatmul.mubr.msk.bf16.gmra.mrb[64].mxu1 %vm8997_vm4, %v9214_v3 }
 0x1fa   : > { %v7593_v36 = vpop.permute.xlu1 %7592 }
 0x1fb   : > { %v7595_v58 = vunpack.i.h.bf16 %v7593_v36  ;;  %v7594_v59 = vunpack.i.l.bf16 %v7593_v36 }
 0x1fd   : > { %v1805_v47 = vsel %vm1793_vm1, %v10901_v8, %v7595_v58  ;;  %v1804_v16 = vsel %vm1793_vm1, %v10902_v32, %v7594_v59  ;;  %v10907_v58 = vmax.f32 %v8924_v42, 0.0 }
 0x1fe   : > { %v9236_v5 = vpack.c.bf16 %v1805_v47, %v1804_v16 }
 0x202   : > { %v7588_v61 = vpop.permute.xlu0 %7587 }
 0x203   : > { %v7590_v56 = vunpack.i.h.bf16 %v7588_v61  ;;  %v7589_v44 = vunpack.i.l.bf16 %v7588_v61  ;;  %v10908_v61 = vmax.f32 %v8916_v49, 0.0 }
 0x205   : > { %v1825_v57 = vsel %vm1793_vm1, %v10903_v38, %v7590_v56  ;;  %v1824_v27 = vsel %vm1793_vm1, %v10904_v20, %v7589_v44  ;;  %v10909_v38 = vmax.f32 %v8946_v54, 0.0 }
 0x206   : > { %v9234_v39 = vpack.c.bf16 %v1825_v57, %v1824_v27  ;;  %v10910_v57 = vmax.f32 %v8941_v50, 0.0  ;;  %v10911_v27 = vmax.f32 %v8962_v4, 0.0 }
 0x208   : > { %6375 = vmatprep.mubr.msk.bf16.mxu1 %vm8997_vm4, %v9234_v39 }
 0x209   : > { %6378 = vmatmul.mubr.msk.bf16.gmra.mrb[68].mxu1 %vm8997_vm4, %v9236_v5 }
 0x20a   : > { %v7603_v53 = vpop.permute.xlu1 %7602 }
 0x20b   : > { %v7605_v19 = vunpack.i.h.bf16 %v7603_v53  ;;  %v7604_v40 = vunpack.i.l.bf16 %v7603_v53 }
 0x20d   : > { %v1807_v21 = vsel %vm1793_vm1, %v10905_v34, %v7605_v19  ;;  %v1806_v36 = vsel %vm1793_vm1, %v10906_v55, %v7604_v40 }
 0x20e   : > { %v6383_v8 = vpack.c.bf16 %v1807_v21, %v1806_v36 }
 0x212   : > { %v7598_v0 = vpop.permute.xlu0 %7597 }
 0x213   : > { %v7600_v14 = vunpack.i.h.bf16 %v7598_v0  ;;  %v7599_v11 = vunpack.i.l.bf16 %v7598_v0 }
 0x215   : > { %v1827_v59 = vsel %vm1793_vm1, %v10907_v58, %v7600_v14  ;;  %v1826_v56 = vsel %vm1793_vm1, %v10908_v61, %v7599_v11  ;;  %v10913_v14 = vmax.f32 %v8977_v30, 0.0  ;;  %v10914_v11 = vmax.f32 %v8973_v31, 0.0 }
 0x216   : > { %v6380_v44 = vpack.c.bf16 %v1827_v59, %v1826_v56 }
 0x218   : > { %6381 = vmatprep.mubr.msk.bf16.mxu1 %vm8997_vm4, %v6380_v44 }
 0x219   : > { %6384 = vmatmul.mubr.msk.bf16.gmra.mrb[72].mxu1 %vm8997_vm4, %v6383_v8 }
 0x21a   : > { %v7613_v33 = vpop.permute.xlu1 %7612 }
 0x21b   : > { %v7615_v45 = vunpack.i.h.bf16 %v7613_v33  ;;  %v7614_v47 = vunpack.i.l.bf16 %v7613_v33 }
 0x21d   : > { %v1809_v49 = vsel %vm1793_vm1, %v10909_v38, %v7615_v45  ;;  %v1808_v20 = vsel %vm1793_vm1, %v10910_v57, %v7614_v47  ;;  %v10916_v45 = vmax.f32 %v9058_v52, 0.0 }
 0x21e   : > { %v6389_v53 = vpack.c.bf16 %v1809_v49, %v1808_v20 }
 0x222   : > { %v7608_v32 = vpop.permute.xlu0 %7607 }
 0x223   : > { %v7610_v16 = vunpack.i.h.bf16 %v7608_v32  ;;  %v7609_v42 = vunpack.i.l.bf16 %v7608_v32 }
 0x225   : > { %v1829_v62 = vsel %vm1793_vm1, %v10911_v27, %v7610_v16  ;;  %v1828_v46 = vsel %vm1793_vm1, %v10912_v29, %v7609_v42  ;;  %v7939_v27 = vld [vmem:[%s10835_s5 + $0x48] sm:$0xff]  }
 0x226   : > { %v6386_v15 = vpack.c.bf16 %v1829_v62, %v1828_v46 }
 0x228   : > { %6387 = vmatprep.mubr.msk.bf16.mxu1 %vm8997_vm4, %v6386_v15 }
 0x229   : > { %6390 = vmatmul.mubr.msk.bf16.gmra.mrb[76].mxu1 %vm8997_vm4, %v6389_v53 }
 0x22c   : > { %v7623_v54 = vpop.permute.xlu1 %7622 }
 0x22d   : > { %v7625_v50 = vunpack.i.h.bf16 %v7623_v54  ;;  %v7624_v19 = vunpack.i.l.bf16 %v7623_v54 }
 0x22f   : > { %v1811_v1 = vsel %vm1793_vm1, %v10913_v14, %v7625_v50  ;;  %v1810_v34 = vsel %vm1793_vm1, %v10914_v11, %v7624_v19  ;;  %v7941_v14 = vld [vmem:[%s10835_s5 + $0x50] sm:$0xff]   ;;  %v7943_v11 = vld [vmem:[%s10835_s5 + $0x100] sm:$0xff]  }
 0x230   : > { %v6395_v58 = vpack.c.bf16 %v1811_v1, %v1810_v34  ;;  %v7942_v1 = vld [vmem:[%s10835_s5 + $0x10] sm:$0xff]   ;;  %7457 = vmatprep.subr.bf16.mxu1 %v7943_v11 }
 0x232   : > { %v7618_v40 = vpop.permute.xlu0 %7617 }
 0x233   : > { %v7620_v0 = vunpack.i.h.bf16 %v7618_v40  ;;  %v7619_v4 = vunpack.i.l.bf16 %v7618_v40 }
 0x235   : > { %v1831_v21 = vsel %vm1793_vm1, %v1541_v10, %v7620_v0  ;;  %v1830_v55 = vsel %vm1793_vm1, %v1540_v18, %v7619_v4  ;;  %v10915_v10 = vmax.f32 %v9078_v9, 0.0 }
 0x236   : > { %v6392_v36 = vpack.c.bf16 %v1831_v21, %v1830_v55 }
 0x238   : > { %6393 = vmatprep.mubr.msk.bf16.mxu1 %vm8997_vm4, %v6392_v36 }
 0x239   : > { %6396 = vmatmul.mubr.msk.bf16.gmra.mrb[80].mxu1 %vm8997_vm4, %v6395_v58 }
 0x23c   : > { %v7633_v30 = vpop.permute.xlu1 %7632 }
 0x23d   : > { %v7635_v31 = vunpack.i.h.bf16 %v7633_v30  ;;  %v7634_v59 = vunpack.i.l.bf16 %v7633_v30  ;;  %v7944_v30 = vld [vmem:[%s10835_s5 + $0x108] sm:$0xff]  }
 0x23f   : > { %v1813_v48 = vsel %vm1793_vm1, %v1543_v35, %v7635_v31  ;;  %v1812_v18 = vsel %vm1793_vm1, %v1542_v12, %v7634_v59  ;;  %v7945_v59 = vld [vmem:[%s10835_s5 + $0x110] sm:$0xff]  }
 0x240   : > { %v6401_v16 = vpack.c.bf16 %v1813_v48, %v1812_v18 }
 0x242   : > { %v7628_v61 = vpop.permute.xlu0 %7627 }
 0x243   : > { %v7630_v56 = vunpack.i.h.bf16 %v7628_v61  ;;  %v7629_v22 = vunpack.i.l.bf16 %v7628_v61  ;;  %v7948_v61 = vld [vmem:[%s10835_s5 + $0x118] sm:$0xff]  }
 0x245   : > { %v1833_v33 = vsel %vm1793_vm1, %v10915_v10, %v7630_v56  ;;  %v1832_v47 = vsel %vm1793_vm1, %v10916_v45, %v7629_v22  ;;  %v7946_v22 = vld [vmem:[%s10835_s5 + $0x58] sm:$0xff]  }
 0x246   : > { %v6398_v32 = vpack.c.bf16 %v1833_v33, %v1832_v47  ;;  %v7947_v47 = vld [vmem:[%s10835_s5 + $0x18] sm:$0xff]  }
 0x248   : > { %6399 = vmatprep.mubr.msk.bf16.mxu1 %vm8997_vm4, %v6398_v32 }
 0x249   : > { %6402 = vmatmul.mubr.msk.bf16.gmra.mrb[84].mxu1 %vm8997_vm4, %v6401_v16 }
 0x24a   : > { %6405 = vmatprep.mubr.msk.bf16.mxu1 %vm8997_vm4, %v9070_v26  ;;  %v7643_v26 = vpop.permute.xlu1 %7642 }
 0x251   : > { %6408 = vmatmul.mubr.msk.bf16.vlgmr.msra.gmra.mrb[88].mxu1 %vm8997_vm4, %v9093_v51  ;;  %v7645_v51 = vunpack.i.h.bf16 %v7643_v26 }
 0x252   : > { %6411 = vmatprep.mubr.msk.bf16.mxu1 %vm8997_vm4, %v9152_v6  ;;  %v7638_v41 = vpop.permute.xlu0 %7637  ;;  %v7644_v6 = vunpack.i.l.bf16 %v7643_v26  ;;  %7458 = vmatpush3.bf16.msra.mxu1 %v7943_v11  ;;  %v7950_v26 = vld [vmem:[%s10835_s5 + $0x20] sm:$0xff]  }
 0x253   : > { %v7640_v17 = vunpack.i.h.bf16 %v7638_v41  ;;  %v7639_v12 = vunpack.i.l.bf16 %v7638_v41  ;;  %7459 = vmatprep.subr.bf16.mxu1 %v7944_v30 }
 0x255   : > { %v1837_v35 = vsel %vm1793_vm1, %v1549_v13, %v7640_v17  ;;  %v1836_v52 = vsel %vm1793_vm1, %v1548_v2, %v7639_v12  ;;  %v1835_v2 = vsel %vm1793_vm1, %v10917_v28, %v7645_v51  ;;  %v10918_v13 = vmax.f32 %v9113_v37, 0.0  ;;  %v7952_v51 = vld [vmem:[%s10835_s5 + $0x28] sm:$0xff]  }
 0x256   : > { %v6458_v9 = vpack.c.bf16 %v1837_v35, %v1836_v52  ;;  %7460 = vmatpush3.bf16.msra.mxu1 %v7944_v30  ;;  %v7949_v52 = vld [vmem:[%s10835_s5 + $0x60] sm:$0xff]  }
 0x257   : > { %7461 = vmatprep.subr.bf16.mxu1 %v7945_v59 }
 0x259   : > { %6414 = vmatmul.mubr.msk.bf16.gmra.mrb[92].mxu1 %vm8997_vm4, %v9158_v43 }
 0x25a   : > { %6417 = vmatprep.mubr.msk.bf16.mxu1 %vm8997_vm4, %v9190_v25  ;;  %7462 = vmatpush3.bf16.msra.mxu1 %v7945_v59 }
 0x25b   : > { %7463 = vmatprep.subr.bf16.mxu1 %v7948_v61 }
 0x25e   : > { %7464 = vmatpush3.bf16.msra.mxu1 %v7948_v61 }
 0x261   : > { %6420 = vmatmul.mubr.msk.bf16.gmra.mrb[96].mxu1 %vm8997_vm4, %v9192_v24  ;;  %v7937_v24 = vld [vmem:[%s10835_s5 + $0x40] sm:$0xff]  }
 0x262   : > { %6423 = vmatprep.mubr.msk.bf16.mxu1 %vm8997_vm4, %v9212_v60  ;;  %6948 = vmatprep.subr.bf16.mxu0 %v7937_v24  ;;  %v7957_v24 = vld [vmem:[%s8462_s26 + $0x210] ss:$12 sps:$4 sm:$0xff]  }
 0x269   : > { %6426 = vmatmul.mubr.msk.bf16.gmra.mrb[100].mxu1 %vm8997_vm4, %v9214_v3 }
 0x26a   : > { %6429 = vmatprep.mubr.msk.bf16.mxu1 %vm8997_vm4, %v9234_v39  ;;  %v1834_v39 = vsel %vm1793_vm1, %v10918_v13, %v7644_v6  ;;  %v7953_v6 = vld [vmem:[%s10835_s5 + $0x70] sm:$0xff]  }
 0x271   : > { %6432 = vmatmul.mubr.msk.bf16.gmra.mrb[104].mxu1 %vm8997_vm4, %v9236_v5  ;;  %v7938_v5 = vld [vmem:[%s10835_s5] sm:$0xff]  }
 0x272   : > { %6435 = vmatprep.mubr.msk.bf16.mxu1 %vm8997_vm4, %v6380_v44  ;;  %6949 = vmatpush3.bf16.msra.mxu0 %v7938_v5 }
 0x273   : > { %6950 = vmatprep.subr.bf16.mxu0 %v7939_v27 }
 0x276   : > { %6951 = vmatpush3.bf16.msra.mxu0 %v7940_v23  ;;  %v9465_v23 = vld [vmem:[%s10834_s4] ss:$0 sm:$0xff] }
 0x277   : > { %6952 = vmatprep.subr.bf16.mxu0 %v7941_v14 }
 0x279   : > { %6438 = vmatmul.mubr.msk.bf16.gmra.mrb[108].mxu1 %vm8997_vm4, %v6383_v8  ;;  %v6461_v8 = vpack.c.bf16 %v1835_v2, %v1834_v39  ;;  %v7954_v2 = vld [vmem:[%s10835_s5 + $0x30] sm:$0xff]  }
 0x27a   : > { %6441 = vmatprep.mubr.msk.bf16.mxu1 %vm8997_vm4, %v6386_v15  ;;  %6953 = vmatpush3.bf16.msra.mxu0 %v7942_v1 }
 0x27b   : > { %6954 = vmatprep.subr.bf16.mxu0 %v7946_v22 }
 0x27e   : > { %6955 = vmatpush3.bf16.msra.mxu0 %v7947_v47 }
 0x27f   : > { %6956 = vmatprep.subr.bf16.mxu0 %v7949_v52 }
 0x281   : > { %6444 = vmatmul.mubr.msk.bf16.gmra.mrb[112].mxu1 %vm8997_vm4, %v6389_v53 }
 0x282   : > { %6447 = vmatprep.mubr.msk.bf16.mxu1 %vm8997_vm4, %v6392_v36  ;;  %6957 = vmatpush3.bf16.msra.mxu0 %v7950_v26 }
 0x289   : > { %6450 = vmatmul.mubr.msk.bf16.gmra.mrb[116].mxu1 %vm8997_vm4, %v6395_v58 }
 0x28a   : > { %6453 = vmatprep.mubr.msk.bf16.mxu1 %vm8997_vm4, %v6398_v32 }
 0x28f   : > { %v6812_v43 = vpop.f32.mrb[48].mxu1 }
 0x290   : > { %v6813_v25 = vpop.f32.mrb[49].mxu1 }
 0x291   : > { %v9361_v60 = vadd.f32 %v6813_v25, %v6812_v43  ;;  %v6815_v3 = vpop.f32.mrb[50].mxu1  ;;  %6456 = vmatmul.mubr.msk.bf16.gmra.mrb[120].mxu1 %vm8997_vm4, %v6401_v16  ;;  %v7955_v25 = vld [vmem:[%s8462_s26 + $0x214] ss:$12 sps:$4 sm:$0xff]  }
 0x292   : > { %v6816_v7 = vpop.f32.mrb[51].mxu1  ;;  %6459 = vmatprep.mubr.msk.bf16.mxu1 %vm8997_vm4, %v6458_v9  ;;  %v7951_v9 = vld [vmem:[%s10835_s5 + $0x68] sm:$0xff]   ;;  %1272 = vmatprep.mubr.bf16.mxu0 %v7955_v25 }
 0x293   : > { %v9376_v44 = vadd.f32 %v6816_v7, %v6815_v3  ;;  %6958 = vmatprep.subr.bf16.mxu0 %v7951_v9  ;;  %1273 = vmatmul.mubr.bf16.gmra.mrb[88].mxu0 %v7957_v24  ;;  %v2181_v1 = vadd.f32 %v9361_v60, %v9465_v23  ;;  %v7960_v60 = vld [vmem:[%s8462_s26 + $0x228] ss:$12 sps:$4 sm:$0xff]  }
 0x294   : > { %6959 = vmatpush3.bf16.msra.mxu0 %v7952_v51 }
 0x295   : > { %6960 = vmatprep.subr.bf16.mxu0 %v7953_v6 }
 0x298   : > { %6961 = vmatpush3.bf16.msra.mxu0 %v7954_v2 }
 0x299   : > { %6462 = vmatmul.mubr.msk.bf16.gmra.mrb[124].mxu1 %vm8997_vm4, %v6461_v8 }
 0x29f   : > { %v6818_v63 = vpop.f32.mrb[52].mxu1 }
 0x2a0   : > { %v6819_v42 = vpop.f32.mrb[53].mxu1 }
 0x2a1   : > { %v9380_v37 = vadd.f32 %v6819_v42, %v6818_v63  ;;  %v6821_v38 = vpop.f32.mrb[54].mxu1 }
 0x2a2   : > { %v6822_v49 = vpop.f32.mrb[55].mxu1 }
 0x2a3   : > { %v9382_v57 = vadd.f32 %v6822_v49, %v6821_v38  ;;  %v2189_v22 = vadd.f32 %v9380_v37, %v9465_v23  ;;  %v7962_v37 = vld [vmem:[%s10835_s5 + $0x38] sm:$0xff]  }
 0x2ad   : > { %v6824_v20 = vpop.f32.mrb[56].mxu1 }
 0x2ae   : > { %v6825_v62 = vpop.f32.mrb[57].mxu1 }
 0x2af   : > { %v9387_v29 = vadd.f32 %v6825_v62, %v6824_v20  ;;  %v6827_v46 = vpop.f32.mrb[58].mxu1 }
 0x2b0   : > { %v6828_v15 = vpop.f32.mrb[59].mxu1 }
 0x2b1   : > { %v9392_v53 = vadd.f32 %v6828_v15, %v6827_v46 }
 0x2bc   : > { %v6830_v54 = vpop.f32.mrb[60].mxu1 }
 0x2bd   : > { %v6831_v50 = vpop.f32.mrb[61].mxu1 }
 0x2be   : > { %v9394_v19 = vadd.f32 %v6831_v50, %v6830_v54  ;;  %v6833_v40 = vpop.f32.mrb[62].mxu1 }
 0x2bf   : > { %v6834_v0 = vpop.f32.mrb[63].mxu1 }
 0x2c0   : > { %v9396_v4 = vadd.f32 %v6834_v0, %v6833_v40 }
 0x2cc   : > { %v6836_v34 = vpop.f32.mrb[64].mxu1 }
 0x2cd   : > { %v6837_v21 = vpop.f32.mrb[65].mxu1 }
 0x2ce   : > { %v9407_v55 = vadd.f32 %v6837_v21, %v6836_v34  ;;  %v6839_v36 = vpop.f32.mrb[66].mxu1 }
 0x2cf   : > { %v6840_v58 = vpop.f32.mrb[67].mxu1 }
 0x2d0   : > { %v9412_v31 = vadd.f32 %v6840_v58, %v6839_v36  ;;  %v2184_v36 = vadd.f32 %v9376_v44, %v9465_v23 }
 0x2dc   : > { %v6842_v56 = vpop.f32.mrb[68].mxu1 }
 0x2dd   : > { %v6843_v48 = vpop.f32.mrb[69].mxu1 }
 0x2de   : > { %v9423_v18 = vadd.f32 %v6843_v48, %v6842_v56  ;;  %v6845_v10 = vpop.f32.mrb[70].mxu1 }
 0x2df   : > { %v6846_v33 = vpop.f32.mrb[71].mxu1 }
 0x2e0   : > { %v9425_v45 = vadd.f32 %v6846_v33, %v6845_v10  ;;  %v7958_v33 = vld [vmem:[%s8462_s26 + $0x22c] ss:$12 sps:$4 sm:$0xff]   ;;  %s10919_s26 = smov 64  }
 0x2e1   : > { %1278 = vmatprep.mubr.bf16.mxu0 %v7958_v33 }
 0x2e2   : > { %1279 = vmatmul.mubr.bf16.gmra.mrb[92].mxu0 %v7960_v60 }
 0x2ec   : > { %v6848_v32 = vpop.f32.mrb[72].mxu1 }
 0x2ed   : > { %v6849_v16 = vpop.f32.mrb[73].mxu1 }
 0x2ee   : > { %v9430_v41 = vadd.f32 %v6849_v16, %v6848_v32  ;;  %v6851_v17 = vpop.f32.mrb[74].mxu1  ;;  %v2192_v32 = vadd.f32 %v9382_v57, %v9465_v23 }
 0x2ef   : > { %v6852_v12 = vpop.f32.mrb[75].mxu1 }
 0x2f0   : > { %v9432_v35 = vadd.f32 %v6852_v12, %v6851_v17  ;;  %v7961_v12 = vld [vmem:[%s10835_s5 + $0x78] sm:$0xff]  }
 0x2f1   : > { %6962 = vmatprep.subr.bf16.mxu0 %v7961_v12 }
 0x2f2   : > { %6963 = vmatpush3.bf16.msra.mxu0 %v7962_v37 }
 0x2fc   : > { %v6854_v43 = vpop.f32.mrb[76].mxu1 }
 0x2fd   : > { %v6855_v3 = vpop.f32.mrb[77].mxu1 }
 0x2fe   : > { %v9451_v7 = vadd.f32 %v6855_v3, %v6854_v43  ;;  %v6857_v28 = vpop.f32.mrb[78].mxu1  ;;  %v2197_v43 = vadd.f32 %v9387_v29, %v9465_v23 }
 0x2ff   : > { %v6858_v13 = vpop.f32.mrb[79].mxu1 }
 0x300   : > { %v9456_v39 = vadd.f32 %v6858_v13, %v6857_v28 }
 0x30c   : > { %v6860_v5 = vpop.f32.mrb[80].mxu1 }
 0x30d   : > { %v6861_v8 = vpop.f32.mrb[81].mxu1 }
 0x30e   : > { %v9458_v63 = vadd.f32 %v6861_v8, %v6860_v5  ;;  %v6863_v42 = vpop.f32.mrb[82].mxu1  ;;  %v2200_v5 = vadd.f32 %v9392_v53, %v9465_v23 }
 0x30f   : > { %v6864_v38 = vpop.f32.mrb[83].mxu1 }
 0x310   : > { %v9460_v49 = vadd.f32 %v6864_v38, %v6863_v42 }
 0x31c   : > { %v6866_v20 = vpop.f32.mrb[84].mxu1 }
 0x31d   : > { %v6867_v27 = vpop.f32.mrb[85].mxu1 }
 0x31e   : > { %v6868_v62 = vadd.f32 %v6867_v27, %v6866_v20  ;;  %v6869_v46 = vpop.f32.mrb[86].mxu1 }
 0x31f   : > { %v6870_v15 = vpop.f32.mrb[87].mxu1 }
 0x320   : > { %v9468_v54 = vadd.f32 %v6868_v62, %v9465_v23  ;;  %v6871_v50 = vadd.f32 %v6870_v15, %v6869_v46 }
 0x322   : > { %v9471_v40 = vadd.f32 %v6871_v50, %v9465_v23 }
 0x324   : > { %v6888_v0 = vpop.f32.mrb[88].mxu1 }
 0x325   : > { %v6889_v14 = vpop.f32.mrb[89].mxu1 }
 0x326   : > { %v6890_v11 = vadd.f32 %v6889_v14, %v6888_v0  ;;  %v6891_v34 = vpop.f32.mrb[90].mxu1  ;;  %v2205_v0 = vadd.f32 %v9394_v19, %v9465_v23  ;;  %v2213_v19 = vadd.f32 %v9407_v55, %v9465_v23 }
 0x327   : > { %v6892_v21 = vpop.f32.mrb[91].mxu1 }
 0x328   : > { %v2294_v58 = vadd.f32 %v6890_v11, %v2181_v1  ;;  %v6893_v30 = vadd.f32 %v6892_v21, %v6891_v34  ;;  %v2208_v21 = vadd.f32 %v9396_v4, %v9465_v23 }
 0x32a   : > { %v9477_v59 = vadd.f32 %v6893_v30, %v2184_v36  ;;  %v9492_v52 = vmax.f32 %v2294_v58, 0.0 }
 0x32c   : > { %v6894_v61 = vpop.f32.mrb[92].mxu1  ;;  %v2373_v16 = vmax.f32 %v9477_v59, 0.0  ;;  %v2408_v24 = vrot.slane %v9492_v52, 1 }
 0x32d   : > { %v6895_v56 = vpop.f32.mrb[93].mxu1 }
 0x32e   : > { %v6896_v48 = vadd.f32 %v6895_v56, %v6894_v61  ;;  %v6897_v10 = vpop.f32.mrb[94].mxu1  ;;  %v2409_v57 = vrot.slane %v2373_v16, 1 }
 0x32f   : > { %v6898_v47 = vpop.f32.mrb[95].mxu1 }
 0x330   : > { %v2302_v44 = vadd.f32 %v6896_v48, %v2189_v22  ;;  %v6899_v17 = vadd.f32 %v6898_v47, %v6897_v10  ;;  %v2410_v20 = vsel %vm1570_vm0, %v2408_v24, %v2409_v57  ;;  %v2216_v57 = vadd.f32 %v9412_v31, %v9465_v23 }
 0x332   : > { %v9494_v26 = vmax.f32 %v2302_v44, 0.0  ;;  %v9496_v9 = vadd.f32 %v6899_v17, %v2192_v32 }
 0x334   : > { %v2375_v51 = vmax.f32 %v9496_v9, 0.0  ;;  %v6900_v6 = vpop.f32.mrb[96].mxu1  ;;  %v2411_v13 = vrot.slane %v9494_v26, 1 }
 0x335   : > { %v6901_v25 = vpop.f32.mrb[97].mxu1 }
 0x336   : > { %v2412_v3 = vrot.slane %v2375_v51, 1  ;;  %v6902_v28 = vadd.f32 %v6901_v25, %v6900_v6  ;;  %v6903_v2 = vpop.f32.mrb[98].mxu1 }
 0x337   : > { %v6904_v8 = vpop.f32.mrb[99].mxu1 }
 0x338   : > { %v2310_v42 = vadd.f32 %v6902_v28, %v2197_v43  ;;  %v6905_v38 = vadd.f32 %v6904_v8, %v6903_v2  ;;  %v9511_v29 = vsel %vm1570_vm0, %v2411_v13, %v2412_v3 }
 0x339   : > { %v7651_v27 = vpack.i.bf16 %v9511_v29, %v2410_v20  ;;  %v2221_v20 = vadd.f32 %v9423_v18, %v9465_v23 }
 0x33a   : > { %v9514_v62 = vmax.f32 %v2310_v42, 0.0  ;;  %v2313_v46 = vadd.f32 %v6905_v38, %v2200_v5 }
 0x33b   : > { %7652 = vrot.lane.b32.xlu1 %v7651_v27, %s10919_s26 }
 0x33c   : > { %v6906_v15 = vpop.f32.mrb[100].mxu1  ;;  %v7646_v50 = vpack.i.bf16 %v9514_v62, %v9494_v26  ;;  %v2377_v11 = vmax.f32 %v2313_v46, 0.0  ;;  %v2463_v33 = vrot.slane %v9514_v62, 2  ;;  %v2414_v4 = vrot.slane %v9514_v62, 1 }
 0x33d   : > { %v6907_v53 = vpop.f32.mrb[101].mxu1 }
 0x33e   : > { %v6908_v14 = vadd.f32 %v6907_v53, %v6906_v15  ;;  %v6909_v1 = vpop.f32.mrb[102].mxu1  ;;  %7647 = vrot.lane.b32.xlu0 %v7646_v50, %s10919_s26  ;;  %v2415_v56 = vrot.slane %v2377_v11, 1  ;;  %v2464_v22 = vrot.slane %v2377_v11, 2  ;;  %v7963_v15 = vld [vmem:[%s10835_s5 + $0xc0] sm:$0xff]  }
 0x33f   : > { %v6910_v34 = vpop.f32.mrb[103].mxu1  ;;  %6988 = vmatprep.subr.bf16.mxu0 %v7963_v15 }
 0x340   : > { %v2318_v36 = vadd.f32 %v6908_v14, %v2205_v0  ;;  %v6911_v58 = vadd.f32 %v6910_v34, %v6909_v1  ;;  %v9535_v6 = vsel %vm2456_vm5, %v2463_v33, %v2464_v22  ;;  %v9538_v43 = vsel %vm1570_vm0, %v2414_v4, %v2415_v56 }
 0x341   : > { %v2224_v0 = vadd.f32 %v9425_v45, %v9465_v23  ;;  %v2232_v4 = vadd.f32 %v9432_v35, %v9465_v23 }
 0x342   : > { %v9524_v30 = vmax.f32 %v2318_v36, 0.0  ;;  %v2321_v61 = vadd.f32 %v6911_v58, %v2208_v21 }
 0x344   : > { %v2379_v48 = vmax.f32 %v2321_v61, 0.0  ;;  %v6912_v10 = vpop.f32.mrb[104].mxu1  ;;  %v2466_v47 = vrot.slane %v9524_v30, 2  ;;  %v2417_v37 = vrot.slane %v9524_v30, 1  ;;  %v2229_v61 = vadd.f32 %v9430_v41, %v9465_v23 }
 0x345   : > { %v6913_v60 = vpop.f32.mrb[105].mxu1 }
 0x346   : > { %v2418_v32 = vrot.slane %v2379_v48, 1  ;;  %v2467_v44 = vrot.slane %v2379_v48, 2  ;;  %v6914_v17 = vadd.f32 %v6913_v60, %v6912_v10  ;;  %v6915_v12 = vpop.f32.mrb[106].mxu1 }
 0x347   : > { %v6916_v55 = vpop.f32.mrb[107].mxu1 }
 0x348   : > { %v9541_v25 = vsel %vm2456_vm5, %v2466_v47, %v2467_v44  ;;  %v2326_v24 = vadd.f32 %v6914_v17, %v2213_v19  ;;  %v6917_v3 = vadd.f32 %v6916_v55, %v6915_v12  ;;  %v9544_v28 = vsel %vm1570_vm0, %v2417_v37, %v2418_v32 }
 0x349   : > { %v2599_v2 = vpack.c.bf16 %v9541_v25, %v9535_v6  ;;  %v7661_v31 = vpack.i.bf16 %v9544_v28, %v9538_v43 }
 0x34a   : > { %v9550_v13 = vmax.f32 %v2326_v24, 0.0  ;;  %v2329_v5 = vadd.f32 %v6917_v3, %v2216_v57 }
 0x34b   : > { %7465 = vmatprep.mubr.msk.bf16.mxu1 %vm1793_vm1, %v2599_v2  ;;  %7662 = vrot.lane.b32.xlu1 %v7661_v31, %s10919_s26 }
 0x34c   : > { %v6918_v8 = vpop.f32.mrb[108].mxu1  ;;  %v7656_v42 = vpack.i.bf16 %v9550_v13, %v9524_v30  ;;  %v2381_v50 = vmax.f32 %v2329_v5, 0.0  ;;  %v2469_v56 = vrot.slane %v9550_v13, 2  ;;  %v2420_v45 = vrot.slane %v9550_v13, 1 }
 0x34d   : > { %v6919_v38 = vpop.f32.mrb[109].mxu1 }
 0x34e   : > { %v6920_v27 = vadd.f32 %v6919_v38, %v6918_v8  ;;  %v6921_v46 = vpop.f32.mrb[110].mxu1  ;;  %7657 = vrot.lane.b32.xlu0 %v7656_v42, %s10919_s26  ;;  %v2421_v18 = vrot.slane %v2381_v50, 1  ;;  %v2470_v21 = vrot.slane %v2381_v50, 2  ;;  %v2237_v8 = vadd.f32 %v9451_v7, %v9465_v23 }
 0x34f   : > { %v6922_v53 = vpop.f32.mrb[111].mxu1  ;;  %v2245_v7 = vadd.f32 %v9458_v63, %v9465_v23 }
 0x350   : > { %v2334_v14 = vadd.f32 %v6920_v27, %v2221_v20  ;;  %v6923_v1 = vadd.f32 %v6922_v53, %v6921_v46  ;;  %v9575_v32 = vsel %vm2456_vm5, %v2469_v56, %v2470_v21  ;;  %v9578_v44 = vsel %vm1570_vm0, %v2420_v45, %v2421_v18 }
 0x351   : > { %v2240_v46 = vadd.f32 %v9456_v39, %v9465_v23 }
 0x352   : > { %v9564_v11 = vmax.f32 %v2334_v14, 0.0  ;;  %v2337_v34 = vadd.f32 %v6923_v1, %v2224_v0 }
 0x354   : > { %v2383_v36 = vmax.f32 %v2337_v34, 0.0  ;;  %v6924_v58 = vpop.f32.mrb[112].mxu1  ;;  %v2472_v22 = vrot.slane %v9564_v11, 2  ;;  %v2423_v60 = vrot.slane %v9564_v11, 1 }
 0x355   : > { %v6925_v48 = vpop.f32.mrb[113].mxu1 }
 0x356   : > { %v2424_v10 = vrot.slane %v2383_v36, 1  ;;  %v2473_v19 = vrot.slane %v2383_v36, 2  ;;  %v6926_v33 = vadd.f32 %v6925_v48, %v6924_v58  ;;  %v6927_v47 = vpop.f32.mrb[114].mxu1 }
 0x357   : > { %v6928_v41 = vpop.f32.mrb[115].mxu1 }
 0x358   : > { %v9581_v17 = vsel %vm2456_vm5, %v2472_v22, %v2473_v19  ;;  %v2342_v12 = vadd.f32 %v6926_v33, %v2229_v61  ;;  %v6929_v37 = vadd.f32 %v6928_v41, %v6927_v47  ;;  %v9584_v57 = vsel %vm1570_vm0, %v2423_v60, %v2424_v10 }
 0x359   : > { %v2603_v55 = vpack.c.bf16 %v9581_v17, %v9575_v32  ;;  %v7671_v35 = vpack.i.bf16 %v9584_v57, %v9578_v44  ;;  %v2248_v10 = vadd.f32 %v9460_v49, %v9465_v23 }
 0x35a   : > { %v9590_v24 = vmax.f32 %v2342_v12, 0.0  ;;  %v2345_v3 = vadd.f32 %v6929_v37, %v2232_v4 }
 0x35b   : > { %7466 = vmatmul.mubr.msk.bf16.vlgmr.msra.gmra.mrb[128].mxu1 %vm1793_vm1, %v2603_v55  ;;  %7672 = vrot.lane.b32.xlu1 %v7671_v35, %s10919_s26  ;;  %v2461_v55 = vrot.slane %v2375_v51, 2 }
 0x35c   : > { %v6930_v2 = vpop.f32.mrb[116].mxu1  ;;  %v7666_v31 = vpack.i.bf16 %v9590_v24, %v9564_v11  ;;  %v2385_v20 = vmax.f32 %v2345_v3, 0.0  ;;  %v2475_v21 = vrot.slane %v9590_v24, 2  ;;  %v2426_v61 = vrot.slane %v9590_v24, 1 }
 0x35d   : > { %v6931_v5 = vpop.f32.mrb[117].mxu1 }
 0x35e   : > { %v6932_v42 = vadd.f32 %v6931_v5, %v6930_v2  ;;  %v6933_v38 = vpop.f32.mrb[118].mxu1  ;;  %7667 = vrot.lane.b32.xlu0 %v7666_v31, %s10919_s26  ;;  %v2427_v14 = vrot.slane %v2385_v20, 1  ;;  %v2476_v1 = vrot.slane %v2385_v20, 2  ;;  %v7691_v5 = vpack.i.bf16 %v9575_v32, %v9541_v25 }
 0x35f   : > { %v6934_v27 = vpop.f32.mrb[119].mxu1 }
 0x360   : > { %v2350_v15 = vadd.f32 %v6932_v42, %v2237_v8  ;;  %v6935_v50 = vadd.f32 %v6934_v27, %v6933_v38  ;;  %v9612_v19 = vsel %vm2456_vm5, %v2475_v21, %v2476_v1  ;;  %v9615_v33 = vsel %vm1570_vm0, %v2426_v61, %v2427_v14 }
 0x361   : > { %v2460_v8 = vrot.slane %v9494_v26, 2 }
 0x362   : > { %v9601_v53 = vmax.f32 %v2350_v15, 0.0  ;;  %v2353_v0 = vadd.f32 %v6935_v50, %v2240_v46 }
 0x363   : > { %v2462_v51 = vsel %vm2456_vm5, %v2460_v8, %v2461_v55 }
 0x364   : > { %v2387_v34 = vmax.f32 %v2353_v0, 0.0  ;;  %v6936_v18 = vpop.f32.mrb[120].mxu1  ;;  %v2478_v36 = vrot.slane %v9601_v53, 2  ;;  %v2429_v45 = vrot.slane %v9601_v53, 1  ;;  %v7686_v46 = vpack.i.bf16 %v9535_v6, %v2462_v51 }
 0x365   : > { %v6937_v58 = vpop.f32.mrb[121].mxu1 }
 0x366   : > { %v2430_v39 = vrot.slane %v2387_v34, 1  ;;  %v2479_v56 = vrot.slane %v2387_v34, 2  ;;  %v6938_v22 = vadd.f32 %v6937_v58, %v6936_v18  ;;  %v6939_v48 = vpop.f32.mrb[122].mxu1  ;;  %v7696_v18 = vpack.i.bf16 %v9612_v19, %v9581_v17 }
 0x367   : > { %v6940_v63 = vpop.f32.mrb[123].mxu1 }
 0x368   : > { %v9618_v47 = vsel %vm2456_vm5, %v2478_v36, %v2479_v56  ;;  %v2358_v60 = vadd.f32 %v6938_v22, %v2245_v7  ;;  %v6941_v4 = vadd.f32 %v6940_v63, %v6939_v48  ;;  %v9621_v41 = vsel %vm1570_vm0, %v2429_v45, %v2430_v39 }
 0x369   : > { %v2607_v12 = vpack.c.bf16 %v9618_v47, %v9612_v19  ;;  %v7681_v49 = vpack.i.bf16 %v9621_v41, %v9615_v33  ;;  %v2458_v63 = vrot.slane %v2373_v16, 2 }
 0x36a   : > { %v9627_v23 = vmax.f32 %v2358_v60, 0.0  ;;  %v2361_v37 = vadd.f32 %v6941_v4, %v2248_v10 }
 0x36b   : > { %7469 = vmatprep.mubr.msk.bf16.mxu1 %vm1793_vm1, %v2607_v12  ;;  %7682 = vrot.lane.b32.xlu1 %v7681_v49, %s10919_s26  ;;  %v2457_v12 = vrot.slane %v9492_v52, 2 }
 0x36c   : > { %v6942_v35 = vpop.f32.mrb[124].mxu1  ;;  %v7676_v3 = vpack.i.bf16 %v9627_v23, %v9601_v53  ;;  %v2389_v2 = vmax.f32 %v2361_v37, 0.0  ;;  %v2526_v14 = vrot.slane %v9627_v23, 2 }
 0x36d   : > { %v6943_v31 = vpop.f32.mrb[125].mxu1 }
 0x36e   : > { %v6944_v42 = vadd.f32 %v6943_v31, %v6942_v35  ;;  %v6945_v38 = vpop.f32.mrb[126].mxu1  ;;  %7677 = vrot.lane.b32.xlu0 %v7676_v3, %s10919_s26  ;;  %v2527_v15 = vrot.slane %v2389_v2, 2  ;;  %v2516_v1 = vrot.slane %v2389_v2, 1  ;;  %v2459_v2 = vsel %vm2456_vm5, %v2457_v12, %v2458_v63  ;;  %v1274_v12 = vpop.f32.mrb[88].mxu0 }
 0x36f   : > { %v6946_v9 = vpop.f32.mrb[127].mxu1  ;;  %7692 = vrot.lane.b32.xlu1 %v7691_v5, %s10919_s26  ;;  %v7964_v5 = vld [vmem:[%s10835_s5 + $0x80] sm:$0xff]  }
 0x370   : > { %v2366_v20 = vadd.f32 %v6944_v42, %v9468_v54  ;;  %v6947_v27 = vadd.f32 %v6946_v9, %v6945_v38  ;;  %v2528_v7 = vsel %vm2456_vm5, %v2526_v14, %v2527_v15  ;;  %v2515_v54 = vrot.slane %v9627_v23, 1  ;;  %v7965_v42 = vld [vmem:[%s10835_s5 + $0xc8] sm:$0xff]   ;;  %v7968_v38 = vld [vmem:[%s10835_s5 + $0x90] sm:$0xff]   ;;  %v7970_v15 = vld [vmem:[%s10835_s5 + $0x98] sm:$0xff]  }
 0x371   : > { %v7706_v39 = vpack.i.bf16 %v2528_v7, %v9618_v47  ;;  %v7981_v12 = vld [vmem:[%s10837_s7] sm:$0xff]  }
 0x372   : > { %v9643_v50 = vmax.f32 %v2366_v20, 0.0  ;;  %v2369_v0 = vadd.f32 %v6947_v27, %v9471_v40  ;;  %7687 = vrot.lane.b32.xlu0 %v7686_v46, %s10919_s26  ;;  %v9658_v56 = vsel %vm1570_vm0, %v2515_v54, %v2516_v1  ;;  %v7971_v1 = vld [vmem:[%s10835_s5 + $0xe0] sm:$0xff]  }
 0x374   : > { %v2391_v34 = vmax.f32 %v2369_v0, 0.0  ;;  %v2555_v21 = vrot.slane %v9643_v50, 1  ;;  %v2564_v36 = vrot.slane %v9643_v50, 2 }
 0x376   : > { %v2556_v58 = vrot.slane %v2391_v34, 1  ;;  %v2565_v61 = vrot.slane %v2391_v34, 2  ;;  %7697 = vrot.lane.b32.xlu0 %v7696_v18, %s10919_s26 }
 0x378   : > { %v2566_v40 = vsel %vm2456_vm5, %v2564_v36, %v2565_v61  ;;  %v2557_v22 = vsel %vm1570_vm0, %v2555_v21, %v2556_v58  ;;  %v7972_v36 = vld [vmem:[%s10835_s5 + $0xa0] sm:$0xff]  }
 0x379   : > { %v2611_v48 = vpack.c.bf16 %v2566_v40, %v2528_v7  ;;  %v7701_v45 = vpack.i.bf16 %v2557_v22, %v9658_v56  ;;  %v7977_v40 = vld [vmem:[%s10835_s5 + $0xf8] sm:$0xff]  }
 0x37a   : > { %7707 = vrot.lane.b32.xlu0 %v7706_v39, %s10919_s26 }
 0x37b   : > { %7470 = vmatmul.mubr.msk.bf16.gmra.mrb[132].mxu1 %vm1793_vm1, %v2611_v48  ;;  %7702 = vrot.lane.b32.xlu1 %v7701_v45, %s10919_s26  ;;  %v7978_v45 = vld [vmem:[%s10835_s5 + $0xb8] sm:$0xff]  }
 0x3ad   : > { %v7653_v10 = vpop.permute.xlu1 %7652 }
 0x3ae   : > { %v7655_v60 = vunpack.i.h.bf16 %v7653_v10  ;;  %v7654_v4 = vunpack.i.l.bf16 %v7653_v10 }
 0x3b0   : > { %v7648_v49 = vpop.permute.xlu0 %7647  ;;  %v2570_v35 = vsel %vm1793_vm1, %v9494_v26, %v7655_v60  ;;  %v2569_v3 = vsel %vm1793_vm1, %v9492_v52, %v7654_v4  ;;  %v7966_v52 = vld [vmem:[%s10835_s5 + $0x88] sm:$0xff]   ;;  %v7967_v26 = vld [vmem:[%s10835_s5 + $0xd0] sm:$0xff]  }
 0x3b1   : > { %v7650_v37 = vunpack.i.h.bf16 %v7648_v49  ;;  %v7649_v55 = vunpack.i.l.bf16 %v7648_v49  ;;  %v2595_v8 = vpack.c.bf16 %v2570_v35, %v2569_v3 }
 0x3b3   : > { %v2577_v31 = vsel %vm1793_vm1, %v2459_v2, %v7649_v55  ;;  %v2578_v59 = vsel %vm1793_vm1, %v2462_v51, %v7650_v37  ;;  %v7969_v51 = vld [vmem:[%s10835_s5 + $0xd8] sm:$0xff]   ;;  %v1275_v55 = vpop.f32.mrb[89].mxu0 }
 0x3b4   : > { %v2596_v16 = vpack.c.bf16 %v2578_v59, %v2577_v31  ;;  %v1276_v3 = vpop.f32.mrb[90].mxu0  ;;  %v7984_v55 = vld [vmem:[%s10837_s7 + $0xc8] sm:$0xff]  }
 0x3b5   : > { %v1277_v31 = vpop.f32.mrb[91].mxu0  ;;  %v7986_v3 = vld [vmem:[%s10837_s7 + $0x88] sm:$0xff]  }
 0x3b6   : > { %2951 = vmatprep.mubr.bf16.mxu0 %v2596_v16  ;;  %v7988_v31 = vld [vmem:[%s10837_s7 + $0xd0] sm:$0xff]  }
 0x3b7   : > { %2952 = vmatmul.mubr.bf16.vlgmr.msra.gmra.mrb[96].mxu0 %v2595_v8 }
 0x3b8   : > { %6989 = vmatpush3.bf16.msra.mxu0 %v7964_v5 }
 0x3b9   : > { %6990 = vmatprep.subr.bf16.mxu0 %v7965_v42 }
 0x3bc   : > { %6991 = vmatpush3.bf16.msra.mxu0 %v7966_v52 }
 0x3bd   : > { %v7663_v9 = vpop.permute.xlu1 %7662  ;;  %6992 = vmatprep.subr.bf16.mxu0 %v7967_v26 }
 0x3be   : > { %v7665_v20 = vunpack.i.h.bf16 %v7663_v9  ;;  %v7664_v27 = vunpack.i.l.bf16 %v7663_v9 }
 0x3c0   : > { %v7658_v46 = vpop.permute.xlu0 %7657  ;;  %6993 = vmatpush3.bf16.msra.mxu0 %v7968_v38  ;;  %v2571_v34 = vsel %vm1793_vm1, %v9514_v62, %v7664_v27  ;;  %v2572_v18 = vsel %vm1793_vm1, %v9524_v30, %v7665_v20  ;;  %v7973_v62 = vld [vmem:[%s10835_s5 + $0xe8] sm:$0xff]  }
 0x3c1   : > { %v7660_v0 = vunpack.i.h.bf16 %v7658_v46  ;;  %v7659_v14 = vunpack.i.l.bf16 %v7658_v46  ;;  %6994 = vmatprep.subr.bf16.mxu0 %v7969_v51  ;;  %v2598_v58 = vpack.c.bf16 %v2572_v18, %v2571_v34  ;;  %v7974_v30 = vld [vmem:[%s10835_s5 + $0xa8] sm:$0xff]  }
 0x3c3   : > { %v2579_v7 = vsel %vm1793_vm1, %v9535_v6, %v7659_v14  ;;  %v2580_v54 = vsel %vm1793_vm1, %v9541_v25, %v7660_v0  ;;  %v7975_v6 = vld [vmem:[%s10835_s5 + $0xf0] sm:$0xff]  }
 0x3c4   : > { %v2600_v21 = vpack.c.bf16 %v2580_v54, %v2579_v7  ;;  %6995 = vmatpush3.bf16.msra.mxu0 %v7970_v15  ;;  %v7976_v25 = vld [vmem:[%s10835_s5 + $0xb0] sm:$0xff]  }
 0x3c5   : > { %6996 = vmatprep.subr.bf16.mxu0 %v7971_v1 }
 0x3c6   : > { %2959 = vmatprep.mubr.bf16.mxu0 %v2600_v21 }
 0x3c7   : > { %2960 = vmatmul.mubr.bf16.gmra.mrb[100].mxu0 %v2598_v58 }
 0x3c8   : > { %6997 = vmatpush3.bf16.msra.mxu0 %v7972_v36 }
 0x3c9   : > { %6998 = vmatprep.subr.bf16.mxu0 %v7973_v62 }
 0x3cc   : > { %6999 = vmatpush3.bf16.msra.mxu0 %v7974_v30 }
 0x3cd   : > { %v7673_v61 = vpop.permute.xlu1 %7672  ;;  %7000 = vmatprep.subr.bf16.mxu0 %v7975_v6 }
 0x3ce   : > { %v7675_v39 = vunpack.i.h.bf16 %v7673_v61  ;;  %v7674_v22 = vunpack.i.l.bf16 %v7673_v61 }
 0x3d0   : > { %v7668_v48 = vpop.permute.xlu0 %7667  ;;  %7001 = vmatpush3.bf16.msra.mxu0 %v7976_v25  ;;  %v2573_v60 = vsel %vm1793_vm1, %v9550_v13, %v7674_v22  ;;  %v2574_v4 = vsel %vm1793_vm1, %v9564_v11, %v7675_v39 }
 0x3d1   : > { %v7670_v10 = vunpack.i.h.bf16 %v7668_v48  ;;  %v7669_v63 = vunpack.i.l.bf16 %v7668_v48  ;;  %7002 = vmatprep.subr.bf16.mxu0 %v7977_v40  ;;  %v2602_v2 = vpack.c.bf16 %v2574_v4, %v2573_v60  ;;  %v7979_v60 = vld [vmem:[%s10837_s7 + $0x40] sm:$0xff]  }
 0x3d2   : > { %v7980_v4 = vld [vmem:[%s10837_s7 + $0xc0] sm:$0xff]  }
 0x3d3   : > { %v2581_v49 = vsel %vm1793_vm1, %v9575_v32, %v7669_v63  ;;  %v2582_v37 = vsel %vm1793_vm1, %v9581_v17, %v7670_v10  ;;  %7058 = vmatprep.subr.bf16.mxu1 %v7980_v4 }
 0x3d4   : > { %v2604_v35 = vpack.c.bf16 %v2582_v37, %v2581_v49  ;;  %7003 = vmatpush3.bf16.msra.mxu0 %v7978_v45  ;;  %v7982_v49 = vld [vmem:[%s10837_s7 + $0x80] sm:$0xff]   ;;  %v7983_v37 = vld [vmem:[%s10837_s7 + $0x48] sm:$0xff]  }
 0x3d5   : > { %7036 = vmatprep.subr.bf16.mxu0 %v7979_v60  ;;  %7059 = vmatpush3.bf16.msra.mxu1 %v7982_v49  ;;  %v8008_v49 = vld [vmem:[%s10837_s7 + $0xf8] sm:$0xff]  }
 0x3d6   : > { %2967 = vmatprep.mubr.bf16.mxu0 %v2604_v35  ;;  %v7985_v35 = vld [vmem:[%s10837_s7 + $0x8] sm:$0xff]   ;;  %7060 = vmatprep.subr.bf16.mxu1 %v7984_v55  ;;  %v8009_v55 = vld [vmem:[%s10837_s7 + $0x38] sm:$0xff]  }
 0x3d7   : > { %2968 = vmatmul.mubr.bf16.gmra.mrb[104].mxu0 %v2602_v2 }
 0x3d9   : > { %7061 = vmatpush3.bf16.msra.mxu1 %v7986_v3 }
 0x3da   : > { %7062 = vmatprep.subr.bf16.mxu1 %v7988_v31 }
 0x3dd   : > { %v7683_v59 = vpop.permute.xlu1 %7682 }
 0x3de   : > { %v7685_v13 = vunpack.i.h.bf16 %v7683_v59  ;;  %v7684_v16 = vunpack.i.l.bf16 %v7683_v59  ;;  %v7989_v59 = vld [vmem:[%s10837_s7 + $0x10] sm:$0xff]  }
 0x3e0   : > { %v7678_v5 = vpop.permute.xlu0 %7677  ;;  %v2575_v32 = vsel %vm1793_vm1, %v9590_v24, %v7684_v16  ;;  %v2576_v17 = vsel %vm1793_vm1, %v9601_v53, %v7685_v13  ;;  %v7990_v13 = vld [vmem:[%s10837_s7 + $0x90] sm:$0xff]   ;;  %v7991_v16 = vld [vmem:[%s10837_s7 + $0x58] sm:$0xff]  }
 0x3e1   : > { %v7680_v11 = vunpack.i.h.bf16 %v7678_v5  ;;  %v7679_v8 = vunpack.i.l.bf16 %v7678_v5  ;;  %v2606_v9 = vpack.c.bf16 %v2576_v17, %v2575_v32  ;;  %v7693_v27 = vpop.permute.xlu1 %7692  ;;  %v7992_v5 = vld [vmem:[%s10837_s7 + $0xd8] sm:$0xff]   ;;  %7063 = vmatpush3.bf16.msra.mxu1 %v7990_v13  ;;  %v7995_v32 = vld [vmem:[%s10837_s7 + $0x60] sm:$0xff]  }
 0x3e2   : > { %v7694_v15 = vunpack.i.l.bf16 %v7693_v27  ;;  %7064 = vmatprep.subr.bf16.mxu1 %v7992_v5  ;;  %v7996_v17 = vld [vmem:[%s10837_s7 + $0xe0] sm:$0xff]  }
 0x3e3   : > { %v2583_v42 = vsel %vm1793_vm1, %v9612_v19, %v7679_v8  ;;  %v2584_v52 = vsel %vm1793_vm1, %v9618_v47, %v7680_v11  ;;  %v7695_v19 = vunpack.i.h.bf16 %v7693_v27  ;;  %v7993_v11 = vld [vmem:[%s10837_s7 + $0x18] sm:$0xff]   ;;  %v8006_v27 = vld [vmem:[%s10837_s7 + $0xb0] sm:$0xff]  }
 0x3e4   : > { %v7688_v26 = vpop.permute.xlu0 %7687  ;;  %v2608_v38 = vpack.c.bf16 %v2584_v52, %v2583_v42  ;;  %v2587_v47 = vsel %vm1793_vm1, %v9544_v28, %v7694_v15  ;;  %v7994_v8 = vld [vmem:[%s10837_s7 + $0x98] sm:$0xff]   ;;  %v7997_v42 = vld [vmem:[%s10837_s7 + $0x20] sm:$0xff]  }
 0x3e5   : > { %v7690_v51 = vunpack.i.h.bf16 %v7688_v26  ;;  %v7689_v20 = vunpack.i.l.bf16 %v7688_v26  ;;  %v2588_v0 = vsel %vm1793_vm1, %v9578_v44, %v7695_v19  ;;  %7065 = vmatpush3.bf16.msra.mxu1 %v7994_v8  ;;  %v7998_v52 = vld [vmem:[%s10837_s7 + $0xa0] sm:$0xff]   ;;  %v7999_v26 = vld [vmem:[%s10837_s7 + $0x68] sm:$0xff]  }
 0x3e6   : > { %2975 = vmatprep.mubr.bf16.mxu0 %v2608_v38  ;;  %v2601_v34 = vpack.c.bf16 %v2588_v0, %v2587_v47  ;;  %7066 = vmatprep.subr.bf16.mxu1 %v7996_v17  ;;  %v8000_v38 = vld [vmem:[%s10837_s7 + $0xe8] sm:$0xff]   ;;  %v8011_v8 = vld [vmem:[%s10837_s7 + $0x140] sm:$0xff]  }
 0x3e7   : > { %2976 = vmatmul.mubr.bf16.gmra.mrb[108].mxu0 %v2606_v9  ;;  %v2586_v24 = vsel %vm1793_vm1, %v9538_v43, %v7690_v51  ;;  %v2585_v53 = vsel %vm1793_vm1, %v9511_v29, %v7689_v20  ;;  %v8002_v51 = vld [vmem:[%s10837_s7 + $0xa8] sm:$0xff]   ;;  %v8003_v20 = vld [vmem:[%s10837_s7 + $0x70] sm:$0xff]  }
 0x3e8   : > { %3016 = vmatprep.mubr.bf16.mxu0 %v2598_v58  ;;  %v2597_v46 = vpack.c.bf16 %v2586_v24, %v2585_v53  ;;  %v7698_v14 = vpop.permute.xlu0 %7697  ;;  %v8004_v24 = vld [vmem:[%s10837_s7 + $0xf0] sm:$0xff]  }
 0x3e9   : > { %v7700_v18 = vunpack.i.h.bf16 %v7698_v14  ;;  %v7699_v43 = vunpack.i.l.bf16 %v7698_v14  ;;  %7067 = vmatpush3.bf16.msra.mxu1 %v7998_v52  ;;  %v8005_v53 = vld [vmem:[%s10837_s7 + $0x30] sm:$0xff]  }
 0x3ea   : > { %7068 = vmatprep.subr.bf16.mxu1 %v8000_v38 }
 0x3eb   : > { %v2589_v29 = vsel %vm1793_vm1, %v9584_v57, %v7699_v43  ;;  %v2590_v21 = vsel %vm1793_vm1, %v9615_v33, %v7700_v18  ;;  %v1280_v33 = vpop.f32.mrb[92].mxu0 }
 0x3ec   : > { %v7708_v36 = vpop.permute.xlu0 %7707  ;;  %v2605_v58 = vpack.c.bf16 %v2590_v21, %v2589_v29  ;;  %v1281_v40 = vpop.f32.mrb[93].mxu0 }
 0x3ed   : > { %v7703_v1 = vpop.permute.xlu1 %7702  ;;  %v7710_v62 = vunpack.i.h.bf16 %v7708_v36  ;;  %v7709_v30 = vunpack.i.l.bf16 %v7708_v36  ;;  %v1282_v39 = vpop.f32.mrb[94].mxu0  ;;  %7069 = vmatpush3.bf16.msra.mxu1 %v8002_v51 }
 0x3ee   : > { %v7705_v7 = vunpack.i.h.bf16 %v7703_v1  ;;  %v7704_v54 = vunpack.i.l.bf16 %v7703_v1  ;;  %7070 = vmatprep.subr.bf16.mxu1 %v8004_v24 }
 0x3ef   : > { %3017 = vmatmul.mubr.bf16.vlgmr.msra.gmra.mrb[112].mxu0 %v2597_v46  ;;  %v2591_v25 = vsel %vm1793_vm1, %v9621_v41, %v7709_v30  ;;  %v2592_v57 = vsel %vm1793_vm1, %v9658_v56, %v7710_v62 }
 0x3f0   : > { %3024 = vmatprep.mubr.bf16.mxu0 %v2602_v2  ;;  %v2593_v28 = vsel %vm1793_vm1, %v9627_v23, %v7704_v54  ;;  %v2594_v44 = vsel %vm1793_vm1, %v9643_v50, %v7705_v7  ;;  %v2609_v61 = vpack.c.bf16 %v2592_v57, %v2591_v25  ;;  %v1283_v23 = vpop.f32.mrb[95].mxu0  ;;  %7037 = vmatpush3.bf16.msra.mxu0 %v7981_v12  ;;  %v7987_v2 = vld [vmem:[%s10837_s7 + $0x50] sm:$0xff]   ;;  %v8007_v12 = vld [vmem:[%s10837_s7 + $0x78] sm:$0xff]  }
 0x3f1   : > { %v2610_v6 = vpack.c.bf16 %v2594_v44, %v2593_v28  ;;  %7038 = vmatprep.subr.bf16.mxu0 %v7983_v37  ;;  %7071 = vmatpush3.bf16.msra.mxu1 %v8006_v27 }
 0x3f2   : > { %7072 = vmatprep.subr.bf16.mxu1 %v8008_v49 }
 0x3f4   : > { %7039 = vmatpush3.bf16.msra.mxu0 %v7985_v35  ;;  %v8010_v35 = vld [vmem:[%s10837_s7 + $0xb8] sm:$0xff]  }
 0x3f5   : > { %7040 = vmatprep.subr.bf16.mxu0 %v7987_v2  ;;  %7073 = vmatpush3.bf16.msra.mxu1 %v8010_v35 }
 0x3f7   : > { %3025 = vmatmul.mubr.bf16.gmra.mrb[116].mxu0 %v2601_v34 }
 0x3f8   : > { %3032 = vmatprep.mubr.bf16.mxu0 %v2606_v9  ;;  %7041 = vmatpush3.bf16.msra.mxu0 %v7989_v59  ;;  %v8001_v9 = vld [vmem:[%s10837_s7 + $0x28] sm:$0xff]  }
 0x3f9   : > { %7042 = vmatprep.subr.bf16.mxu0 %v7991_v16 }
 0x3fc   : > { %7043 = vmatpush3.bf16.msra.mxu0 %v7993_v11 }
 0x3fd   : > { %7044 = vmatprep.subr.bf16.mxu0 %v7995_v32  ;;  %v8012_v32 = vld [vmem:[%s10837_s7 + $0x1c0] sm:$0xff]  }
 0x3fe   : > { %7102 = vmatprep.subr.bf16.mxu1 %v8012_v32 }
 0x3ff   : > { %3033 = vmatmul.mubr.bf16.gmra.mrb[120].mxu0 %v2605_v58 }
 0x400   : > { %3040 = vmatprep.mubr.bf16.mxu0 %v2610_v6  ;;  %7045 = vmatpush3.bf16.msra.mxu0 %v7997_v42 }
 0x401   : > { %7046 = vmatprep.subr.bf16.mxu0 %v7999_v26 }
 0x404   : > { %7047 = vmatpush3.bf16.msra.mxu0 %v8001_v9 }
 0x405   : > { %7048 = vmatprep.subr.bf16.mxu0 %v8003_v20 }
 0x407   : > { %3041 = vmatmul.mubr.bf16.gmra.mrb[124].mxu0 %v2609_v61  ;;  %v9875_v61 = vld [vmem:[%s10836_s6] ss:$0 sm:$0xff] }
 0x408   : > { %7049 = vmatpush3.bf16.msra.mxu0 %v8005_v53 }
 0x409   : > { %7050 = vmatprep.subr.bf16.mxu0 %v8007_v12 }
 0x40c   : > { %7051 = vmatpush3.bf16.msra.mxu0 %v8009_v55 }
 0x40d   : > { %7080 = vmatprep.subr.bf16.mxu0 %v8011_v8 }
 0x42e   : > { %v9764_v22 = vpop.f32.mrb[128].mxu1 }
 0x42f   : > { %v9766_v50 = vpop.f32.mrb[129].mxu1 }
 0x430   : > { %v9768_v48 = vpop.f32.mrb[130].mxu1 }
 0x431   : > { %v9770_v45 = vpop.f32.mrb[131].mxu1 }
 0x44e   : > { %v9772_v10 = vpop.f32.mrb[132].mxu1 }
 0x44f   : > { %v9774_v41 = vpop.f32.mrb[133].mxu1 }
 0x450   : > { %v9776_v63 = vpop.f32.mrb[134].mxu1 }
 0x451   : > { %v9778_v56 = vpop.f32.mrb[135].mxu1 }
 0x48a   : > { %v6964_v46 = vpop.f32.mrb[96].mxu0 }
 0x48b   : > { %v6965_v19 = vpop.f32.mrb[97].mxu0 }
 0x48c   : > { %v6966_v15 = vadd.f32 %v6965_v19, %v6964_v46  ;;  %v6967_v47 = vpop.f32.mrb[98].mxu0 }
 0x48d   : > { %v6968_v0 = vpop.f32.mrb[99].mxu0 }
 0x48e   : > { %v6969_v14 = vadd.f32 %v6968_v0, %v6967_v47  ;;  %v2954_v23 = vadd.f32 %v6966_v15, %v9875_v61 }
 0x490   : > { %v2957_v3 = vadd.f32 %v6969_v14, %v9875_v61 }
 0x49a   : > { %v6970_v1 = vpop.f32.mrb[100].mxu0 }
 0x49b   : > { %v6971_v34 = vpop.f32.mrb[101].mxu0 }
 0x49c   : > { %v6972_v18 = vadd.f32 %v6971_v34, %v6970_v1  ;;  %v6973_v43 = vpop.f32.mrb[102].mxu0 }
 0x49d   : > { %v6974_v7 = vpop.f32.mrb[103].mxu0 }
 0x49e   : > { %v6975_v54 = vadd.f32 %v6974_v7, %v6973_v43  ;;  %v2962_v17 = vadd.f32 %v6972_v18, %v9875_v61 }
 0x4a0   : > { %v2965_v9 = vadd.f32 %v6975_v54, %v9875_v61 }
 0x4aa   : > { %v6976_v29 = vpop.f32.mrb[104].mxu0 }
 0x4ab   : > { %v6977_v21 = vpop.f32.mrb[105].mxu0 }
 0x4ac   : > { %v9864_v36 = vadd.f32 %v6977_v21, %v6976_v29  ;;  %v6979_v28 = vpop.f32.mrb[106].mxu0 }
 0x4ad   : > { %v6980_v44 = vpop.f32.mrb[107].mxu0 }
 0x4ae   : > { %v9866_v58 = vadd.f32 %v6980_v44, %v6979_v28  ;;  %v2970_v29 = vadd.f32 %v9864_v36, %v9875_v61 }
 0x4ba   : > { %v6982_v62 = vpop.f32.mrb[108].mxu0 }
 0x4bb   : > { %v6983_v30 = vpop.f32.mrb[109].mxu0 }
 0x4bc   : > { %v9868_v6 = vadd.f32 %v6983_v30, %v6982_v62  ;;  %v6985_v25 = vpop.f32.mrb[110].mxu0 }
 0x4bd   : > { %v6986_v57 = vpop.f32.mrb[111].mxu0 }
 0x4be   : > { %v9870_v33 = vadd.f32 %v6986_v57, %v6985_v25 }
 0x4c2   : > { %v7004_v40 = vpop.f32.mrb[112].mxu0 }
 0x4c3   : > { %v7005_v39 = vpop.f32.mrb[113].mxu0 }
 0x4c4   : > { %v7006_v60 = vadd.f32 %v7005_v39, %v7004_v40  ;;  %v7007_v4 = vpop.f32.mrb[114].mxu0 }
 0x4c5   : > { %v7008_v37 = vpop.f32.mrb[115].mxu0 }
 0x4c6   : > { %v3019_v2 = vadd.f32 %v7006_v60, %v2954_v23  ;;  %v7009_v31 = vadd.f32 %v7008_v37, %v7007_v4 }
 0x4c8   : > { %v3084_v59 = vadd.f32 %v9766_v50, %v3019_v2  ;;  %v3022_v13 = vadd.f32 %v7009_v31, %v2957_v3 }
 0x4ca   : > { %v9892_v16 = vmax.f32 %v3084_v59, 0.0  ;;  %v3087_v5 = vadd.f32 %v9770_v45, %v3022_v13  ;;  %v7010_v11 = vpop.f32.mrb[116].mxu0  ;;  %v2978_v13 = vadd.f32 %v9868_v6, %v9875_v61 }
 0x4cb   : > { %v7011_v42 = vpop.f32.mrb[117].mxu0 }
 0x4cc   : > { %v9902_v52 = vmax.f32 %v3087_v5, 0.0  ;;  %v7012_v50 = vadd.f32 %v7011_v42, %v7010_v11  ;;  %v7013_v26 = vpop.f32.mrb[118].mxu0  ;;  %v3135_v38 = vrot.slane %v9892_v16, 5  ;;  %v3141_v45 = vrot.slane %v9892_v16, 7 }
 0x4cd   : > { %v7014_v51 = vpop.f32.mrb[119].mxu0  ;;  %v3123_v20 = vrot.slane %v9892_v16, 1  ;;  %v3129_v24 = vrot.slane %v9892_v16, 3 }
 0x4ce   : > { %v3027_v53 = vadd.f32 %v7012_v50, %v2962_v17  ;;  %v7015_v27 = vadd.f32 %v7014_v51, %v7013_v26  ;;  %v7716_v46 = vpack.i.bf16 %v3135_v38, %v3141_v45  ;;  %v3158_v19 = vrot.slane %v9902_v52, 5 }
 0x4cf   : > { %v7711_v15 = vpack.i.bf16 %v3123_v20, %v3129_v24  ;;  %v3164_v47 = vrot.slane %v9902_v52, 7  ;;  %v3146_v0 = vrot.slane %v9902_v52, 1  ;;  %v3152_v14 = vrot.slane %v9902_v52, 3 }
 0x4d0   : > { %v3092_v1 = vadd.f32 %v9764_v22, %v3027_v53  ;;  %v3030_v34 = vadd.f32 %v7015_v27, %v2965_v9  ;;  %7717 = vrot.lane.b32.xlu0 %v7716_v46, %s10919_s26 }
 0x4d1   : > { %7712 = vrot.lane.b32.xlu1 %v7711_v15, %s10919_s26  ;;  %v7726_v54 = vpack.i.bf16 %v3158_v19, %v3164_v47  ;;  %v7721_v28 = vpack.i.bf16 %v3146_v0, %v3152_v14 }
 0x4d2   : > { %v9916_v18 = vmax.f32 %v3092_v1, 0.0  ;;  %v3095_v43 = vadd.f32 %v9768_v48, %v3030_v34  ;;  %v7016_v7 = vpop.f32.mrb[120].mxu0  ;;  %v2973_v48 = vadd.f32 %v9866_v58, %v9875_v61 }
 0x4d3   : > { %v7017_v21 = vpop.f32.mrb[121].mxu0 }
 0x4d4   : > { %v9921_v44 = vmax.f32 %v3095_v43, 0.0  ;;  %v7018_v62 = vadd.f32 %v7017_v21, %v7016_v7  ;;  %v7019_v22 = vpop.f32.mrb[122].mxu0  ;;  %7727 = vrot.lane.b32.xlu0 %v7726_v54, %s10919_s26  ;;  %v3189_v30 = vrot.slane %v9916_v18, 5  ;;  %v3195_v25 = vrot.slane %v9916_v18, 7 }
 0x4d5   : > { %7722 = vrot.lane.b32.xlu1 %v7721_v28, %s10919_s26  ;;  %v7020_v57 = vpop.f32.mrb[123].mxu0  ;;  %v3177_v36 = vrot.slane %v9916_v18, 1  ;;  %v3183_v40 = vrot.slane %v9916_v18, 3 }
 0x4d6   : > { %v3035_v39 = vadd.f32 %v7018_v62, %v2970_v29  ;;  %v7021_v23 = vadd.f32 %v7020_v57, %v7019_v22  ;;  %v7736_v60 = vpack.i.bf16 %v3189_v30, %v3195_v25  ;;  %v3212_v4 = vrot.slane %v9921_v44, 5 }
 0x4d7   : > { %v7731_v12 = vpack.i.bf16 %v3177_v36, %v3183_v40  ;;  %v3218_v49 = vrot.slane %v9921_v44, 7  ;;  %v3200_v37 = vrot.slane %v9921_v44, 1  ;;  %v3206_v55 = vrot.slane %v9921_v44, 3 }
 0x4d8   : > { %v3100_v58 = vadd.f32 %v9774_v41, %v3035_v39  ;;  %v3038_v35 = vadd.f32 %v7021_v23, %v2973_v48  ;;  %7737 = vrot.lane.b32.xlu0 %v7736_v60, %s10919_s26  ;;  %v3133_v48 = vrot.slane %v9892_v16, 4  ;;  %v3139_v36 = vrot.slane %v9892_v16, 6 }
 0x4d9   : > { %7732 = vrot.lane.b32.xlu1 %v7731_v12, %s10919_s26  ;;  %v7746_v59 = vpack.i.bf16 %v3212_v4, %v3218_v49  ;;  %v7741_v11 = vpack.i.bf16 %v3200_v37, %v3206_v55  ;;  %v3127_v23 = vrot.slane %v9892_v16, 2 }
 0x4da   : > { %v9938_v3 = vmax.f32 %v3100_v58, 0.0  ;;  %v3103_v2 = vadd.f32 %v9778_v56, %v3038_v35  ;;  %v7022_v31 = vpop.f32.mrb[124].mxu0  ;;  %v2981_v56 = vadd.f32 %v9870_v33, %v9875_v61  ;;  %v8014_v35 = vld [vmem:[%s10837_s7 + $0x180] sm:$0xff]  }
 0x4db   : > { %v7023_v5 = vpop.f32.mrb[125].mxu0 }
 0x4dc   : > { %v9943_v8 = vmax.f32 %v3103_v2, 0.0  ;;  %v7024_v32 = vadd.f32 %v7023_v5, %v7022_v31  ;;  %v7025_v41 = vpop.f32.mrb[126].mxu0  ;;  %7747 = vrot.lane.b32.xlu0 %v7746_v59, %s10919_s26  ;;  %v3243_v17 = vrot.slane %v9938_v3, 5  ;;  %v3249_v42 = vrot.slane %v9938_v3, 7  ;;  %v8013_v5 = vld [vmem:[%s10837_s7 + $0x100] sm:$0xff]  }
 0x4dd   : > { %7742 = vrot.lane.b32.xlu1 %v7741_v11, %s10919_s26  ;;  %v7026_v50 = vpop.f32.mrb[127].mxu0  ;;  %v3231_v6 = vrot.slane %v9938_v3, 1  ;;  %v3237_v26 = vrot.slane %v9938_v3, 3  ;;  %v3162_v11 = vrot.slane %v9902_v52, 6 }
 0x4de   : > { %v3043_v38 = vadd.f32 %v7024_v32, %v2978_v13  ;;  %v7027_v45 = vadd.f32 %v7026_v50, %v7025_v41  ;;  %v7756_v9 = vpack.i.bf16 %v3243_v17, %v3249_v42  ;;  %v3266_v51 = vrot.slane %v9943_v8, 5  ;;  %v8015_v41 = vld [vmem:[%s10837_s7 + $0x148] sm:$0xff]  }
 0x4df   : > { %v7751_v20 = vpack.i.bf16 %v3231_v6, %v3237_v26  ;;  %v3272_v24 = vrot.slane %v9943_v8, 7  ;;  %v3254_v53 = vrot.slane %v9943_v8, 1  ;;  %v3260_v27 = vrot.slane %v9943_v8, 3  ;;  %v8018_v50 = vld [vmem:[%s10837_s7 + $0x188] sm:$0xff]  }
 0x4e0   : > { %v3108_v33 = vadd.f32 %v9772_v10, %v3043_v38  ;;  %v3046_v61 = vadd.f32 %v7027_v45, %v2981_v56  ;;  %7757 = vrot.lane.b32.xlu0 %v7756_v9, %s10919_s26  ;;  %v3150_v17 = vrot.slane %v9902_v52, 2  ;;  %v8017_v26 = vld [vmem:[%s10837_s7 + $0x108] sm:$0xff]   ;;  %v8020_v38 = vld [vmem:[%s10837_s7 + $0x1d0] sm:$0xff]  }
 0x4e1   : > { %7752 = vrot.lane.b32.xlu1 %v7751_v20, %s10919_s26  ;;  %v7766_v15 = vpack.i.bf16 %v3266_v51, %v3272_v24  ;;  %v7761_v47 = vpack.i.bf16 %v3254_v53, %v3260_v27  ;;  %v8019_v9 = vld [vmem:[%s10837_s7 + $0x150] sm:$0xff]   ;;  %v8024_v24 = vld [vmem:[%s10837_s7 + $0x1d8] sm:$0xff]  }
 0x4e2   : > { %v9960_v46 = vmax.f32 %v3108_v33, 0.0  ;;  %v3111_v19 = vadd.f32 %v9776_v63, %v3046_v61  ;;  %v8022_v51 = vld [vmem:[%s10837_s7 + $0x190] sm:$0xff]   ;;  %v8023_v53 = vld [vmem:[%s10837_s7 + $0x158] sm:$0xff]   ;;  %v8028_v61 = vld [vmem:[%s10837_s7 + $0x1e0] sm:$0xff]  }
 0x4e3   : > { %v8021_v20 = vld [vmem:[%s10837_s7 + $0x110] sm:$0xff]   ;;  %v8026_v27 = vld [vmem:[%s10837_s7 + $0x198] sm:$0xff]  }
 0x4e4   : > { %v9963_v0 = vmax.f32 %v3111_v19, 0.0  ;;  %7767 = vrot.lane.b32.xlu0 %v7766_v15, %s10919_s26  ;;  %v3297_v14 = vrot.slane %v9960_v46, 5  ;;  %v3303_v1 = vrot.slane %v9960_v46, 7  ;;  %v3285_v10 = vrot.slane %v9960_v46, 1  ;;  %v8025_v33 = vld [vmem:[%s10837_s7 + $0x118] sm:$0xff]   ;;  %v8027_v19 = vld [vmem:[%s10837_s7 + $0x160] sm:$0xff]  }
 0x4e5   : > { %7762 = vrot.lane.b32.xlu1 %v7761_v47, %s10919_s26  ;;  %v3291_v34 = vrot.slane %v9960_v46, 3  ;;  %v8030_v15 = vld [vmem:[%s10837_s7 + $0x1a0] sm:$0xff]  }
 0x4e6   : > { %v7776_v43 = vpack.i.bf16 %v3297_v14, %v3303_v1  ;;  %v3320_v7 = vrot.slane %v9963_v0, 5  ;;  %v3326_v63 = vrot.slane %v9963_v0, 7  ;;  %v3308_v29 = vrot.slane %v9963_v0, 1  ;;  %v8029_v47 = vld [vmem:[%s10837_s7 + $0x120] sm:$0xff]   ;;  %v8032_v14 = vld [vmem:[%s10837_s7 + $0x1e8] sm:$0xff]  }
 0x4e7   : > { %v7771_v54 = vpack.i.bf16 %v3285_v10, %v3291_v34  ;;  %v3314_v21 = vrot.slane %v9963_v0, 3  ;;  %v8031_v1 = vld [vmem:[%s10837_s7 + $0x168] sm:$0xff]  }
 0x4e8   : > { %7777 = vrot.lane.b32.xlu0 %v7776_v43, %s10919_s26  ;;  %v7786_v28 = vpack.i.bf16 %v3320_v7, %v3326_v63  ;;  %v8034_v10 = vld [vmem:[%s10837_s7 + $0x1a8] sm:$0xff]   ;;  %v8036_v43 = vld [vmem:[%s10837_s7 + $0x1f0] sm:$0xff]  }
 0x4e9   : > { %7772 = vrot.lane.b32.xlu1 %v7771_v54, %s10919_s26  ;;  %v7781_v62 = vpack.i.bf16 %v3308_v29, %v3314_v21  ;;  %v8033_v34 = vld [vmem:[%s10837_s7 + $0x128] sm:$0xff]   ;;  %v8035_v7 = vld [vmem:[%s10837_s7 + $0x170] sm:$0xff]   ;;  %v8040_v21 = vld [vmem:[%s10837_s7 + $0x1f8] sm:$0xff]  }
 0x4ea   : > { %v8038_v63 = vld [vmem:[%s10837_s7 + $0x1b0] sm:$0xff]  }
 0x4eb   : > { %v8037_v29 = vld [vmem:[%s10837_s7 + $0x130] sm:$0xff]  }
 0x4ec   : > { %7787 = vrot.lane.b32.xlu0 %v7786_v28, %s10919_s26 }
 0x4ed   : > { %7782 = vrot.lane.b32.xlu1 %v7781_v62, %s10919_s26 }
 0x542   : > { %v7718_v22 = vpop.permute.xlu0 %7717 }
 0x543   : > { %v7720_v30 = vunpack.i.h.bf16 %v7718_v22  ;;  %v7719_v25 = vunpack.i.l.bf16 %v7718_v22  ;;  %v7713_v57 = vpop.permute.xlu1 %7712  ;;  %v8039_v22 = vld [vmem:[%s10837_s7 + $0x178] sm:$0xff]  }
 0x544   : > { %v7715_v40 = vunpack.i.h.bf16 %v7713_v57  ;;  %v7714_v39 = vunpack.i.l.bf16 %v7713_v57  ;;  %v8042_v57 = vld [vmem:[%s10837_s7 + $0x1b8] sm:$0xff]  }
 0x545   : > { %v3170_v60 = vsel %vm1793_vm1, %v3133_v48, %v7720_v30  ;;  %v3171_v4 = vsel %vm1793_vm1, %v3139_v36, %v7719_v25  ;;  %v3156_v25 = vrot.slane %v9902_v52, 4 }
 0x546   : > { %v3340_v12 = vpack.c.bf16 %v3170_v60, %v3170_v60  ;;  %v3168_v49 = vsel %vm1793_vm1, %v9892_v16, %v7715_v40  ;;  %v9986_v37 = vpop.permute.xlu0 %7727  ;;  %v3169_v55 = vsel %vm1793_vm1, %v3127_v23, %v7714_v39  ;;  %v3341_v58 = vpack.c.bf16 %v3171_v4, %v3171_v4  ;;  %v8016_v16 = vld [vmem:[%s10837_s7 + $0x1c8] sm:$0xff]   ;;  %v8041_v40 = vld [vmem:[%s10837_s7 + $0x138] sm:$0xff]   ;;  %v8044_v39 = vld [vmem:[%s10837_s7 + $0x2c0] sm:$0xff]  }
 0x547   : > { %v3338_v2 = vpack.c.bf16 %v3168_v49, %v3168_v49  ;;  %v7729_v31 = vunpack.i.l.bf16 %v9986_v37  ;;  %v9993_v59 = vpop.permute.xlu1 %7722  ;;  %v3339_v13 = vpack.c.bf16 %v3169_v55, %v3169_v55  ;;  %v7730_v28 = vunpack.i.h.bf16 %v9986_v37  ;;  %v8043_v60 = vld [vmem:[%s10837_s7 + $0x240] sm:$0xff]  }
 0x548   : > { %v7724_v32 = vunpack.i.l.bf16 %v9993_v59  ;;  %5491 = vmatprep.mubr.bf16.mxu1 %v3341_v58  ;;  %v7725_v30 = vunpack.i.h.bf16 %v9993_v59  ;;  %v3181_v4 = vrot.slane %v9916_v18, 2  ;;  %v3193_v49 = vrot.slane %v9916_v18, 6  ;;  %v8046_v55 = vld [vmem:[%s10837_s7 + $0x280] sm:$0xff]  }
 0x549   : > { %5451 = vmatprep.mubr.bf16.mxu0 %v3339_v13  ;;  %5492 = vmatmul.mubr.bf16.vlgmr.msra.gmra.mrb[136].mxu1 %v3340_v12  ;;  %v3175_v42 = vsel %vm1793_vm1, %v3162_v11, %v7729_v31  ;;  %v3174_v23 = vsel %vm1793_vm1, %v3156_v25, %v7730_v28  ;;  %v8048_v13 = vld [vmem:[%s10837_s7 + $0x2c8] sm:$0xff]   ;;  %v8073_v28 = vld [vmem:[%s10837_s7 + $0x238] sm:$0xff]  }
 0x54a   : > { %5452 = vmatmul.mubr.bf16.vlgmr.msra.gmra.mrb[128].mxu0 %v3338_v2  ;;  %7103 = vmatpush3.bf16.msra.mxu1 %v8014_v35  ;;  %v3173_v56 = vsel %vm1793_vm1, %v3150_v17, %v7724_v32  ;;  %v3345_v45 = vpack.c.bf16 %v3175_v42, %v3175_v42  ;;  %v10081_v62 = vpop.permute.xlu0 %7737  ;;  %v3172_v12 = vsel %vm1793_vm1, %v9902_v52, %v7725_v30  ;;  %v8045_v35 = vld [vmem:[%s10837_s7 + $0x200] sm:$0xff]   ;;  %v8047_v52 = vld [vmem:[%s10837_s7 + $0x248] sm:$0xff]   ;;  %v8052_v32 = vld [vmem:[%s10837_s7 + $0x2d0] sm:$0xff]   ;;  %v3204_v30 = vrot.slane %v9921_v44, 2 }
 0x54b   : > { %7081 = vmatpush3.bf16.msra.mxu0 %v8013_v5  ;;  %v3343_v6 = vpack.c.bf16 %v3173_v56, %v3173_v56  ;;  %7104 = vmatprep.subr.bf16.mxu1 %v8016_v16  ;;  %v10072_v54 = vpop.permute.xlu1 %7732  ;;  %v7739_v36 = vunpack.i.l.bf16 %v10081_v62  ;;  %v3344_v58 = vpack.c.bf16 %v3174_v23, %v3174_v23  ;;  %v3342_v31 = vpack.c.bf16 %v3172_v12, %v3172_v12  ;;  %v8050_v16 = vld [vmem:[%s10837_s7 + $0x288] sm:$0xff]   ;;  %v8054_v17 = vld [vmem:[%s10837_s7 + $0x290] sm:$0xff]   ;;  %v8056_v56 = vld [vmem:[%s10837_s7 + $0x2d8] sm:$0xff]  }
 0x54c   : > { %7082 = vmatprep.subr.bf16.mxu0 %v8015_v41  ;;  %5571 = vmatprep.mubr.bf16.mxu1 %v3345_v45  ;;  %v7734_v48 = vunpack.i.l.bf16 %v10072_v54  ;;  %v8049_v11 = vld [vmem:[%s10837_s7 + $0x208] sm:$0xff]   ;;  %v8051_v41 = vld [vmem:[%s10837_s7 + $0x250] sm:$0xff]   ;;  %v8059_v45 = vld [vmem:[%s10837_s7 + $0x260] sm:$0xff]  }
 0x54d   : > { %5531 = vmatprep.mubr.bf16.mxu0 %v3343_v6  ;;  %v3225_v2 = vsel %vm1793_vm1, %v3193_v49, %v7739_v36  ;;  %v8053_v42 = vld [vmem:[%s10837_s7 + $0x210] sm:$0xff]   ;;  %v8058_v6 = vld [vmem:[%s10837_s7 + $0x298] sm:$0xff]   ;;  %v8078_v36 = vld [vmem:[%s10837_s7 + $0x380] sm:$0xff]  }
 0x54e   : > { %7105 = vmatpush3.bf16.msra.mxu1 %v8018_v50  ;;  %v3223_v37 = vsel %vm1793_vm1, %v3181_v4, %v7734_v48  ;;  %v3349_v5 = vpack.c.bf16 %v3225_v2, %v3225_v2  ;;  %v8055_v50 = vld [vmem:[%s10837_s7 + $0x258] sm:$0xff]   ;;  %v3216_v48 = vrot.slane %v9921_v44, 6  ;;  %v8080_v12 = vld [vmem:[%s10837_s7 + $0x3c8] sm:$0xff]   ;;  %v8086_v2 = vld [vmem:[%s10837_s7 + $0x390] sm:$0xff]  }
 0x54f   : > { %7083 = vmatpush3.bf16.msra.mxu0 %v8017_v26  ;;  %7106 = vmatprep.subr.bf16.mxu1 %v8020_v38  ;;  %v3347_v59 = vpack.c.bf16 %v3223_v37, %v3223_v37  ;;  %v8057_v26 = vld [vmem:[%s10837_s7 + $0x218] sm:$0xff]   ;;  %v8060_v38 = vld [vmem:[%s10837_s7 + $0x2e0] sm:$0xff]   ;;  %v8082_v37 = vld [vmem:[%s10837_s7 + $0x388] sm:$0xff]  }
 0x550   : > { %7084 = vmatprep.subr.bf16.mxu0 %v8019_v9  ;;  %v8062_v9 = vld [vmem:[%s10837_s7 + $0x2a0] sm:$0xff]  }
 0x552   : > { %7107 = vmatpush3.bf16.msra.mxu1 %v8022_v51  ;;  %v8061_v51 = vld [vmem:[%s10837_s7 + $0x220] sm:$0xff]  }
 0x553   : > { %7085 = vmatpush3.bf16.msra.mxu0 %v8021_v20  ;;  %7108 = vmatprep.subr.bf16.mxu1 %v8024_v24  ;;  %v8064_v20 = vld [vmem:[%s10837_s7 + $0x2e8] sm:$0xff]  }
 0x554   : > { %7086 = vmatprep.subr.bf16.mxu0 %v8023_v53  ;;  %v8063_v24 = vld [vmem:[%s10837_s7 + $0x268] sm:$0xff]  }
 0x555   : > { %v8066_v53 = vld [vmem:[%s10837_s7 + $0x2a8] sm:$0xff]  }
 0x556   : > { %7109 = vmatpush3.bf16.msra.mxu1 %v8026_v27  ;;  %v8065_v27 = vld [vmem:[%s10837_s7 + $0x228] sm:$0xff]  }
 0x557   : > { %7087 = vmatpush3.bf16.msra.mxu0 %v8025_v33  ;;  %7110 = vmatprep.subr.bf16.mxu1 %v8028_v61  ;;  %v8068_v33 = vld [vmem:[%s10837_s7 + $0x2f0] sm:$0xff]  }
 0x558   : > { %7088 = vmatprep.subr.bf16.mxu0 %v8027_v19  ;;  %v8067_v61 = vld [vmem:[%s10837_s7 + $0x270] sm:$0xff]  }
 0x559   : > { %v8070_v19 = vld [vmem:[%s10837_s7 + $0x2b0] sm:$0xff]  }
 0x55a   : > { %7111 = vmatpush3.bf16.msra.mxu1 %v8030_v15  ;;  %v10184_v15 = vpop.permute.xlu1 %7742 }
 0x55b   : > { %7089 = vmatpush3.bf16.msra.mxu0 %v8029_v47  ;;  %7112 = vmatprep.subr.bf16.mxu1 %v8032_v14  ;;  %v8069_v47 = vld [vmem:[%s10837_s7 + $0x230] sm:$0xff]   ;;  %v8072_v14 = vld [vmem:[%s10837_s7 + $0x2f8] sm:$0xff]  }
 0x55c   : > { %7090 = vmatprep.subr.bf16.mxu0 %v8031_v1  ;;  %v7740_v1 = vunpack.i.h.bf16 %v10081_v62 }
 0x55e   : > { %7113 = vmatpush3.bf16.msra.mxu1 %v8034_v10  ;;  %v10193_v10 = vpop.permute.xlu0 %7747 }
 0x55f   : > { %7091 = vmatpush3.bf16.msra.mxu0 %v8033_v34  ;;  %7114 = vmatprep.subr.bf16.mxu1 %v8036_v43  ;;  %v8071_v34 = vld [vmem:[%s10837_s7 + $0x278] sm:$0xff]   ;;  %v7735_v43 = vunpack.i.h.bf16 %v10072_v54  ;;  %v8076_v54 = vld [vmem:[%s10837_s7 + $0x3c0] sm:$0xff]  }
 0x560   : > { %7092 = vmatprep.subr.bf16.mxu0 %v8035_v7  ;;  %v3187_v7 = vrot.slane %v9916_v18, 4 }
 0x561   : > { %v3222_v25 = vsel %vm1793_vm1, %v9916_v18, %v7735_v43  ;;  %v8079_v18 = vld [vmem:[%s10837_s7 + $0x348] sm:$0xff]  }
 0x562   : > { %7115 = vmatpush3.bf16.msra.mxu1 %v8038_v63  ;;  %v7744_v63 = vunpack.i.l.bf16 %v10184_v15  ;;  %v3224_v62 = vsel %vm1793_vm1, %v3187_v7, %v7740_v1  ;;  %v3247_v7 = vrot.slane %v9938_v3, 6 }
 0x563   : > { %7093 = vmatpush3.bf16.msra.mxu0 %v8037_v29  ;;  %7116 = vmatprep.subr.bf16.mxu1 %v8040_v21  ;;  %v8074_v29 = vld [vmem:[%s10837_s7 + $0x2b8] sm:$0xff]   ;;  %v7749_v21 = vunpack.i.l.bf16 %v10193_v10 }
 0x564   : > { %7094 = vmatprep.subr.bf16.mxu0 %v8039_v22  ;;  %v8075_v22 = vld [vmem:[%s10837_s7 + $0x340] sm:$0xff]  }
 0x565   : > { %v3229_v23 = vsel %vm1793_vm1, %v3216_v48, %v7749_v21  ;;  %v8114_v48 = vld [vmem:[%s10837_s7 + $0x488] sm:$0xff]  }
 0x566   : > { %7117 = vmatpush3.bf16.msra.mxu1 %v8042_v57  ;;  %v3227_v57 = vsel %vm1793_vm1, %v3204_v30, %v7744_v63  ;;  %v3353_v49 = vpack.c.bf16 %v3229_v23, %v3229_v23  ;;  %v8112_v30 = vld [vmem:[%s10837_s7 + $0x4c8] sm:$0xff]   ;;  %v8117_v23 = vld [vmem:[%s10837_s7 + $0x410] sm:$0xff]  }
 0x567   : > { %7095 = vmatpush3.bf16.msra.mxu0 %v8041_v40  ;;  %7146 = vmatprep.subr.bf16.mxu1 %v8044_v39  ;;  %v3348_v40 = vpack.c.bf16 %v3224_v62, %v3224_v62  ;;  %v8077_v39 = vld [vmem:[%s10837_s7 + $0x300] sm:$0xff]   ;;  %v3351_v4 = vpack.c.bf16 %v3227_v57, %v3227_v57  ;;  %v8113_v57 = vld [vmem:[%s10837_s7 + $0x408] sm:$0xff]  }
 0x568   : > { %7124 = vmatprep.subr.bf16.mxu0 %v8043_v60  ;;  %v3346_v60 = vpack.c.bf16 %v3222_v25, %v3222_v25 }
 0x569   : > { %5572 = vmatmul.mubr.bf16.vlgmr.msra.gmra.mrb[140].mxu1 %v3344_v58  ;;  %v8084_v58 = vld [vmem:[%s10837_s7 + $0x3d0] sm:$0xff]  }
 0x56a   : > { %5532 = vmatmul.mubr.bf16.vlgmr.msra.gmra.mrb[132].mxu0 %v3342_v31  ;;  %7147 = vmatpush3.bf16.msra.mxu1 %v8046_v55  ;;  %v8081_v55 = vld [vmem:[%s10837_s7 + $0x308] sm:$0xff]   ;;  %v8085_v31 = vld [vmem:[%s10837_s7 + $0x310] sm:$0xff]  }
 0x56b   : > { %7125 = vmatpush3.bf16.msra.mxu0 %v8045_v35  ;;  %5611 = vmatprep.mubr.bf16.mxu0 %v3347_v59  ;;  %v8083_v35 = vld [vmem:[%s10837_s7 + $0x350] sm:$0xff]   ;;  %v8087_v59 = vld [vmem:[%s10837_s7 + $0x358] sm:$0xff]  }
 0x56c   : > { %5651 = vmatprep.mubr.bf16.mxu1 %v3349_v5  ;;  %7126 = vmatprep.subr.bf16.mxu0 %v8047_v52  ;;  %v8088_v52 = vld [vmem:[%s10837_s7 + $0x3d8] sm:$0xff]  }
 0x56d   : > { %7148 = vmatprep.subr.bf16.mxu1 %v8048_v13  ;;  %v8090_v13 = vld [vmem:[%s10837_s7 + $0x398] sm:$0xff]  }
 0x56e   : > { %7149 = vmatpush3.bf16.msra.mxu1 %v8050_v16  ;;  %v8089_v5 = vld [vmem:[%s10837_s7 + $0x318] sm:$0xff]   ;;  %v8092_v16 = vld [vmem:[%s10837_s7 + $0x3e0] sm:$0xff]  }
 0x56f   : > { %7127 = vmatpush3.bf16.msra.mxu0 %v8049_v11  ;;  %7150 = vmatprep.subr.bf16.mxu1 %v8052_v32  ;;  %v8091_v11 = vld [vmem:[%s10837_s7 + $0x360] sm:$0xff]  }
 0x570   : > { %7128 = vmatprep.subr.bf16.mxu0 %v8051_v41  ;;  %v8094_v32 = vld [vmem:[%s10837_s7 + $0x3a0] sm:$0xff]  }
 0x571   : > { %v8093_v41 = vld [vmem:[%s10837_s7 + $0x320] sm:$0xff]  }
 0x572   : > { %7151 = vmatpush3.bf16.msra.mxu1 %v8054_v17  ;;  %v8096_v17 = vld [vmem:[%s10837_s7 + $0x3e8] sm:$0xff]  }
 0x573   : > { %7129 = vmatpush3.bf16.msra.mxu0 %v8053_v42  ;;  %7152 = vmatprep.subr.bf16.mxu1 %v8056_v56  ;;  %v8095_v42 = vld [vmem:[%s10837_s7 + $0x368] sm:$0xff]  }
 0x574   : > { %7130 = vmatprep.subr.bf16.mxu0 %v8055_v50  ;;  %v8098_v56 = vld [vmem:[%s10837_s7 + $0x3a8] sm:$0xff]  }
 0x575   : > { %v8097_v50 = vld [vmem:[%s10837_s7 + $0x328] sm:$0xff]  }
 0x576   : > { %7153 = vmatpush3.bf16.msra.mxu1 %v8058_v6  ;;  %v8100_v6 = vld [vmem:[%s10837_s7 + $0x3f0] sm:$0xff]  }
 0x577   : > { %7131 = vmatpush3.bf16.msra.mxu0 %v8057_v26  ;;  %7154 = vmatprep.subr.bf16.mxu1 %v8060_v38  ;;  %v8099_v26 = vld [vmem:[%s10837_s7 + $0x370] sm:$0xff]  }
 0x578   : > { %7132 = vmatprep.subr.bf16.mxu0 %v8059_v45  ;;  %v8102_v38 = vld [vmem:[%s10837_s7 + $0x3b0] sm:$0xff]   ;;  %v10296_v45 = vpop.permute.xlu1 %7752 }
 0x57a   : > { %7155 = vmatpush3.bf16.msra.mxu1 %v8062_v9  ;;  %v8101_v9 = vld [vmem:[%s10837_s7 + $0x330] sm:$0xff]  }
 0x57b   : > { %7133 = vmatpush3.bf16.msra.mxu0 %v8061_v51  ;;  %7156 = vmatprep.subr.bf16.mxu1 %v8064_v20  ;;  %v8104_v51 = vld [vmem:[%s10837_s7 + $0x3f8] sm:$0xff]   ;;  %v7750_v20 = vunpack.i.h.bf16 %v10193_v10  ;;  %v8107_v10 = vld [vmem:[%s10837_s7 + $0x440] sm:$0xff]  }
 0x57c   : > { %7134 = vmatprep.subr.bf16.mxu0 %v8063_v24  ;;  %v10305_v24 = vpop.permute.xlu0 %7757 }
 0x57e   : > { %7157 = vmatpush3.bf16.msra.mxu1 %v8066_v53  ;;  %v8103_v53 = vld [vmem:[%s10837_s7 + $0x378] sm:$0xff]  }
 0x57f   : > { %7135 = vmatpush3.bf16.msra.mxu0 %v8065_v27  ;;  %7158 = vmatprep.subr.bf16.mxu1 %v8068_v33  ;;  %v7745_v27 = vunpack.i.h.bf16 %v10184_v15  ;;  %v3210_v33 = vrot.slane %v9921_v44, 4  ;;  %v8108_v15 = vld [vmem:[%s10837_s7 + $0x4c0] sm:$0xff]  }
 0x580   : > { %7136 = vmatprep.subr.bf16.mxu0 %v8067_v61  ;;  %v7754_v61 = vunpack.i.l.bf16 %v10296_v45 }
 0x581   : > { %v3228_v1 = vsel %vm1793_vm1, %v3210_v33, %v7750_v20  ;;  %v3226_v43 = vsel %vm1793_vm1, %v9921_v44, %v7745_v27  ;;  %v8111_v44 = vld [vmem:[%s10837_s7 + $0x448] sm:$0xff]   ;;  %v8139_v20 = vld [vmem:[%s10837_s7 + $0x540] sm:$0xff]   ;;  %v3270_v27 = vrot.slane %v9943_v8, 6 }
 0x582   : > { %7159 = vmatpush3.bf16.msra.mxu1 %v8070_v19  ;;  %v8106_v19 = vld [vmem:[%s10837_s7 + $0x3b8] sm:$0xff]   ;;  %v3352_v21 = vpack.c.bf16 %v3228_v1, %v3228_v1  ;;  %v3350_v62 = vpack.c.bf16 %v3226_v43, %v3226_v43  ;;  %v8146_v43 = vld [vmem:[%s10837_s7 + $0x588] sm:$0xff]  }
 0x583   : > { %7137 = vmatpush3.bf16.msra.mxu0 %v8069_v47  ;;  %7160 = vmatprep.subr.bf16.mxu1 %v8072_v14  ;;  %v7759_v47 = vunpack.i.l.bf16 %v10305_v24  ;;  %v8105_v14 = vld [vmem:[%s10837_s7 + $0x338] sm:$0xff]  }
 0x584   : > { %7138 = vmatprep.subr.bf16.mxu0 %v8071_v34  ;;  %v3235_v34 = vrot.slane %v9938_v3, 2 }
 0x586   : > { %7161 = vmatpush3.bf16.msra.mxu1 %v8074_v29  ;;  %v3277_v63 = vsel %vm1793_vm1, %v3235_v34, %v7754_v61  ;;  %v8110_v29 = vld [vmem:[%s10837_s7 + $0x480] sm:$0xff]  }
 0x587   : > { %7139 = vmatpush3.bf16.msra.mxu0 %v8073_v28  ;;  %7190 = vmatprep.subr.bf16.mxu1 %v8076_v54  ;;  %v8109_v28 = vld [vmem:[%s10837_s7 + $0x400] sm:$0xff]   ;;  %v3279_v54 = vsel %vm1793_vm1, %v3247_v7, %v7759_v47  ;;  %v8145_v7 = vld [vmem:[%s10837_s7 + $0x508] sm:$0xff]  }
 0x588   : > { %7168 = vmatprep.subr.bf16.mxu0 %v8075_v22  ;;  %v3355_v22 = vpack.c.bf16 %v3277_v63, %v3277_v63  ;;  %v3357_v25 = vpack.c.bf16 %v3279_v54, %v3279_v54  ;;  %v8142_v61 = vld [vmem:[%s10837_s7 + $0x580] sm:$0xff]   ;;  %v8148_v63 = vld [vmem:[%s10837_s7 + $0x5d0] sm:$0xff]   ;;  %v8152_v54 = vld [vmem:[%s10837_s7 + $0x5d8] sm:$0xff]  }
 0x589   : > { %5652 = vmatmul.mubr.bf16.vlgmr.msra.gmra.mrb[144].mxu1 %v3348_v40  ;;  %v8115_v40 = vld [vmem:[%s10837_s7 + $0x450] sm:$0xff]   ;;  %v8141_v47 = vld [vmem:[%s10837_s7 + $0x500] sm:$0xff]  }
 0x58a   : > { %5612 = vmatmul.mubr.bf16.vlgmr.msra.gmra.mrb[136].mxu0 %v3346_v60  ;;  %7191 = vmatpush3.bf16.msra.mxu1 %v8078_v36  ;;  %v8116_v36 = vld [vmem:[%s10837_s7 + $0x4d0] sm:$0xff]   ;;  %v8120_v60 = vld [vmem:[%s10837_s7 + $0x4d8] sm:$0xff]  }
 0x58b   : > { %7169 = vmatpush3.bf16.msra.mxu0 %v8077_v39  ;;  %5691 = vmatprep.mubr.bf16.mxu0 %v3351_v4  ;;  %v8118_v39 = vld [vmem:[%s10837_s7 + $0x490] sm:$0xff]   ;;  %v8122_v4 = vld [vmem:[%s10837_s7 + $0x498] sm:$0xff]  }
 0x58c   : > { %5731 = vmatprep.mubr.bf16.mxu1 %v3353_v49  ;;  %7170 = vmatprep.subr.bf16.mxu0 %v8079_v18  ;;  %v8119_v18 = vld [vmem:[%s10837_s7 + $0x458] sm:$0xff]   ;;  %v8124_v49 = vld [vmem:[%s10837_s7 + $0x4e0] sm:$0xff]  }
 0x58d   : > { %7192 = vmatprep.subr.bf16.mxu1 %v8080_v12  ;;  %v8121_v12 = vld [vmem:[%s10837_s7 + $0x418] sm:$0xff]  }
 0x58e   : > { %7193 = vmatpush3.bf16.msra.mxu1 %v8082_v37  ;;  %v8123_v37 = vld [vmem:[%s10837_s7 + $0x460] sm:$0xff]  }
 0x58f   : > { %7171 = vmatpush3.bf16.msra.mxu0 %v8081_v55  ;;  %7194 = vmatprep.subr.bf16.mxu1 %v8084_v58  ;;  %v8126_v55 = vld [vmem:[%s10837_s7 + $0x4a0] sm:$0xff]  }
 0x590   : > { %7172 = vmatprep.subr.bf16.mxu0 %v8083_v35  ;;  %v8125_v58 = vld [vmem:[%s10837_s7 + $0x420] sm:$0xff]   ;;  %v8128_v35 = vld [vmem:[%s10837_s7 + $0x4e8] sm:$0xff]  }
 0x592   : > { %7195 = vmatpush3.bf16.msra.mxu1 %v8086_v2  ;;  %v8127_v2 = vld [vmem:[%s10837_s7 + $0x468] sm:$0xff]  }
 0x593   : > { %7173 = vmatpush3.bf16.msra.mxu0 %v8085_v31  ;;  %7196 = vmatprep.subr.bf16.mxu1 %v8088_v52  ;;  %v8130_v31 = vld [vmem:[%s10837_s7 + $0x4a8] sm:$0xff]  }
 0x594   : > { %7174 = vmatprep.subr.bf16.mxu0 %v8087_v59  ;;  %v8129_v52 = vld [vmem:[%s10837_s7 + $0x428] sm:$0xff]   ;;  %v8132_v59 = vld [vmem:[%s10837_s7 + $0x4f0] sm:$0xff]  }
 0x596   : > { %7197 = vmatpush3.bf16.msra.mxu1 %v8090_v13  ;;  %v8131_v13 = vld [vmem:[%s10837_s7 + $0x470] sm:$0xff]  }
 0x597   : > { %7175 = vmatpush3.bf16.msra.mxu0 %v8089_v5  ;;  %7198 = vmatprep.subr.bf16.mxu1 %v8092_v16  ;;  %v8134_v5 = vld [vmem:[%s10837_s7 + $0x4b0] sm:$0xff]   ;;  %v10408_v16 = vpop.permute.xlu1 %7762 }
 0x598   : > { %7176 = vmatprep.subr.bf16.mxu0 %v8091_v11  ;;  %v8133_v11 = vld [vmem:[%s10837_s7 + $0x430] sm:$0xff]  }
 0x59a   : > { %7199 = vmatpush3.bf16.msra.mxu1 %v8094_v32  ;;  %v8136_v32 = vld [vmem:[%s10837_s7 + $0x4f8] sm:$0xff]  }
 0x59b   : > { %7177 = vmatpush3.bf16.msra.mxu0 %v8093_v41  ;;  %7200 = vmatprep.subr.bf16.mxu1 %v8096_v17  ;;  %v7760_v41 = vunpack.i.h.bf16 %v10305_v24  ;;  %v10417_v17 = vpop.permute.xlu0 %7767  ;;  %v3258_v24 = vrot.slane %v9943_v8, 2 }
 0x59c   : > { %7178 = vmatprep.subr.bf16.mxu0 %v8095_v42  ;;  %v8135_v42 = vld [vmem:[%s10837_s7 + $0x478] sm:$0xff]  }
 0x59e   : > { %7201 = vmatpush3.bf16.msra.mxu1 %v8098_v56  ;;  %v7755_v56 = vunpack.i.h.bf16 %v10296_v45  ;;  %v8140_v45 = vld [vmem:[%s10837_s7 + $0x5c0] sm:$0xff]  }
 0x59f   : > { %7179 = vmatpush3.bf16.msra.mxu0 %v8097_v50  ;;  %7202 = vmatprep.subr.bf16.mxu1 %v8100_v6  ;;  %v3241_v50 = vrot.slane %v9938_v3, 4  ;;  %v7764_v6 = vunpack.i.l.bf16 %v10408_v16 }
 0x5a0   : > { %7180 = vmatprep.subr.bf16.mxu0 %v8099_v26  ;;  %v8138_v26 = vld [vmem:[%s10837_s7 + $0x4b8] sm:$0xff]  }
 0x5a1   : > { %v3281_v33 = vsel %vm1793_vm1, %v3258_v24, %v7764_v6  ;;  %v8178_v24 = vld [vmem:[%s10837_s7 + $0x688] sm:$0xff]  }
 0x5a2   : > { %7203 = vmatpush3.bf16.msra.mxu1 %v8102_v38  ;;  %v7769_v38 = vunpack.i.l.bf16 %v10417_v17  ;;  %v3359_v1 = vpack.c.bf16 %v3281_v33, %v3281_v33  ;;  %v8179_v33 = vld [vmem:[%s10837_s7 + $0x650] sm:$0xff]  }
 0x5a3   : > { %7181 = vmatpush3.bf16.msra.mxu0 %v8101_v9  ;;  %7204 = vmatprep.subr.bf16.mxu1 %v8104_v51  ;;  %v8137_v9 = vld [vmem:[%s10837_s7 + $0x438] sm:$0xff]   ;;  %v3278_v51 = vsel %vm1793_vm1, %v3241_v50, %v7760_v41  ;;  %v3289_v41 = vrot.slane %v9960_v46, 2  ;;  %v8174_v50 = vld [vmem:[%s10837_s7 + $0x680] sm:$0xff]  }
 0x5a4   : > { %7182 = vmatprep.subr.bf16.mxu0 %v8103_v53  ;;  %v3276_v53 = vsel %vm1793_vm1, %v9938_v3, %v7755_v56  ;;  %v8143_v3 = vld [vmem:[%s10837_s7 + $0x548] sm:$0xff]  }
 0x5a6   : > { %7205 = vmatpush3.bf16.msra.mxu1 %v8106_v19  ;;  %v3356_v19 = vpack.c.bf16 %v3278_v51, %v3278_v51  ;;  %v8176_v51 = vld [vmem:[%s10837_s7 + $0x6c8] sm:$0xff]  }
 0x5a7   : > { %7183 = vmatpush3.bf16.msra.mxu0 %v8105_v14  ;;  %7234 = vmatprep.subr.bf16.mxu1 %v8108_v15  ;;  %v3283_v14 = vsel %vm1793_vm1, %v3270_v27, %v7769_v38  ;;  %v3354_v15 = vpack.c.bf16 %v3276_v53, %v3276_v53  ;;  %v8177_v53 = vld [vmem:[%s10837_s7 + $0x608] sm:$0xff]   ;;  %v8180_v27 = vld [vmem:[%s10837_s7 + $0x6d0] sm:$0xff]  }
 0x5a8   : > { %7212 = vmatprep.subr.bf16.mxu0 %v8107_v10  ;;  %v8144_v10 = vld [vmem:[%s10837_s7 + $0x5c8] sm:$0xff]   ;;  %v3361_v34 = vpack.c.bf16 %v3283_v14, %v3283_v14  ;;  %v8183_v14 = vld [vmem:[%s10837_s7 + $0x658] sm:$0xff]  }
 0x5a9   : > { %5732 = vmatmul.mubr.bf16.vlgmr.msra.gmra.mrb[148].mxu1 %v3352_v21  ;;  %v8150_v21 = vld [vmem:[%s10837_s7 + $0x590] sm:$0xff]  }
 0x5aa   : > { %5692 = vmatmul.mubr.bf16.vlgmr.msra.gmra.mrb[140].mxu0 %v3350_v62  ;;  %7235 = vmatpush3.bf16.msra.mxu1 %v8110_v29  ;;  %v8147_v29 = vld [vmem:[%s10837_s7 + $0x550] sm:$0xff]   ;;  %v8151_v62 = vld [vmem:[%s10837_s7 + $0x558] sm:$0xff]  }
 0x5ab   : > { %7213 = vmatpush3.bf16.msra.mxu0 %v8109_v28  ;;  %5771 = vmatprep.mubr.bf16.mxu0 %v3355_v22  ;;  %v8149_v28 = vld [vmem:[%s10837_s7 + $0x510] sm:$0xff]   ;;  %v8153_v22 = vld [vmem:[%s10837_s7 + $0x518] sm:$0xff]  }
 0x5ac   : > { %5811 = vmatprep.mubr.bf16.mxu1 %v3357_v25  ;;  %7214 = vmatprep.subr.bf16.mxu0 %v8111_v44  ;;  %v8154_v44 = vld [vmem:[%s10837_s7 + $0x598] sm:$0xff]   ;;  %v8155_v25 = vld [vmem:[%s10837_s7 + $0x560] sm:$0xff]  }
 0x5ad   : > { %7236 = vmatprep.subr.bf16.mxu1 %v8112_v30  ;;  %v8156_v30 = vld [vmem:[%s10837_s7 + $0x5e0] sm:$0xff]  }
 0x5ae   : > { %7237 = vmatpush3.bf16.msra.mxu1 %v8114_v48  ;;  %v8158_v48 = vld [vmem:[%s10837_s7 + $0x5a0] sm:$0xff]  }
 0x5af   : > { %7215 = vmatpush3.bf16.msra.mxu0 %v8113_v57  ;;  %7238 = vmatprep.subr.bf16.mxu1 %v8116_v36  ;;  %v8157_v57 = vld [vmem:[%s10837_s7 + $0x520] sm:$0xff]   ;;  %v8160_v36 = vld [vmem:[%s10837_s7 + $0x5e8] sm:$0xff]  }
 0x5b0   : > { %7216 = vmatprep.subr.bf16.mxu0 %v8115_v40  ;;  %v8159_v40 = vld [vmem:[%s10837_s7 + $0x568] sm:$0xff]  }
 0x5b2   : > { %7239 = vmatpush3.bf16.msra.mxu1 %v8118_v39  ;;  %v8162_v39 = vld [vmem:[%s10837_s7 + $0x5a8] sm:$0xff]  }
 0x5b3   : > { %7217 = vmatpush3.bf16.msra.mxu0 %v8117_v23  ;;  %7240 = vmatprep.subr.bf16.mxu1 %v8120_v60  ;;  %v8161_v23 = vld [vmem:[%s10837_s7 + $0x528] sm:$0xff]   ;;  %v8164_v60 = vld [vmem:[%s10837_s7 + $0x5f0] sm:$0xff]  }
 0x5b4   : > { %7218 = vmatprep.subr.bf16.mxu0 %v8119_v18  ;;  %v8163_v18 = vld [vmem:[%s10837_s7 + $0x570] sm:$0xff]  }
 0x5b6   : > { %7241 = vmatpush3.bf16.msra.mxu1 %v8122_v4  ;;  %v8166_v4 = vld [vmem:[%s10837_s7 + $0x5b0] sm:$0xff]  }
 0x5b7   : > { %7219 = vmatpush3.bf16.msra.mxu0 %v8121_v12  ;;  %7242 = vmatprep.subr.bf16.mxu1 %v8124_v49  ;;  %v10520_v12 = vpop.permute.xlu1 %7772  ;;  %v8165_v49 = vld [vmem:[%s10837_s7 + $0x530] sm:$0xff]  }
 0x5b8   : > { %7220 = vmatprep.subr.bf16.mxu0 %v8123_v37  ;;  %v8168_v37 = vld [vmem:[%s10837_s7 + $0x5f8] sm:$0xff]  }
 0x5ba   : > { %7243 = vmatpush3.bf16.msra.mxu1 %v8126_v55  ;;  %v7770_v55 = vunpack.i.h.bf16 %v10417_v17 }
 0x5bb   : > { %7221 = vmatpush3.bf16.msra.mxu0 %v8125_v58  ;;  %7244 = vmatprep.subr.bf16.mxu1 %v8128_v35  ;;  %v10529_v58 = vpop.permute.xlu0 %7777  ;;  %v8167_v35 = vld [vmem:[%s10837_s7 + $0x578] sm:$0xff]  }
 0x5bc   : > { %7222 = vmatprep.subr.bf16.mxu0 %v8127_v2  ;;  %v7765_v2 = vunpack.i.h.bf16 %v10408_v16  ;;  %v8172_v16 = vld [vmem:[%s10837_s7 + $0x6c0] sm:$0xff]  }
 0x5be   : > { %7245 = vmatpush3.bf16.msra.mxu1 %v8130_v31  ;;  %v3264_v31 = vrot.slane %v9943_v8, 4  ;;  %v3280_v17 = vsel %vm1793_vm1, %v9943_v8, %v7765_v2  ;;  %v8175_v8 = vld [vmem:[%s10837_s7 + $0x648] sm:$0xff]   ;;  %v8206_v2 = vld [vmem:[%s10837_s7 + $0x780] sm:$0xff]  }
 0x5bf   : > { %7223 = vmatpush3.bf16.msra.mxu0 %v8129_v52  ;;  %7246 = vmatprep.subr.bf16.mxu1 %v8132_v59  ;;  %v7774_v52 = vunpack.i.l.bf16 %v10520_v12  ;;  %v8170_v59 = vld [vmem:[%s10837_s7 + $0x5b8] sm:$0xff]  }
 0x5c0   : > { %7224 = vmatprep.subr.bf16.mxu0 %v8131_v13  ;;  %v7779_v13 = vunpack.i.l.bf16 %v10529_v58 }
 0x5c1   : > { %v3331_v56 = vsel %vm1793_vm1, %v3289_v41, %v7774_v52  ;;  %v8205_v52 = vld [vmem:[%s10837_s7 + $0x700] sm:$0xff]   ;;  %v8209_v41 = vld [vmem:[%s10837_s7 + $0x708] sm:$0xff]  }
 0x5c2   : > { %7247 = vmatpush3.bf16.msra.mxu1 %v8134_v5  ;;  %v8169_v5 = vld [vmem:[%s10837_s7 + $0x538] sm:$0xff]  }
 0x5c3   : > { %7225 = vmatpush3.bf16.msra.mxu0 %v8133_v11  ;;  %7248 = vmatprep.subr.bf16.mxu1 %v8136_v32  ;;  %v3282_v11 = vsel %vm1793_vm1, %v3264_v31, %v7770_v55  ;;  %v8171_v32 = vld [vmem:[%s10837_s7 + $0x640] sm:$0xff]  }
 0x5c4   : > { %7226 = vmatprep.subr.bf16.mxu0 %v8135_v42  ;;  %v3301_v42 = vrot.slane %v9960_v46, 6  ;;  %v3360_v6 = vpack.c.bf16 %v3282_v11, %v3282_v11 }
 0x5c6   : > { %7249 = vmatpush3.bf16.msra.mxu1 %v8138_v26  ;;  %v8173_v26 = vld [vmem:[%s10837_s7 + $0x600] sm:$0xff]   ;;  %v3333_v38 = vsel %vm1793_vm1, %v3301_v42, %v7779_v13  ;;  %v8211_v42 = vld [vmem:[%s10837_s7 + $0x750] sm:$0xff]  }
 0x5c7   : > { %7227 = vmatpush3.bf16.msra.mxu0 %v8137_v9  ;;  %7278 = vmatprep.subr.bf16.mxu1 %v8140_v45  ;;  %v3358_v9 = vpack.c.bf16 %v3280_v17, %v3280_v17  ;;  %v3363_v45 = vpack.c.bf16 %v3331_v56, %v3331_v56  ;;  %v8212_v17 = vld [vmem:[%s10837_s7 + $0x7d0] sm:$0xff]  }
 0x5c8   : > { %7256 = vmatprep.subr.bf16.mxu0 %v8139_v20  ;;  %v3365_v20 = vpack.c.bf16 %v3333_v38, %v3333_v38  ;;  %v8214_v56 = vld [vmem:[%s10837_s7 + $0x790] sm:$0xff]   ;;  %v8218_v38 = vld [vmem:[%s10837_s7 + $0x798] sm:$0xff]  }
 0x5c9   : > { %5812 = vmatmul.mubr.bf16.vlgmr.msra.gmra.mrb[152].mxu1 %v3356_v19  ;;  %v8181_v19 = vld [vmem:[%s10837_s7 + $0x610] sm:$0xff]  }
 0x5ca   : > { %5772 = vmatmul.mubr.bf16.vlgmr.msra.gmra.mrb[144].mxu0 %v3354_v15  ;;  %7279 = vmatpush3.bf16.msra.mxu1 %v8142_v61  ;;  %v8182_v61 = vld [vmem:[%s10837_s7 + $0x690] sm:$0xff]   ;;  %v8186_v15 = vld [vmem:[%s10837_s7 + $0x698] sm:$0xff]  }
 0x5cb   : > { %7257 = vmatpush3.bf16.msra.mxu0 %v8141_v47  ;;  %5851 = vmatprep.mubr.bf16.mxu0 %v3359_v1  ;;  %v8184_v47 = vld [vmem:[%s10837_s7 + $0x6d8] sm:$0xff]   ;;  %v8188_v1 = vld [vmem:[%s10837_s7 + $0x6e0] sm:$0xff]  }
 0x5cc   : > { %5891 = vmatprep.mubr.bf16.mxu1 %v3361_v34  ;;  %7258 = vmatprep.subr.bf16.mxu0 %v8143_v3  ;;  %v8185_v3 = vld [vmem:[%s10837_s7 + $0x618] sm:$0xff]   ;;  %v8190_v34 = vld [vmem:[%s10837_s7 + $0x6a0] sm:$0xff]  }
 0x5cd   : > { %7280 = vmatprep.subr.bf16.mxu1 %v8144_v10  ;;  %v8187_v10 = vld [vmem:[%s10837_s7 + $0x660] sm:$0xff]  }
 0x5ce   : > { %7281 = vmatpush3.bf16.msra.mxu1 %v8146_v43  ;;  %v8189_v43 = vld [vmem:[%s10837_s7 + $0x620] sm:$0xff]  }
 0x5cf   : > { %7259 = vmatpush3.bf16.msra.mxu0 %v8145_v7  ;;  %7282 = vmatprep.subr.bf16.mxu1 %v8148_v63  ;;  %v8192_v7 = vld [vmem:[%s10837_s7 + $0x6e8] sm:$0xff]  }
 0x5d0   : > { %7260 = vmatprep.subr.bf16.mxu0 %v8147_v29  ;;  %v8191_v63 = vld [vmem:[%s10837_s7 + $0x668] sm:$0xff]  }
 0x5d1   : > { %v8194_v29 = vld [vmem:[%s10837_s7 + $0x6a8] sm:$0xff]  }
 0x5d2   : > { %7283 = vmatpush3.bf16.msra.mxu1 %v8150_v21  ;;  %v8193_v21 = vld [vmem:[%s10837_s7 + $0x628] sm:$0xff]  }
 0x5d3   : > { %7261 = vmatpush3.bf16.msra.mxu0 %v8149_v28  ;;  %7284 = vmatprep.subr.bf16.mxu1 %v8152_v54  ;;  %v8196_v28 = vld [vmem:[%s10837_s7 + $0x6f0] sm:$0xff]  }
 0x5d4   : > { %7262 = vmatprep.subr.bf16.mxu0 %v8151_v62  ;;  %v8195_v54 = vld [vmem:[%s10837_s7 + $0x670] sm:$0xff]  }
 0x5d5   : > { %v8198_v62 = vld [vmem:[%s10837_s7 + $0x6b0] sm:$0xff]  }
 0x5d6   : > { %7285 = vmatpush3.bf16.msra.mxu1 %v8154_v44  ;;  %v10632_v44 = vpop.permute.xlu1 %7782 }
 0x5d7   : > { %7263 = vmatpush3.bf16.msra.mxu0 %v8153_v22  ;;  %7286 = vmatprep.subr.bf16.mxu1 %v8156_v30  ;;  %v8197_v22 = vld [vmem:[%s10837_s7 + $0x630] sm:$0xff]   ;;  %v8200_v30 = vld [vmem:[%s10837_s7 + $0x6f8] sm:$0xff]  }
 0x5d8   : > { %7264 = vmatprep.subr.bf16.mxu0 %v8155_v25  ;;  %v7780_v25 = vunpack.i.h.bf16 %v10529_v58  ;;  %v3324_v58 = vrot.slane %v9963_v0, 6 }
 0x5da   : > { %7287 = vmatpush3.bf16.msra.mxu1 %v8158_v48  ;;  %v10641_v48 = vpop.permute.xlu0 %7787 }
 0x5db   : > { %7265 = vmatpush3.bf16.msra.mxu0 %v8157_v57  ;;  %7288 = vmatprep.subr.bf16.mxu1 %v8160_v36  ;;  %v8199_v57 = vld [vmem:[%s10837_s7 + $0x678] sm:$0xff]   ;;  %v7775_v36 = vunpack.i.h.bf16 %v10520_v12 }
 0x5dc   : > { %7266 = vmatprep.subr.bf16.mxu0 %v8159_v40  ;;  %v3295_v40 = vrot.slane %v9960_v46, 4 }
 0x5dd   : > { %v3330_v55 = vsel %vm1793_vm1, %v9960_v46, %v7775_v36  ;;  %v8207_v46 = vld [vmem:[%s10837_s7 + $0x748] sm:$0xff]   ;;  %v8234_v36 = vld [vmem:[%s10837_s7 + $0x7b8] sm:$0xff]  }
 0x5de   : > { %7289 = vmatpush3.bf16.msra.mxu1 %v8162_v39  ;;  %v7784_v39 = vunpack.i.l.bf16 %v10632_v44  ;;  %v3332_v12 = vsel %vm1793_vm1, %v3295_v40, %v7780_v25  ;;  %v3362_v13 = vpack.c.bf16 %v3330_v55, %v3330_v55 }
 0x5df   : > { %7267 = vmatpush3.bf16.msra.mxu0 %v8161_v23  ;;  %7290 = vmatprep.subr.bf16.mxu1 %v8164_v60  ;;  %v8202_v23 = vld [vmem:[%s10837_s7 + $0x6b8] sm:$0xff]   ;;  %v7789_v60 = vunpack.i.l.bf16 %v10641_v48  ;;  %v3364_v31 = vpack.c.bf16 %v3332_v12, %v3332_v12 }
 0x5e0   : > { %7268 = vmatprep.subr.bf16.mxu0 %v8163_v18  ;;  %v8201_v18 = vld [vmem:[%s10837_s7 + $0x638] sm:$0xff]  }
 0x5e2   : > { %7291 = vmatpush3.bf16.msra.mxu1 %v8166_v4  ;;  %v8204_v4 = vld [vmem:[%s10837_s7 + $0x7c0] sm:$0xff]  }
 0x5e3   : > { %7269 = vmatpush3.bf16.msra.mxu0 %v8165_v49  ;;  %7292 = vmatprep.subr.bf16.mxu1 %v8168_v37  ;;  %v8203_v49 = vld [vmem:[%s10837_s7 + $0x740] sm:$0xff]   ;;  %v3312_v37 = vrot.slane %v9963_v0, 2 }
 0x5e4   : > { %7270 = vmatprep.subr.bf16.mxu0 %v8167_v35 }
 0x5e5   : > { %v3335_v35 = vsel %vm1793_vm1, %v3312_v37, %v7784_v39 }
 0x5e6   : > { %7293 = vmatpush3.bf16.msra.mxu1 %v8170_v59  ;;  %v3337_v59 = vsel %vm1793_vm1, %v3324_v58, %v7789_v60 }
 0x5e7   : > { %7271 = vmatpush3.bf16.msra.mxu0 %v8169_v5  ;;  %7322 = vmatprep.subr.bf16.mxu1 %v8172_v16  ;;  %v3367_v5 = vpack.c.bf16 %v3335_v35, %v3335_v35  ;;  %v8208_v16 = vld [vmem:[%s10837_s7 + $0x7c8] sm:$0xff]   ;;  %v3369_v11 = vpack.c.bf16 %v3337_v59, %v3337_v59 }
 0x5e8   : > { %7300 = vmatprep.subr.bf16.mxu0 %v8171_v32  ;;  %v8210_v32 = vld [vmem:[%s10837_s7 + $0x788] sm:$0xff]  }
 0x5e9   : > { %5892 = vmatmul.mubr.bf16.vlgmr.msra.gmra.mrb[156].mxu1 %v3360_v6  ;;  %v8216_v6 = vld [vmem:[%s10837_s7 + $0x7d8] sm:$0xff]  }
 0x5ea   : > { %5852 = vmatmul.mubr.bf16.vlgmr.msra.gmra.mrb[148].mxu0 %v3358_v9  ;;  %7323 = vmatpush3.bf16.msra.mxu1 %v8174_v50  ;;  %v8213_v50 = vld [vmem:[%s10837_s7 + $0x710] sm:$0xff]   ;;  %v8217_v9 = vld [vmem:[%s10837_s7 + $0x718] sm:$0xff]  }
 0x5eb   : > { %7301 = vmatpush3.bf16.msra.mxu0 %v8173_v26  ;;  %5931 = vmatprep.mubr.bf16.mxu0 %v3363_v45  ;;  %v8215_v26 = vld [vmem:[%s10837_s7 + $0x758] sm:$0xff]   ;;  %v8219_v45 = vld [vmem:[%s10837_s7 + $0x760] sm:$0xff]  }
 0x5ec   : > { %5971 = vmatprep.mubr.bf16.mxu1 %v3365_v20  ;;  %7302 = vmatprep.subr.bf16.mxu0 %v8175_v8  ;;  %v8220_v8 = vld [vmem:[%s10837_s7 + $0x7e0] sm:$0xff]  }
 0x5ed   : > { %7324 = vmatprep.subr.bf16.mxu1 %v8176_v51  ;;  %v8222_v51 = vld [vmem:[%s10837_s7 + $0x7a0] sm:$0xff]  }
 0x5ee   : > { %7325 = vmatpush3.bf16.msra.mxu1 %v8178_v24  ;;  %v8221_v20 = vld [vmem:[%s10837_s7 + $0x720] sm:$0xff]   ;;  %v8224_v24 = vld [vmem:[%s10837_s7 + $0x7e8] sm:$0xff]  }
 0x5ef   : > { %7303 = vmatpush3.bf16.msra.mxu0 %v8177_v53  ;;  %7326 = vmatprep.subr.bf16.mxu1 %v8180_v27  ;;  %v8223_v53 = vld [vmem:[%s10837_s7 + $0x768] sm:$0xff]  }
 0x5f0   : > { %7304 = vmatprep.subr.bf16.mxu0 %v8179_v33  ;;  %v8226_v27 = vld [vmem:[%s10837_s7 + $0x7a8] sm:$0xff]  }
 0x5f1   : > { %v8225_v33 = vld [vmem:[%s10837_s7 + $0x728] sm:$0xff]  }
 0x5f2   : > { %7327 = vmatpush3.bf16.msra.mxu1 %v8182_v61  ;;  %v8228_v61 = vld [vmem:[%s10837_s7 + $0x7f0] sm:$0xff]  }
 0x5f3   : > { %7305 = vmatpush3.bf16.msra.mxu0 %v8181_v19  ;;  %7328 = vmatprep.subr.bf16.mxu1 %v8184_v47  ;;  %v8227_v47 = vld [vmem:[%s10837_s7 + $0x770] sm:$0xff]  }
 0x5f4   : > { %7306 = vmatprep.subr.bf16.mxu0 %v8183_v14 }
 0x5f6   : > { %7329 = vmatpush3.bf16.msra.mxu1 %v8186_v15 }
 0x5f7   : > { %7307 = vmatpush3.bf16.msra.mxu0 %v8185_v3  ;;  %7330 = vmatprep.subr.bf16.mxu1 %v8188_v1  ;;  %v3882_v3 = vld [vmem:[%s10838_s8] sm:$0x1] }
 0x5f8   : > { %7308 = vmatprep.subr.bf16.mxu0 %v8187_v10 }
 0x5fa   : > { %7331 = vmatpush3.bf16.msra.mxu1 %v8190_v34 }
 0x5fb   : > { %7309 = vmatpush3.bf16.msra.mxu0 %v8189_v43  ;;  %7332 = vmatprep.subr.bf16.mxu1 %v8192_v7  ;;  %v8230_v43 = vld [vmem:[%s10837_s7 + $0x7b0] sm:$0xff]  }
 0x5fc   : > { %7310 = vmatprep.subr.bf16.mxu0 %v8191_v63 }
 0x5fe   : > { %7333 = vmatpush3.bf16.msra.mxu1 %v8194_v29 }
 0x5ff   : > { %7311 = vmatpush3.bf16.msra.mxu0 %v8193_v21  ;;  %7334 = vmatprep.subr.bf16.mxu1 %v8196_v28  ;;  %v8229_v21 = vld [vmem:[%s10837_s7 + $0x730] sm:$0xff]   ;;  %v8232_v28 = vld [vmem:[%s10837_s7 + $0x7f8] sm:$0xff]  }
 0x600   : > { %7312 = vmatprep.subr.bf16.mxu0 %v8195_v54  ;;  %v7790_v54 = vunpack.i.h.bf16 %v10641_v48  ;;  %v8233_v48 = vld [vmem:[%s10837_s7 + $0x738] sm:$0xff]  }
 0x602   : > { %7335 = vmatpush3.bf16.msra.mxu1 %v8198_v62 }
 0x603   : > { %7313 = vmatpush3.bf16.msra.mxu0 %v8197_v22  ;;  %7336 = vmatprep.subr.bf16.mxu1 %v8200_v30  ;;  %v8231_v22 = vld [vmem:[%s10837_s7 + $0x778] sm:$0xff]   ;;  %v7785_v30 = vunpack.i.h.bf16 %v10632_v44 }
 0x604   : > { %7314 = vmatprep.subr.bf16.mxu0 %v8199_v57  ;;  %v3318_v57 = vrot.slane %v9963_v0, 4 }
 0x605   : > { %v3334_v44 = vsel %vm1793_vm1, %v9963_v0, %v7785_v30 }
 0x606   : > { %7337 = vmatpush3.bf16.msra.mxu1 %v8202_v23  ;;  %v3336_v39 = vsel %vm1793_vm1, %v3318_v57, %v7790_v54  ;;  %v3366_v60 = vpack.c.bf16 %v3334_v44, %v3334_v44 }
 0x607   : > { %7315 = vmatpush3.bf16.msra.mxu0 %v8201_v18  ;;  %7366 = vmatprep.subr.bf16.mxu1 %v8204_v4  ;;  %v3368_v23 = vpack.c.bf16 %v3336_v39, %v3336_v39 }
 0x608   : > { %7344 = vmatprep.subr.bf16.mxu0 %v8203_v49 }
 0x609   : > { %5972 = vmatmul.mubr.bf16.vlgmr.msra.gmra.mrb[160].mxu1 %v3364_v31 }
 0x60a   : > { %5932 = vmatmul.mubr.bf16.vlgmr.msra.gmra.mrb[152].mxu0 %v3362_v13  ;;  %7367 = vmatpush3.bf16.msra.mxu1 %v8206_v2 }
 0x60b   : > { %7345 = vmatpush3.bf16.msra.mxu0 %v8205_v52  ;;  %6011 = vmatprep.mubr.bf16.mxu0 %v3367_v5 }
 0x60c   : > { %6051 = vmatprep.mubr.bf16.mxu1 %v3369_v11  ;;  %7346 = vmatprep.subr.bf16.mxu0 %v8207_v46 }
 0x60d   : > { %7368 = vmatprep.subr.bf16.mxu1 %v8208_v16 }
 0x60e   : > { %7369 = vmatpush3.bf16.msra.mxu1 %v8210_v32 }
 0x60f   : > { %7347 = vmatpush3.bf16.msra.mxu0 %v8209_v41  ;;  %7370 = vmatprep.subr.bf16.mxu1 %v8212_v17 }
 0x610   : > { %7348 = vmatprep.subr.bf16.mxu0 %v8211_v42 }
 0x612   : > { %7371 = vmatpush3.bf16.msra.mxu1 %v8214_v56 }
 0x613   : > { %7349 = vmatpush3.bf16.msra.mxu0 %v8213_v50  ;;  %7372 = vmatprep.subr.bf16.mxu1 %v8216_v6 }
 0x614   : > { %7350 = vmatprep.subr.bf16.mxu0 %v8215_v26 }
 0x616   : > { %7373 = vmatpush3.bf16.msra.mxu1 %v8218_v38 }
 0x617   : > { %7351 = vmatpush3.bf16.msra.mxu0 %v8217_v9  ;;  %7374 = vmatprep.subr.bf16.mxu1 %v8220_v8 }
 0x618   : > { %7352 = vmatprep.subr.bf16.mxu0 %v8219_v45 }
 0x61a   : > { %7375 = vmatpush3.bf16.msra.mxu1 %v8222_v51 }
 0x61b   : > { %7353 = vmatpush3.bf16.msra.mxu0 %v8221_v20  ;;  %7376 = vmatprep.subr.bf16.mxu1 %v8224_v24 }
 0x61c   : > { %v7074_v19 = vpop.f32.mrb[136].mxu1  ;;  %7354 = vmatprep.subr.bf16.mxu0 %v8223_v53  ;;  %v6060_v53 = vld [vmem:[%s10839_s9] sm:$0xff] }
 0x61d   : > { %v7052_v14 = vpop.f32.mrb[128].mxu0  ;;  %v7075_v15 = vpop.f32.mrb[137].mxu1 }
 0x61e   : > { %v7053_v1 = vpop.f32.mrb[129].mxu0  ;;  %v7076_v10 = vadd.f32 %v7075_v15, %v7074_v19  ;;  %7377 = vmatpush3.bf16.msra.mxu1 %v8226_v27  ;;  %v7077_v34 = vpop.f32.mrb[138].mxu1  ;;  %v6061_v27 = vld [vmem:[%s10839_s9 + $0x8] sm:$0xff]  ;;  %v6062_v15 = vld [vmem:[%s10839_s9 + $0x10] sm:$0xff] }
 0x61f   : > { %v7054_v7 = vadd.f32 %v7053_v1, %v7052_v14  ;;  %7355 = vmatpush3.bf16.msra.mxu0 %v8225_v33  ;;  %v7055_v63 = vpop.f32.mrb[130].mxu0  ;;  %v7078_v29 = vpop.f32.mrb[139].mxu1  ;;  %7378 = vmatprep.subr.bf16.mxu1 %v8228_v61  ;;  %v7485_v61 = vpack.c.bf16 %v6061_v27, %v6060_v53 }
 0x620   : > { %v7056_v62 = vpop.f32.mrb[131].mxu0  ;;  %7356 = vmatprep.subr.bf16.mxu0 %v8227_v47  ;;  %v8303_v47 = vmov 0.0|0.0  }
 0x621   : > { %v5454_v25 = vadd.f32 %v7054_v7, %v3882_v3  ;;  %v6063_v3 = vld [vmem:[%s10839_s9 + $0x18] sm:$0xff] }
 0x622   : > { %7379 = vmatpush3.bf16.msra.mxu1 %v8230_v43  ;;  %v7488_v1 = vpack.c.bf16 %v6063_v3, %v6062_v15 }
 0x623   : > { %v5494_v40 = vadd.f32 %v7076_v10, %v5454_v25  ;;  %7357 = vmatpush3.bf16.msra.mxu0 %v8229_v21  ;;  %7380 = vmatprep.subr.bf16.mxu1 %v8232_v28  ;;  %v8305_v10 = vmov 0.0  }
 0x624   : > { %7358 = vmatprep.subr.bf16.mxu0 %v8231_v22 }
 0x626   : > { %7381 = vmatpush3.bf16.msra.mxu1 %v8234_v36 }
 0x627   : > { %7359 = vmatpush3.bf16.msra.mxu0 %v8233_v48 }
 0x628   : > { %7484 = vmatprep.subr.bf16.mxu0 %v8303_v47 }
 0x629   : > { %6052 = vmatmul.mubr.bf16.vlgmr.msra.gmra.mrb[164].mxu1 %v3368_v23 }
 0x62a   : > { %6012 = vmatmul.mubr.bf16.vlgmr.msra.gmra.mrb[156].mxu0 %v3366_v60 }
 0x62b   : > { %7486 = vmatpush3.bf16.msra.mxu0 %v7485_v61  ;;  %7481 = vmatprep.mubr.msk.f32.mxu0 %vm8304_vm6, %v8305_v10 }
 0x62c   : > { %7487 = vmatprep.subr.bf16.mxu0 %v8303_v47 }
 0x62f   : > { %7489 = vmatpush3.bf16.msra.mxu0 %v7488_v1 }
 0x63c   : > { %v7118_v18 = vpop.f32.mrb[140].mxu1 }
 0x63d   : > { %v7096_v4 = vpop.f32.mrb[132].mxu0  ;;  %v7119_v12 = vpop.f32.mrb[141].mxu1 }
 0x63e   : > { %v7097_v49 = vpop.f32.mrb[133].mxu0  ;;  %v7120_v37 = vadd.f32 %v7119_v12, %v7118_v18  ;;  %v7121_v55 = vpop.f32.mrb[142].mxu1 }
 0x63f   : > { %v7098_v58 = vadd.f32 %v7097_v49, %v7096_v4  ;;  %v7099_v35 = vpop.f32.mrb[134].mxu0  ;;  %v7122_v2 = vpop.f32.mrb[143].mxu1 }
 0x640   : > { %v7100_v31 = vpop.f32.mrb[135].mxu0 }
 0x641   : > { %v5534_v52 = vadd.f32 %v7098_v58, %v5494_v40 }
 0x643   : > { %v5574_v59 = vadd.f32 %v7120_v37, %v5534_v52 }
 0x65c   : > { %v7162_v13 = vpop.f32.mrb[144].mxu1 }
 0x65d   : > { %v7140_v0 = vpop.f32.mrb[136].mxu0  ;;  %v7163_v46 = vpop.f32.mrb[145].mxu1 }
 0x65e   : > { %v7141_v5 = vpop.f32.mrb[137].mxu0  ;;  %v7164_v16 = vadd.f32 %v7163_v46, %v7162_v13  ;;  %v7165_v11 = vpop.f32.mrb[146].mxu1 }
 0x65f   : > { %v7142_v32 = vadd.f32 %v7141_v5, %v7140_v0  ;;  %v7143_v41 = vpop.f32.mrb[138].mxu0  ;;  %v7166_v17 = vpop.f32.mrb[147].mxu1 }
 0x660   : > { %v7144_v42 = vpop.f32.mrb[139].mxu0 }
 0x661   : > { %v5614_v56 = vadd.f32 %v7142_v32, %v5574_v59 }
 0x663   : > { %v5654_v50 = vadd.f32 %v7164_v16, %v5614_v56 }
 0x67c   : > { %v7206_v6 = vpop.f32.mrb[148].mxu1 }
 0x67d   : > { %v7184_v26 = vpop.f32.mrb[140].mxu0  ;;  %v7207_v38 = vpop.f32.mrb[149].mxu1 }
 0x67e   : > { %v7185_v9 = vpop.f32.mrb[141].mxu0  ;;  %v7208_v8 = vadd.f32 %v7207_v38, %v7206_v6  ;;  %v7209_v45 = vpop.f32.mrb[150].mxu1 }
 0x67f   : > { %v7186_v51 = vadd.f32 %v7185_v9, %v7184_v26  ;;  %v7187_v20 = vpop.f32.mrb[142].mxu0  ;;  %v7210_v24 = vpop.f32.mrb[151].mxu1  ;;  %v6064_v45 = vld [vmem:[%s10840_s10] sm:$0x1] }
 0x680   : > { %v7188_v33 = vpop.f32.mrb[143].mxu0 }
 0x681   : > { %v5694_v19 = vadd.f32 %v7186_v51, %v5654_v50 }
 0x683   : > { %v5734_v14 = vadd.f32 %v7208_v8, %v5694_v19 }
 0x69c   : > { %v7250_v34 = vpop.f32.mrb[152].mxu1 }
 0x69d   : > { %v7228_v43 = vpop.f32.mrb[144].mxu0  ;;  %v7251_v7 = vpop.f32.mrb[153].mxu1 }
 0x69e   : > { %v7229_v63 = vpop.f32.mrb[145].mxu0  ;;  %v7252_v29 = vadd.f32 %v7251_v7, %v7250_v34  ;;  %v7253_v21 = vpop.f32.mrb[154].mxu1 }
 0x69f   : > { %v7230_v28 = vadd.f32 %v7229_v63, %v7228_v43  ;;  %v7231_v54 = vpop.f32.mrb[146].mxu0  ;;  %v7254_v62 = vpop.f32.mrb[155].mxu1 }
 0x6a0   : > { %v7232_v22 = vpop.f32.mrb[147].mxu0 }
 0x6a1   : > { %v5774_v30 = vadd.f32 %v7230_v28, %v5734_v14 }
 0x6a3   : > { %v5814_v25 = vadd.f32 %v7252_v29, %v5774_v30 }
 0x6bc   : > { %v7294_v57 = vpop.f32.mrb[156].mxu1 }
 0x6bd   : > { %v7272_v36 = vpop.f32.mrb[148].mxu0  ;;  %v7295_v40 = vpop.f32.mrb[157].mxu1 }
 0x6be   : > { %v7273_v48 = vpop.f32.mrb[149].mxu0  ;;  %v7296_v39 = vadd.f32 %v7295_v40, %v7294_v57  ;;  %v7297_v44 = vpop.f32.mrb[158].mxu1 }
 0x6bf   : > { %v7274_v23 = vadd.f32 %v7273_v48, %v7272_v36  ;;  %v7275_v60 = vpop.f32.mrb[150].mxu0  ;;  %v7298_v18 = vpop.f32.mrb[159].mxu1 }
 0x6c0   : > { %v7276_v4 = vpop.f32.mrb[151].mxu0 }
 0x6c1   : > { %v5854_v12 = vadd.f32 %v7274_v23, %v5814_v25 }
 0x6c3   : > { %v5894_v49 = vadd.f32 %v7296_v39, %v5854_v12 }
 0x6dc   : > { %v7338_v37 = vpop.f32.mrb[160].mxu1 }
 0x6dd   : > { %v7316_v55 = vpop.f32.mrb[152].mxu0  ;;  %v7339_v58 = vpop.f32.mrb[161].mxu1 }
 0x6de   : > { %v7317_v35 = vpop.f32.mrb[153].mxu0  ;;  %v7340_v2 = vadd.f32 %v7339_v58, %v7338_v37  ;;  %v7341_v31 = vpop.f32.mrb[162].mxu1 }
 0x6df   : > { %v7318_v52 = vadd.f32 %v7317_v35, %v7316_v55  ;;  %v7319_v59 = vpop.f32.mrb[154].mxu0  ;;  %v7342_v13 = vpop.f32.mrb[163].mxu1 }
 0x6e0   : > { %v7320_v0 = vpop.f32.mrb[155].mxu0 }
 0x6e1   : > { %v5934_v46 = vadd.f32 %v7318_v52, %v5894_v49 }
 0x6e3   : > { %v5974_v5 = vadd.f32 %v7340_v2, %v5934_v46 }
 0x6fc   : > { %v7382_v16 = vpop.f32.mrb[164].mxu1 }
 0x6fd   : > { %v7360_v11 = vpop.f32.mrb[156].mxu0  ;;  %v7383_v32 = vpop.f32.mrb[165].mxu1 }
 0x6fe   : > { %v7361_v41 = vpop.f32.mrb[157].mxu0  ;;  %v7384_v17 = vadd.f32 %v7383_v32, %v7382_v16  ;;  %v7385_v42 = vpop.f32.mrb[166].mxu1 }
 0x6ff   : > { %v7362_v56 = vadd.f32 %v7361_v41, %v7360_v11  ;;  %v7363_v50 = vpop.f32.mrb[158].mxu0  ;;  %v7386_v6 = vpop.f32.mrb[167].mxu1 }
 0x700   : > { %v7364_v26 = vpop.f32.mrb[159].mxu0 }
 0x701   : > { %v6014_v38 = vadd.f32 %v7362_v56, %v5974_v5 }
 0x703   : > { %v6054_v9 = vadd.f32 %v7384_v17, %v6014_v38 }
 0x705   : > { %v6059_v8 = vmax.f32 %v6054_v9, 0.0 }
 0x707   : > { %7482 = vmatmul.mubr.msk.f32.vlgmr.msra.gmra.mrb[160].mxu0 %vm6065_vm7, %v6059_v8 }
 0x7da   : > { %v6135_v51 = vpop.f32.mrb[160].mxu0 }
 0x7db   : > { %v6136_v20 = vadd.f32 %v6135_v51, %v6064_v45  ;;  %v7483_v24 = vpop.f32.mrb[161].mxu0 }
 0x7dd   : > { %6139 = vst [vmem:[%s378_s12] sm:$0x1] %v6136_v20 }
 0x7de   : > { %8249 = shalt.err (!%p8246_p3)
}
 0x7df   : > { %s8250_s16 = scalar_lea.hbm %s10788_s14, 16  ;;  %s8254_s29 = scalar_lea.hbm %s10841_s11, 32 }
 0x7e0   : > { %p8251_p4 = scmp.ne.s32.totalorder %s10788_s14, %s8250_s16  ;;  %p8255_p9 = scmp.lt.u32.totalorder %s10788_s14, %s10841_s11 }
 0x7e1   : > { %p8256_p10 = scmp.lt.u32.totalorder %s8254_s29, %s8250_s16  ;;  %p8258_p12 = scmp.lt.u32.totalorder %s8250_s16, %s10788_s14 }
 0x7e2   : > { %p8252_p7 = pnand %p8251_p4, %p8405_p5 }
 0x7e3   : > { %p8257_p11 = por %p8256_p10, %p8255_p9 }
 0x7e4   : > { %p8253_p8 = pneg %p8252_p7 }
 0x7e5   : > { %p8259_p13 = por %p8258_p12, %p8257_p11 }
 0x7e7   : > { %p8260_p0 = pnand %p8259_p13, %p8253_p8 }
 0x7e9   : > { %8263 = shalt.err (!%p8260_p0)
}
 0x7ea   : > { %7491 = dma.vmem_to_hbm [thread:$0]  (%p8405_p5), %s10790_s30, 16, %s10788_s14, %s6141_s15  }
 0x7eb PF: > { %p7497_p1 = scmp.ge.s32.totalorder %s8298_s20, 2  ;;  %s6165_s13 = sand.u32 1, %s8286_s17  }
 0x7ec   : > { %s6166_s0 = scalar_lea.sflag [#allocation3], %s6165_s13 }
 0x7ed   : > { %p7494_p2 = pnand %p7497_p1, %p8409_p6 }
 0x7ef   : > { %8281 = dma.done.wait (!%p7494_p2), %s6166_s0, 16  }
 0x7f0   : > { %8283 = vsyncadd (!%p7494_p2), %s6166_s0, 4294967280  ;;  %s10920_s21 = sld [smem:[#allocation5_spill]]  ;;  %p21_p3 = scmp.ge.s32.totalorder %s8392_s23, 4  }
 0x7f1   : > { %s10921_s17 = smov %s8290_s18  ;;  %s10922_s18 = smov %s8294_s19 }
 0x7f2   : > { %s10924_s20 = smov %s8392_s23  ;;  %23 = sbr.rel (!%p21_p3) target bundleno = 6 (0x6), region = 99 }
 0x7f6   : > { %s10923_s19 = smov %s10920_s21 }
 0x7f9   :  { %6170 = vsyncpa [#allocation3], 1 }
 0x7fa   :  { %6172 = vsyncpa [#allocation3 + $0x1], 1 }

</bundles_post_ra>
